<compile_context>
chip_gen: v5e
topology: v5e:2x2
jax: 0.10.0
libtpu: 0.0.40
codegen_flags: <defaults>
</compile_context>

<pallas_src>
import math
from functools import partial

import numpy as np
import jax
import jax.numpy as jnp
from jax import lax
from jax.experimental import pallas as pl
from jax.experimental.pallas import tpu as pltpu

LN_EPS = 1e-6   # partial(nn.LayerNorm, eps=1e-06)
BN_EPS = 1e-5   # nn.BatchNorm2d default


def _layernorm(x, g, b):
    mu = jnp.mean(x, axis=-1, keepdims=True)
    var = jnp.mean((x - mu) ** 2, axis=-1, keepdims=True)
    return (x - mu) * lax.rsqrt(var + LN_EPS) * g + b


def _gelu(x):
    # exact (erf-based) GELU, matching nn.GELU()
    return 0.5 * x * (1.0 + lax.erf(x * (1.0 / math.sqrt(2.0))))


# ----------------------------------------------------------------------------
# Fused kernel: one grid step = one transformer block applied to one batch row.
#   grid = (B, depth); the output block (resident across the depth axis) holds
#   the residual stream.
# ----------------------------------------------------------------------------
def transformer_block_kernel(
        x_ref, shift_ref,
        ln1_g_ref, ln1_b_ref, qkv_w_ref, qkv_b_ref, proj_w_ref, proj_b_ref,
        ln2_g_ref, ln2_b_ref, fc1_w_ref, fc1_b_ref, dw_w_ref, dw_b_ref,
        fc2_w_ref, fc2_b_ref,
        out_ref, *, num_heads, scale):
    d = pl.program_id(1)

    # Initialize the resident residual stream from the input at the first block.
    @pl.when(d == 0)
    def _():
        out_ref[...] = x_ref[...]

    x = out_ref[...]                                    # (N, C) f32
    N, C = x.shape
    hd = C // num_heads

    # ---- x = x + proj(MHA(LN1(x))) -----------------------------------------
    xn = _layernorm(x, ln1_g_ref[...], ln1_b_ref[...])
    qkv = jnp.dot(xn.astype(jnp.bfloat16), qkv_w_ref[...],
                  preferred_element_type=jnp.float32) + qkv_b_ref[...]   # (N, 3C)
    proj_w = proj_w_ref[...]                            # (C, C) bf16
    attn = jnp.zeros((N, C), jnp.float32)
    for h in range(num_heads):                          # static loop, proj folded in
        q = qkv[:, h * hd:(h + 1) * hd]
        k = qkv[:, C + h * hd:C + (h + 1) * hd]
        v = qkv[:, 2 * C + h * hd:2 * C + (h + 1) * hd]
        # q @ k^T without an explicit transpose (contract dim 1 of both)
        s = lax.dot_general(q, k, (((1,), (1,)), ((), ())),
                            preferred_element_type=jnp.float32) * scale
        s = s - jnp.max(s, axis=-1, keepdims=True)
        p = jnp.exp(s)
        p = p * pl.reciprocal(jnp.sum(p, axis=-1, keepdims=True), approx=True)
        ho = jnp.dot(p, v, preferred_element_type=jnp.float32)          # (N, hd)
        attn = attn + jnp.dot(ho.astype(jnp.bfloat16),
                              proj_w[h * hd:(h + 1) * hd, :],
                              preferred_element_type=jnp.float32)
    x = x + attn + proj_b_ref[...]

    # ---- x = x + MLP(LN2(x))   (BatchNorms already folded into fc1/dw/fc2) --
    xn = _layernorm(x, ln2_g_ref[...], ln2_b_ref[...])
    h1 = jnp.dot(xn.astype(jnp.bfloat16), fc1_w_ref[...],
                 preferred_element_type=jnp.float32) + fc1_b_ref[...]    # (N, hid)
    h1 = _gelu(h1)
    hid = h1.shape[-1]

    # Depthwise 3x3 conv, padding=1, entirely in registers.  Spatial shifts of
    # the row-major-flattened (H*W, hid) activation are realized with small 0/1
    # permutation matrices (column shifts carry the zero-padding border masks,
    # row shifts are whole-row moves).  conv = sum_dh R_dh @ (sum_dw (S_dw@h)*w)
    dw_w = dw_w_ref[...]                                # (9, hid) f32, bn2 folded
    col_m = jnp.dot(shift_ref[0], h1, preferred_element_type=jnp.float32)  # dw=-1
    col_p = jnp.dot(shift_ref[1], h1, preferred_element_type=jnp.float32)  # dw=+1
    cols = (col_m, h1, col_p)                           # dw = -1, 0, +1
    conv = jnp.zeros((N, hid), jnp.float32)
    for di, rmat_idx in ((0, 2), (1, None), (2, 3)):    # dh = di - 1
        z = (cols[0] * dw_w[di * 3 + 0:di * 3 + 1, :]
             + cols[1] * dw_w[di * 3 + 1:di * 3 + 2, :]
             + cols[2] * dw_w[di * 3 + 2:di * 3 + 3, :])
        if rmat_idx is None:
            conv = conv + z
        else:
            conv = conv + jnp.dot(shift_ref[rmat_idx], z,
                                  preferred_element_type=jnp.float32)
    conv = _gelu(conv + dw_b_ref[...])

    y = jnp.dot(conv.astype(jnp.bfloat16), fc2_w_ref[...],
                preferred_element_type=jnp.float32) + fc2_b_ref[...]
    out_ref[...] = x + y


# ----------------------------------------------------------------------------
# Shift (permutation) matrices for the depthwise conv, built host-side.
# ----------------------------------------------------------------------------
def _make_shift_mats(H, W):
    """Stack of 4 (N,N) 0/1 matrices acting on row-major flattened (H,W) tokens:
       [0] column shift dw=-1, [1] column shift dw=+1 (border-masked),
       [2] row shift dh=-1,    [3] row shift dh=+1."""
    N = H * W
    n = np.arange(N)
    col = n % W

    def shift_mat(delta, valid):
        m = np.zeros((N, N), np.float32)
        src = n + delta
        ok = valid & (src >= 0) & (src < N)
        m[n[ok], src[ok]] = 1.0
        return m

    mats = [
        shift_mat(-1, col - 1 >= 0),        # dw = -1
        shift_mat(+1, col + 1 <= W - 1),    # dw = +1
        shift_mat(-W, np.ones(N, bool)),    # dh = -1
        shift_mat(+W, np.ones(N, bool)),    # dh = +1
    ]
    return jnp.asarray(np.stack(mats, axis=0))


# ----------------------------------------------------------------------------
# pallas_call wrapper: one call for the full depth loop.
# ----------------------------------------------------------------------------
def transformer_forward(x_nchw, fused, *, num_heads):
    B, C, H, W = x_nchw.shape
    N = H * W
    hd = C // num_heads
    scale = hd ** (-0.5)
    depth = fused["qkv_w"].shape[0]

    # rearrange 'b c h w -> b (h w) c'
    x = jnp.transpose(x_nchw, (0, 2, 3, 1)).reshape(B, N, C)
    shift_mats = _make_shift_mats(H, W)

    state_map = lambda b, d: (b, 0, 0)   # residual stream: resident per batch row
    wmap = lambda b, d: (d, 0, 0)        # per-block weights: streamed over depth
    const3 = lambda b, d: (0, 0, 0)      # constants: resident

    names = ["ln1_g", "ln1_b", "qkv_w", "qkv_b", "proj_w", "proj_b",
             "ln2_g", "ln2_b", "fc1_w", "fc1_b", "dw_w", "dw_b",
             "fc2_w", "fc2_b"]
    plist = [fused[k] for k in names]

    out = pl.pallas_call(
        partial(transformer_block_kernel, num_heads=num_heads, scale=scale),
        out_shape=jax.ShapeDtypeStruct((B, N, C), jnp.float32),
        grid=(B, depth),
        in_specs=[pl.BlockSpec((None, N, C), state_map),
                  pl.BlockSpec((4, N, N), const3)]
                 + [pl.BlockSpec((None,) + t.shape[1:], wmap) for t in plist],
        out_specs=pl.BlockSpec((None, N, C), state_map),
        compiler_params=pltpu.CompilerParams(
            dimension_semantics=("parallel", "arbitrary")),
    )(x, shift_mats, *plist)

    # rearrange 'b (h w) c -> b c h w'
    return jnp.transpose(out.reshape(B, H, W, C), (0, 3, 1, 2))


# ----------------------------------------------------------------------------
# Deterministic synthetic parameters (PyTorch layouts transposed to (in, out))
# ----------------------------------------------------------------------------
def init_params(key, depth, dim, mlp_ratio):
    hidden = int(dim * mlp_ratio)

    def bn_scale_shift(kg, kb, km, kv, n):
        gamma = 1.0 + 0.1 * jax.random.normal(kg, (1, n), jnp.float32)
        beta = 0.1 * jax.random.normal(kb, (1, n), jnp.float32)
        mean = 0.1 * jax.random.normal(km, (1, n), jnp.float32)
        var = 0.5 + jax.random.uniform(kv, (1, n), jnp.float32)
        s = gamma * lax.rsqrt(var + BN_EPS)
        t = beta - mean * s
        return s, t

    blocks = []
    for _ in range(depth):
        key, *ks = jax.random.split(key, 32)
        p = {}
        p["ln1_g"] = 1.0 + 0.1 * jax.random.normal(ks[0], (1, dim))
        p["ln1_b"] = 0.1 * jax.random.normal(ks[1], (1, dim))
        p["qkv_w"] = 0.06 * jax.random.normal(ks[2], (dim, 3 * dim))   # qkv_bias=True
        p["qkv_b"] = 0.02 * jax.random.normal(ks[3], (1, 3 * dim))
        p["proj_w"] = 0.06 * jax.random.normal(ks[4], (dim, dim))
        p["proj_b"] = 0.02 * jax.random.normal(ks[5], (1, dim))
        p["ln2_g"] = 1.0 + 0.1 * jax.random.normal(ks[6], (1, dim))
        p["ln2_b"] = 0.1 * jax.random.normal(ks[7], (1, dim))
        p["fc1_w"] = 0.06 * jax.random.normal(ks[8], (dim, hidden))
        p["fc1_b"] = 0.02 * jax.random.normal(ks[9], (1, hidden))
        p["bn1_s"], p["bn1_t"] = bn_scale_shift(ks[10], ks[11], ks[12], ks[13], hidden)
        p["dw_w"] = 0.2 * jax.random.normal(ks[14], (9, hidden))       # (kh*3+kw, ch)
        p["dw_b"] = 0.02 * jax.random.normal(ks[15], (1, hidden))
        p["bn2_s"], p["bn2_t"] = bn_scale_shift(ks[16], ks[17], ks[18], ks[19], hidden)
        p["fc2_w"] = 0.06 * jax.random.normal(ks[20], (hidden, dim))
        p["fc2_b"] = 0.02 * jax.random.normal(ks[21], (1, dim))
        p["bn3_s"], p["bn3_t"] = bn_scale_shift(ks[22], ks[23], ks[24], ks[25], dim)
        blocks.append({k: v.astype(jnp.float32) for k, v in p.items()})
    return blocks


def fuse_params(blocks):
    """Stack per-block params along a depth axis, fold eval-mode BatchNorms into
    the adjacent per-channel-linear ops, and cast matmul weights to bf16."""
    def stack(vals):
        return jnp.stack(vals, axis=0)

    f = {}
    for k in ["ln1_g", "ln1_b", "qkv_b", "proj_b", "ln2_g", "ln2_b"]:
        f[k] = stack([b[k] for b in blocks])
    f["qkv_w"] = stack([b["qkv_w"] for b in blocks]).astype(jnp.bfloat16)
    f["proj_w"] = stack([b["proj_w"] for b in blocks]).astype(jnp.bfloat16)
    # bn1 -> fc1, bn2 -> dwconv (per-channel linear), bn3 -> fc2
    f["fc1_w"] = stack([b["fc1_w"] * b["bn1_s"] for b in blocks]).astype(jnp.bfloat16)
    f["fc1_b"] = stack([b["fc1_b"] * b["bn1_s"] + b["bn1_t"] for b in blocks])
    f["dw_w"] = stack([b["dw_w"] * b["bn2_s"] for b in blocks])
    f["dw_b"] = stack([b["dw_b"] * b["bn2_s"] + b["bn2_t"] for b in blocks])
    f["fc2_w"] = stack([b["fc2_w"] * b["bn3_s"] for b in blocks]).astype(jnp.bfloat16)
    f["fc2_b"] = stack([b["fc2_b"] * b["bn3_s"] + b["bn3_t"] for b in blocks])
    return f


# ----------------------------------------------------------------------------
# Pure-JAX f32 reference (mirrors the PyTorch forward, unfolded BN) for checking
# ----------------------------------------------------------------------------
def _ref_block(x, p, num_heads, H, W):
    B, N, C = x.shape
    hd = C // num_heads
    scale = hd ** (-0.5)

    def ln(v, g, b):
        mu = jnp.mean(v, axis=-1, keepdims=True)
        var = jnp.mean((v - mu) ** 2, axis=-1, keepdims=True)
        return (v - mu) * lax.rsqrt(var + LN_EPS) * g + b

    # attention
    xn = ln(x, p["ln1_g"], p["ln1_b"])
    qkv = xn @ p["qkv_w"] + p["qkv_b"]
    qkv = qkv.reshape(B, N, 3, num_heads, hd).transpose(2, 0, 3, 1, 4)
    q, k, v = qkv[0], qkv[1], qkv[2]
    attn = jnp.einsum("bhnd,bhmd->bhnm", q, k) * scale
    attn = jax.nn.softmax(attn, axis=-1)
    o = jnp.einsum("bhnm,bhmd->bhnd", attn, v)
    o = o.transpose(0, 2, 1, 3).reshape(B, N, C)
    x = x + (o @ p["proj_w"] + p["proj_b"])

    # mlp (conv branch, in_features != 768)
    xn = ln(x, p["ln2_g"], p["ln2_b"])
    h = xn @ p["fc1_w"] + p["fc1_b"]
    h = h * p["bn1_s"] + p["bn1_t"]
    h = _gelu(h)
    h4 = h.reshape(B, H, W, -1)
    hp = jnp.pad(h4, ((0, 0), (1, 1), (1, 1), (0, 0)))
    y = jnp.zeros_like(h4)
    for kh in range(3):
        for kw in range(3):
            y = y + hp[:, kh:kh + H, kw:kw + W, :] * p["dw_w"][kh * 3 + kw]
    y = y + p["dw_b"]
    y = y * p["bn2_s"] + p["bn2_t"]
    y = _gelu(y)
    y = y.reshape(B, N, -1) @ p["fc2_w"] + p["fc2_b"]
    y = y * p["bn3_s"] + p["bn3_t"]
    return x + y


def transformer_reference(x_nchw, params, num_heads):
    B, C, H, W = x_nchw.shape
    x = jnp.transpose(x_nchw, (0, 2, 3, 1)).reshape(B, H * W, C)
    for p in params:
        x = _ref_block(x, p, num_heads, H, W)
    return jnp.transpose(x.reshape(B, H, W, C), (0, 3, 1, 2))


if __name__ == "__main__":
    # Transformer(base_dim=16, depth=2, heads=2, mlp_ratio=4) -> embed_dim = 32
    B, base_dim, heads, depth, mlp_ratio = 2, 16, 2, 2, 4.0
    C = base_dim * heads
    H = W = 8            # N = 64 tokens (perfect square, as the MLP requires)

    key = jax.random.PRNGKey(0)
    kx, kp = jax.random.split(key)
    x_nchw = jax.random.normal(kx, (B, C, H, W), dtype=jnp.float32)
    raw_params = init_params(kp, depth, C, mlp_ratio)
    fused_params = fuse_params(raw_params)

    fwd = jax.jit(partial(transformer_forward, num_heads=heads))
    out = jax.block_until_ready(fwd(x_nchw, fused_params))
    assert out.shape == (B, C, H, W)

    ref = transformer_reference(x_nchw, raw_params, heads)
    max_err = float(jnp.max(jnp.abs(out - ref)))
    # bf16 matmul operands (f32 accumulation) vs f32 reference -> slightly looser tol
    if not bool(jnp.allclose(out, ref, atol=3e-2, rtol=3e-2)):
        raise AssertionError(f"Pallas output mismatch vs reference (max abs err {max_err})")

    print("KERNEL_OK")
</pallas_src>

<mosaic_0001>
module attributes {stable_mosaic.version = 11 : i64} {
  func.func @transformer_block_kernel(%arg0: i32, %arg1: i32, %arg2: memref<1x64x32xf32, #tpu.memory_space<vmem>>, %arg3: memref<4x64x64xf32, #tpu.memory_space<vmem>>, %arg4: memref<1x1x32xf32, #tpu.memory_space<vmem>>, %arg5: memref<1x1x32xf32, #tpu.memory_space<vmem>>, %arg6: memref<1x32x96xbf16, #tpu.memory_space<vmem>>, %arg7: memref<1x1x96xf32, #tpu.memory_space<vmem>>, %arg8: memref<1x32x32xbf16, #tpu.memory_space<vmem>>, %arg9: memref<1x1x32xf32, #tpu.memory_space<vmem>>, %arg10: memref<1x1x32xf32, #tpu.memory_space<vmem>>, %arg11: memref<1x1x32xf32, #tpu.memory_space<vmem>>, %arg12: memref<1x32x128xbf16, #tpu.memory_space<vmem>>, %arg13: memref<1x1x128xf32, #tpu.memory_space<vmem>>, %arg14: memref<1x9x128xf32, #tpu.memory_space<vmem>>, %arg15: memref<1x1x128xf32, #tpu.memory_space<vmem>>, %arg16: memref<1x128x32xbf16, #tpu.memory_space<vmem>>, %arg17: memref<1x1x32xf32, #tpu.memory_space<vmem>>, %arg18: memref<1x64x32xf32, #tpu.memory_space<vmem>>) attributes {dimension_semantics = [#tpu.dimension_semantics<parallel>, #tpu.dimension_semantics<arbitrary>], iteration_bounds = array<i64: 2, 2>, scalar_prefetch = 0 : i64, scratch_operands = 0 : i64, tpu.core_type = #tpu.core_type<tc>, window_params = [{transform_indices = @transform_0, window_bounds = array<i64: 1, 64, 32>}, {pipeline_mode = #tpu.pipeline_mode<synchronous>, transform_indices = @transform_1, window_bounds = array<i64: 4, 64, 64>}, {transform_indices = @transform_2, window_bounds = array<i64: 1, 1, 32>}, {transform_indices = @transform_3, window_bounds = array<i64: 1, 1, 32>}, {transform_indices = @transform_4, window_bounds = array<i64: 1, 32, 96>}, {transform_indices = @transform_5, window_bounds = array<i64: 1, 1, 96>}, {transform_indices = @transform_6, window_bounds = array<i64: 1, 32, 32>}, {transform_indices = @transform_7, window_bounds = array<i64: 1, 1, 32>}, {transform_indices = @transform_8, window_bounds = array<i64: 1, 1, 32>}, {transform_indices = @transform_9, window_bounds = array<i64: 1, 1, 32>}, {transform_indices = @transform_10, window_bounds = array<i64: 1, 32, 128>}, {transform_indices = @transform_11, window_bounds = array<i64: 1, 1, 128>}, {transform_indices = @transform_12, window_bounds = array<i64: 1, 9, 128>}, {transform_indices = @transform_13, window_bounds = array<i64: 1, 1, 128>}, {transform_indices = @transform_14, window_bounds = array<i64: 1, 128, 32>}, {transform_indices = @transform_15, window_bounds = array<i64: 1, 1, 32>}, {transform_indices = @transform_16, window_bounds = array<i64: 1, 64, 32>}]} {
    %c0_i32 = arith.constant 0 : i32
    %0 = arith.cmpi eq, %arg1, %c0_i32 : i32
    %1 = arith.extui %0 : i1 to i32
    %c0_i32_0 = arith.constant 0 : i32
    %2 = arith.cmpi ne, %1, %c0_i32_0 : i32
    scf.if %2 {
      %c0_93 = arith.constant 0 : index
      %c0_94 = arith.constant 0 : index
      %c0_95 = arith.constant 0 : index
      %206 = vector.load %arg2[%c0_93, %c0_94, %c0_95] : memref<1x64x32xf32, #tpu.memory_space<vmem>>, vector<1x64x32xf32>
      %207 = vector.shape_cast %206 : vector<1x64x32xf32> to vector<64x32xf32>
      %c0_96 = arith.constant 0 : index
      %c0_97 = arith.constant 0 : index
      %c0_98 = arith.constant 0 : index
      %208 = vector.load %arg18[%c0_96, %c0_97, %c0_98] : memref<1x64x32xf32, #tpu.memory_space<vmem>>, vector<1x64x32xf32>
      %209 = vector.shape_cast %208 : vector<1x64x32xf32> to vector<64x32xf32>
      %210 = vector.shape_cast %207 : vector<64x32xf32> to vector<1x64x32xf32>
      tpu.vector_store %arg18[%c0_96, %c0_97, %c0_98], %210 {strides = array<i32>} : memref<1x64x32xf32, #tpu.memory_space<vmem>>, vector<1x64x32xf32>,
    } else {
    }
    %c0 = arith.constant 0 : index
    %c0_1 = arith.constant 0 : index
    %c0_2 = arith.constant 0 : index
    %3 = vector.load %arg18[%c0, %c0_1, %c0_2] : memref<1x64x32xf32, #tpu.memory_space<vmem>>, vector<1x64x32xf32>
    %4 = vector.shape_cast %3 : vector<1x64x32xf32> to vector<64x32xf32>
    %c0_3 = arith.constant 0 : index
    %c0_4 = arith.constant 0 : index
    %c0_5 = arith.constant 0 : index
    %5 = vector.load %arg4[%c0_3, %c0_4, %c0_5] : memref<1x1x32xf32, #tpu.memory_space<vmem>>, vector<1x1x32xf32>
    %6 = vector.shape_cast %5 : vector<1x1x32xf32> to vector<1x32xf32>
    %c0_6 = arith.constant 0 : index
    %c0_7 = arith.constant 0 : index
    %c0_8 = arith.constant 0 : index
    %7 = vector.load %arg5[%c0_6, %c0_7, %c0_8] : memref<1x1x32xf32, #tpu.memory_space<vmem>>, vector<1x1x32xf32>
    %8 = vector.shape_cast %7 : vector<1x1x32xf32> to vector<1x32xf32>
    %cst = arith.constant dense<0.000000e+00> : vector<64xf32>
    %9 = vector.multi_reduction <add>, %4, %cst [1] : vector<64x32xf32> to vector<64xf32>
    %10 = vector.shape_cast %9 : vector<64xf32> to vector<64x1xf32>
    %cst_9 = arith.constant 3.200000e+01 : f32
    %11 = vector.broadcast %cst_9 : f32 to vector<64x1xf32>
    %12 = arith.divf %10, %11 : vector<64x1xf32>
    %13 = vector.broadcast %12 : vector<64x1xf32> to vector<64x32xf32>
    %14 = arith.subf %4, %13 : vector<64x32xf32>
    %15 = arith.mulf %14, %14 : vector<64x32xf32>
    %cst_10 = arith.constant dense<0.000000e+00> : vector<64xf32>
    %16 = vector.multi_reduction <add>, %15, %cst_10 [1] : vector<64x32xf32> to vector<64xf32>
    %17 = vector.shape_cast %16 : vector<64xf32> to vector<64x1xf32>
    %cst_11 = arith.constant 3.200000e+01 : f32
    %18 = vector.broadcast %cst_11 : f32 to vector<64x1xf32>
    %19 = arith.divf %17, %18 : vector<64x1xf32>
    %20 = vector.broadcast %12 : vector<64x1xf32> to vector<64x32xf32>
    %21 = arith.subf %4, %20 : vector<64x32xf32>
    %cst_12 = arith.constant 9.99999997E-7 : f32
    %22 = vector.broadcast %cst_12 : f32 to vector<64x1xf32>
    %23 = arith.addf %19, %22 : vector<64x1xf32>
    %24 = math.rsqrt %23 : vector<64x1xf32>
    %25 = vector.broadcast %24 : vector<64x1xf32> to vector<64x32xf32>
    %26 = arith.mulf %21, %25 : vector<64x32xf32>
    %27 = vector.broadcast %6 : vector<1x32xf32> to vector<64x32xf32>
    %28 = arith.mulf %26, %27 : vector<64x32xf32>
    %29 = vector.broadcast %8 : vector<1x32xf32> to vector<64x32xf32>
    %30 = arith.addf %28, %29 : vector<64x32xf32>
    %31 = arith.truncf %30 : vector<64x32xf32> to vector<64x32xbf16>
    %c0_13 = arith.constant 0 : index
    %c0_14 = arith.constant 0 : index
    %c0_15 = arith.constant 0 : index
    %32 = vector.load %arg6[%c0_13, %c0_14, %c0_15] : memref<1x32x96xbf16, #tpu.memory_space<vmem>>, vector<1x32x96xbf16>
    %33 = vector.shape_cast %32 : vector<1x32x96xbf16> to vector<32x96xbf16>
    %cst_16 = arith.constant dense<0.000000e+00> : vector<64x96xf32>
    %34 = tpu.matmul %31, %33, %cst_16 {dimension_numbers = #tpu.dot_dimension_numbers<[1], [0], [0], [1], [0, 0, 1, 1], [], []>} : vector<64x32xbf16>, vector<32x96xbf16>, vector<64x96xf32> -> vector<64x96xf32>
    %c0_17 = arith.constant 0 : index
    %c0_18 = arith.constant 0 : index
    %c0_19 = arith.constant 0 : index
    %35 = vector.load %arg7[%c0_17, %c0_18, %c0_19] : memref<1x1x96xf32, #tpu.memory_space<vmem>>, vector<1x1x96xf32>
    %36 = vector.shape_cast %35 : vector<1x1x96xf32> to vector<1x96xf32>
    %37 = vector.broadcast %36 : vector<1x96xf32> to vector<64x96xf32>
    %38 = arith.addf %34, %37 : vector<64x96xf32>
    %c0_20 = arith.constant 0 : index
    %c0_21 = arith.constant 0 : index
    %c0_22 = arith.constant 0 : index
    %39 = vector.load %arg8[%c0_20, %c0_21, %c0_22] : memref<1x32x32xbf16, #tpu.memory_space<vmem>>, vector<1x32x32xbf16>
    %40 = vector.shape_cast %39 : vector<1x32x32xbf16> to vector<32x32xbf16>
    %cst_23 = arith.constant 0.000000e+00 : f32
    %41 = vector.broadcast %cst_23 : f32 to vector<64x32xf32>
    %42 = vector.extract_strided_slice %38 {offsets = [0, 0], sizes = [64, 16], strides = [1, 1]} : vector<64x96xf32> to vector<64x16xf32>
    %43 = vector.extract_strided_slice %38 {offsets = [0, 32], sizes = [64, 16], strides = [1, 1]} : vector<64x96xf32> to vector<64x16xf32>
    %44 = vector.extract_strided_slice %38 {offsets = [0, 64], sizes = [64, 16], strides = [1, 1]} : vector<64x96xf32> to vector<64x16xf32>
    %cst_24 = arith.constant dense<0.000000e+00> : vector<64x64xf32>
    %45 = tpu.matmul %42, %43, %cst_24 {dimension_numbers = #tpu.dot_dimension_numbers<[1], [1], [0], [0], [0, 0, 1, 0], [], []>} : vector<64x16xf32>, vector<64x16xf32>, vector<64x64xf32> -> vector<64x64xf32>
    %cst_25 = arith.constant 2.500000e-01 : f32
    %46 = vector.broadcast %cst_25 : f32 to vector<64x64xf32>
    %47 = arith.mulf %45, %46 : vector<64x64xf32>
    %cst_26 = arith.constant dense<0xFF800000> : vector<64xf32>
    %48 = vector.multi_reduction <maximumf>, %47, %cst_26 [1] : vector<64x64xf32> to vector<64xf32>
    %49 = vector.shape_cast %48 : vector<64xf32> to vector<64x1xf32>
    %50 = vector.broadcast %49 : vector<64x1xf32> to vector<64x64xf32>
    %51 = arith.subf %47, %50 : vector<64x64xf32>
    %52 = math.exp %51 : vector<64x64xf32>
    %cst_27 = arith.constant dense<0.000000e+00> : vector<64xf32>
    %53 = vector.multi_reduction <add>, %52, %cst_27 [1] : vector<64x64xf32> to vector<64xf32>
    %54 = vector.shape_cast %53 : vector<64xf32> to vector<64x1xf32>
    %55 = tpu.reciprocal %54 {approx = true} : vector<64x1xf32> -> vector<64x1xf32>
    %56 = vector.broadcast %55 : vector<64x1xf32> to vector<64x64xf32>
    %57 = arith.mulf %52, %56 : vector<64x64xf32>
    %cst_28 = arith.constant dense<0.000000e+00> : vector<64x16xf32>
    %58 = tpu.matmul %57, %44, %cst_28 {dimension_numbers = #tpu.dot_dimension_numbers<[1], [0], [0], [1], [0, 0, 1, 1], [], []>} : vector<64x64xf32>, vector<64x16xf32>, vector<64x16xf32> -> vector<64x16xf32>
    %59 = arith.truncf %58 : vector<64x16xf32> to vector<64x16xbf16>
    %60 = vector.extract_strided_slice %40 {offsets = [0, 0], sizes = [16, 32], strides = [1, 1]} : vector<32x32xbf16> to vector<16x32xbf16>
    %cst_29 = arith.constant dense<0.000000e+00> : vector<64x32xf32>
    %61 = tpu.matmul %59, %60, %cst_29 {dimension_numbers = #tpu.dot_dimension_numbers<[1], [0], [0], [1], [0, 0, 1, 1], [], []>} : vector<64x16xbf16>, vector<16x32xbf16>, vector<64x32xf32> -> vector<64x32xf32>
    %62 = arith.addf %41, %61 : vector<64x32xf32>
    %63 = vector.extract_strided_slice %38 {offsets = [0, 16], sizes = [64, 16], strides = [1, 1]} : vector<64x96xf32> to vector<64x16xf32>
    %64 = vector.extract_strided_slice %38 {offsets = [0, 48], sizes = [64, 16], strides = [1, 1]} : vector<64x96xf32> to vector<64x16xf32>
    %65 = vector.extract_strided_slice %38 {offsets = [0, 80], sizes = [64, 16], strides = [1, 1]} : vector<64x96xf32> to vector<64x16xf32>
    %cst_30 = arith.constant dense<0.000000e+00> : vector<64x64xf32>
    %66 = tpu.matmul %63, %64, %cst_30 {dimension_numbers = #tpu.dot_dimension_numbers<[1], [1], [0], [0], [0, 0, 1, 0], [], []>} : vector<64x16xf32>, vector<64x16xf32>, vector<64x64xf32> -> vector<64x64xf32>
    %cst_31 = arith.constant 2.500000e-01 : f32
    %67 = vector.broadcast %cst_31 : f32 to vector<64x64xf32>
    %68 = arith.mulf %66, %67 : vector<64x64xf32>
    %cst_32 = arith.constant dense<0xFF800000> : vector<64xf32>
    %69 = vector.multi_reduction <maximumf>, %68, %cst_32 [1] : vector<64x64xf32> to vector<64xf32>
    %70 = vector.shape_cast %69 : vector<64xf32> to vector<64x1xf32>
    %71 = vector.broadcast %70 : vector<64x1xf32> to vector<64x64xf32>
    %72 = arith.subf %68, %71 : vector<64x64xf32>
    %73 = math.exp %72 : vector<64x64xf32>
    %cst_33 = arith.constant dense<0.000000e+00> : vector<64xf32>
    %74 = vector.multi_reduction <add>, %73, %cst_33 [1] : vector<64x64xf32> to vector<64xf32>
    %75 = vector.shape_cast %74 : vector<64xf32> to vector<64x1xf32>
    %76 = tpu.reciprocal %75 {approx = true} : vector<64x1xf32> -> vector<64x1xf32>
    %77 = vector.broadcast %76 : vector<64x1xf32> to vector<64x64xf32>
    %78 = arith.mulf %73, %77 : vector<64x64xf32>
    %cst_34 = arith.constant dense<0.000000e+00> : vector<64x16xf32>
    %79 = tpu.matmul %78, %65, %cst_34 {dimension_numbers = #tpu.dot_dimension_numbers<[1], [0], [0], [1], [0, 0, 1, 1], [], []>} : vector<64x64xf32>, vector<64x16xf32>, vector<64x16xf32> -> vector<64x16xf32>
    %80 = arith.truncf %79 : vector<64x16xf32> to vector<64x16xbf16>
    %81 = vector.extract_strided_slice %40 {offsets = [16, 0], sizes = [16, 32], strides = [1, 1]} : vector<32x32xbf16> to vector<16x32xbf16>
    %cst_35 = arith.constant dense<0.000000e+00> : vector<64x32xf32>
    %82 = tpu.matmul %80, %81, %cst_35 {dimension_numbers = #tpu.dot_dimension_numbers<[1], [0], [0], [1], [0, 0, 1, 1], [], []>} : vector<64x16xbf16>, vector<16x32xbf16>, vector<64x32xf32> -> vector<64x32xf32>
    %83 = arith.addf %62, %82 : vector<64x32xf32>
    %84 = arith.addf %4, %83 : vector<64x32xf32>
    %c0_36 = arith.constant 0 : index
    %c0_37 = arith.constant 0 : index
    %c0_38 = arith.constant 0 : index
    %85 = vector.load %arg9[%c0_36, %c0_37, %c0_38] : memref<1x1x32xf32, #tpu.memory_space<vmem>>, vector<1x1x32xf32>
    %86 = vector.shape_cast %85 : vector<1x1x32xf32> to vector<1x32xf32>
    %87 = vector.broadcast %86 : vector<1x32xf32> to vector<64x32xf32>
    %88 = arith.addf %84, %87 : vector<64x32xf32>
    %c0_39 = arith.constant 0 : index
    %c0_40 = arith.constant 0 : index
    %c0_41 = arith.constant 0 : index
    %89 = vector.load %arg10[%c0_39, %c0_40, %c0_41] : memref<1x1x32xf32, #tpu.memory_space<vmem>>, vector<1x1x32xf32>
    %90 = vector.shape_cast %89 : vector<1x1x32xf32> to vector<1x32xf32>
    %c0_42 = arith.constant 0 : index
    %c0_43 = arith.constant 0 : index
    %c0_44 = arith.constant 0 : index
    %91 = vector.load %arg11[%c0_42, %c0_43, %c0_44] : memref<1x1x32xf32, #tpu.memory_space<vmem>>, vector<1x1x32xf32>
    %92 = vector.shape_cast %91 : vector<1x1x32xf32> to vector<1x32xf32>
    %cst_45 = arith.constant dense<0.000000e+00> : vector<64xf32>
    %93 = vector.multi_reduction <add>, %88, %cst_45 [1] : vector<64x32xf32> to vector<64xf32>
    %94 = vector.shape_cast %93 : vector<64xf32> to vector<64x1xf32>
    %cst_46 = arith.constant 3.200000e+01 : f32
    %95 = vector.broadcast %cst_46 : f32 to vector<64x1xf32>
    %96 = arith.divf %94, %95 : vector<64x1xf32>
    %97 = vector.broadcast %96 : vector<64x1xf32> to vector<64x32xf32>
    %98 = arith.subf %88, %97 : vector<64x32xf32>
    %99 = arith.mulf %98, %98 : vector<64x32xf32>
    %cst_47 = arith.constant dense<0.000000e+00> : vector<64xf32>
    %100 = vector.multi_reduction <add>, %99, %cst_47 [1] : vector<64x32xf32> to vector<64xf32>
    %101 = vector.shape_cast %100 : vector<64xf32> to vector<64x1xf32>
    %cst_48 = arith.constant 3.200000e+01 : f32
    %102 = vector.broadcast %cst_48 : f32 to vector<64x1xf32>
    %103 = arith.divf %101, %102 : vector<64x1xf32>
    %104 = vector.broadcast %96 : vector<64x1xf32> to vector<64x32xf32>
    %105 = arith.subf %88, %104 : vector<64x32xf32>
    %cst_49 = arith.constant 9.99999997E-7 : f32
    %106 = vector.broadcast %cst_49 : f32 to vector<64x1xf32>
    %107 = arith.addf %103, %106 : vector<64x1xf32>
    %108 = math.rsqrt %107 : vector<64x1xf32>
    %109 = vector.broadcast %108 : vector<64x1xf32> to vector<64x32xf32>
    %110 = arith.mulf %105, %109 : vector<64x32xf32>
    %111 = vector.broadcast %90 : vector<1x32xf32> to vector<64x32xf32>
    %112 = arith.mulf %110, %111 : vector<64x32xf32>
    %113 = vector.broadcast %92 : vector<1x32xf32> to vector<64x32xf32>
    %114 = arith.addf %112, %113 : vector<64x32xf32>
    %115 = arith.truncf %114 : vector<64x32xf32> to vector<64x32xbf16>
    %c0_50 = arith.constant 0 : index
    %c0_51 = arith.constant 0 : index
    %c0_52 = arith.constant 0 : index
    %116 = vector.load %arg12[%c0_50, %c0_51, %c0_52] : memref<1x32x128xbf16, #tpu.memory_space<vmem>>, vector<1x32x128xbf16>
    %117 = vector.shape_cast %116 : vector<1x32x128xbf16> to vector<32x128xbf16>
    %cst_53 = arith.constant dense<0.000000e+00> : vector<64x128xf32>
    %118 = tpu.matmul %115, %117, %cst_53 {dimension_numbers = #tpu.dot_dimension_numbers<[1], [0], [0], [1], [0, 0, 1, 1], [], []>} : vector<64x32xbf16>, vector<32x128xbf16>, vector<64x128xf32> -> vector<64x128xf32>
    %c0_54 = arith.constant 0 : index
    %c0_55 = arith.constant 0 : index
    %c0_56 = arith.constant 0 : index
    %119 = vector.load %arg13[%c0_54, %c0_55, %c0_56] : memref<1x1x128xf32, #tpu.memory_space<vmem>>, vector<1x1x128xf32>
    %120 = vector.shape_cast %119 : vector<1x1x128xf32> to vector<1x128xf32>
    %121 = vector.broadcast %120 : vector<1x128xf32> to vector<64x128xf32>
    %122 = arith.addf %118, %121 : vector<64x128xf32>
    %cst_57 = arith.constant 5.000000e-01 : f32
    %123 = vector.broadcast %cst_57 : f32 to vector<64x128xf32>
    %124 = arith.mulf %123, %122 : vector<64x128xf32>
    %cst_58 = arith.constant 0.707106769 : f32
    %125 = vector.broadcast %cst_58 : f32 to vector<64x128xf32>
    %126 = arith.mulf %122, %125 : vector<64x128xf32>
    %127 = math.erf %126 : vector<64x128xf32>
    %cst_59 = arith.constant 1.000000e+00 : f32
    %128 = vector.broadcast %cst_59 : f32 to vector<64x128xf32>
    %129 = arith.addf %128, %127 : vector<64x128xf32>
    %130 = arith.mulf %124, %129 : vector<64x128xf32>
    %c0_60 = arith.constant 0 : index
    %c0_61 = arith.constant 0 : index
    %c0_62 = arith.constant 0 : index
    %131 = vector.load %arg14[%c0_60, %c0_61, %c0_62] : memref<1x9x128xf32, #tpu.memory_space<vmem>>, vector<1x9x128xf32>
    %132 = vector.shape_cast %131 : vector<1x9x128xf32> to vector<9x128xf32>
    %c0_63 = arith.constant 0 : index
    %c0_64 = arith.constant 0 : index
    %c0_65 = arith.constant 0 : index
    %133 = vector.load %arg3[%c0_63, %c0_64, %c0_65] : memref<4x64x64xf32, #tpu.memory_space<vmem>>, vector<1x64x64xf32>
    %134 = vector.shape_cast %133 : vector<1x64x64xf32> to vector<64x64xf32>
    %cst_66 = arith.constant dense<0.000000e+00> : vector<64x128xf32>
    %135 = tpu.matmul %134, %130, %cst_66 {dimension_numbers = #tpu.dot_dimension_numbers<[1], [0], [0], [1], [0, 0, 1, 1], [], []>} : vector<64x64xf32>, vector<64x128xf32>, vector<64x128xf32> -> vector<64x128xf32>
    %c1 = arith.constant 1 : index
    %c0_67 = arith.constant 0 : index
    %c0_68 = arith.constant 0 : index
    %136 = vector.load %arg3[%c1, %c0_67, %c0_68] : memref<4x64x64xf32, #tpu.memory_space<vmem>>, vector<1x64x64xf32>
    %137 = vector.shape_cast %136 : vector<1x64x64xf32> to vector<64x64xf32>
    %cst_69 = arith.constant dense<0.000000e+00> : vector<64x128xf32>
    %138 = tpu.matmul %137, %130, %cst_69 {dimension_numbers = #tpu.dot_dimension_numbers<[1], [0], [0], [1], [0, 0, 1, 1], [], []>} : vector<64x64xf32>, vector<64x128xf32>, vector<64x128xf32> -> vector<64x128xf32>
    %cst_70 = arith.constant 0.000000e+00 : f32
    %139 = vector.broadcast %cst_70 : f32 to vector<64x128xf32>
    %140 = vector.extract_strided_slice %132 {offsets = [0, 0], sizes = [1, 128], strides = [1, 1]} : vector<9x128xf32> to vector<1x128xf32>
    %141 = vector.broadcast %140 : vector<1x128xf32> to vector<64x128xf32>
    %142 = arith.mulf %135, %141 : vector<64x128xf32>
    %143 = vector.extract_strided_slice %132 {offsets = [1, 0], sizes = [1, 128], strides = [1, 1]} : vector<9x128xf32> to vector<1x128xf32>
    %144 = vector.broadcast %143 : vector<1x128xf32> to vector<64x128xf32>
    %145 = arith.mulf %130, %144 : vector<64x128xf32>
    %146 = arith.addf %142, %145 : vector<64x128xf32>
    %147 = vector.extract_strided_slice %132 {offsets = [2, 0], sizes = [1, 128], strides = [1, 1]} : vector<9x128xf32> to vector<1x128xf32>
    %148 = vector.broadcast %147 : vector<1x128xf32> to vector<64x128xf32>
    %149 = arith.mulf %138, %148 : vector<64x128xf32>
    %150 = arith.addf %146, %149 : vector<64x128xf32>
    %c2 = arith.constant 2 : index
    %c0_71 = arith.constant 0 : index
    %c0_72 = arith.constant 0 : index
    %151 = vector.load %arg3[%c2, %c0_71, %c0_72] : memref<4x64x64xf32, #tpu.memory_space<vmem>>, vector<1x64x64xf32>
    %152 = vector.shape_cast %151 : vector<1x64x64xf32> to vector<64x64xf32>
    %cst_73 = arith.constant dense<0.000000e+00> : vector<64x128xf32>
    %153 = tpu.matmul %152, %150, %cst_73 {dimension_numbers = #tpu.dot_dimension_numbers<[1], [0], [0], [1], [0, 0, 1, 1], [], []>} : vector<64x64xf32>, vector<64x128xf32>, vector<64x128xf32> -> vector<64x128xf32>
    %154 = arith.addf %139, %153 : vector<64x128xf32>
    %155 = vector.extract_strided_slice %132 {offsets = [3, 0], sizes = [1, 128], strides = [1, 1]} : vector<9x128xf32> to vector<1x128xf32>
    %156 = vector.broadcast %155 : vector<1x128xf32> to vector<64x128xf32>
    %157 = arith.mulf %135, %156 : vector<64x128xf32>
    %158 = vector.extract_strided_slice %132 {offsets = [4, 0], sizes = [1, 128], strides = [1, 1]} : vector<9x128xf32> to vector<1x128xf32>
    %159 = vector.broadcast %158 : vector<1x128xf32> to vector<64x128xf32>
    %160 = arith.mulf %130, %159 : vector<64x128xf32>
    %161 = arith.addf %157, %160 : vector<64x128xf32>
    %162 = vector.extract_strided_slice %132 {offsets = [5, 0], sizes = [1, 128], strides = [1, 1]} : vector<9x128xf32> to vector<1x128xf32>
    %163 = vector.broadcast %162 : vector<1x128xf32> to vector<64x128xf32>
    %164 = arith.mulf %138, %163 : vector<64x128xf32>
    %165 = arith.addf %161, %164 : vector<64x128xf32>
    %166 = arith.addf %154, %165 : vector<64x128xf32>
    %167 = vector.extract_strided_slice %132 {offsets = [6, 0], sizes = [1, 128], strides = [1, 1]} : vector<9x128xf32> to vector<1x128xf32>
    %168 = vector.broadcast %167 : vector<1x128xf32> to vector<64x128xf32>
    %169 = arith.mulf %135, %168 : vector<64x128xf32>
    %170 = vector.extract_strided_slice %132 {offsets = [7, 0], sizes = [1, 128], strides = [1, 1]} : vector<9x128xf32> to vector<1x128xf32>
    %171 = vector.broadcast %170 : vector<1x128xf32> to vector<64x128xf32>
    %172 = arith.mulf %130, %171 : vector<64x128xf32>
    %173 = arith.addf %169, %172 : vector<64x128xf32>
    %174 = vector.extract_strided_slice %132 {offsets = [8, 0], sizes = [1, 128], strides = [1, 1]} : vector<9x128xf32> to vector<1x128xf32>
    %175 = vector.broadcast %174 : vector<1x128xf32> to vector<64x128xf32>
    %176 = arith.mulf %138, %175 : vector<64x128xf32>
    %177 = arith.addf %173, %176 : vector<64x128xf32>
    %c3 = arith.constant 3 : index
    %c0_74 = arith.constant 0 : index
    %c0_75 = arith.constant 0 : index
    %178 = vector.load %arg3[%c3, %c0_74, %c0_75] : memref<4x64x64xf32, #tpu.memory_space<vmem>>, vector<1x64x64xf32>
    %179 = vector.shape_cast %178 : vector<1x64x64xf32> to vector<64x64xf32>
    %cst_76 = arith.constant dense<0.000000e+00> : vector<64x128xf32>
    %180 = tpu.matmul %179, %177, %cst_76 {dimension_numbers = #tpu.dot_dimension_numbers<[1], [0], [0], [1], [0, 0, 1, 1], [], []>} : vector<64x64xf32>, vector<64x128xf32>, vector<64x128xf32> -> vector<64x128xf32>
    %181 = arith.addf %166, %180 : vector<64x128xf32>
    %c0_77 = arith.constant 0 : index
    %c0_78 = arith.constant 0 : index
    %c0_79 = arith.constant 0 : index
    %182 = vector.load %arg15[%c0_77, %c0_78, %c0_79] : memref<1x1x128xf32, #tpu.memory_space<vmem>>, vector<1x1x128xf32>
    %183 = vector.shape_cast %182 : vector<1x1x128xf32> to vector<1x128xf32>
    %184 = vector.broadcast %183 : vector<1x128xf32> to vector<64x128xf32>
    %185 = arith.addf %181, %184 : vector<64x128xf32>
    %cst_80 = arith.constant 5.000000e-01 : f32
    %186 = vector.broadcast %cst_80 : f32 to vector<64x128xf32>
    %187 = arith.mulf %186, %185 : vector<64x128xf32>
    %cst_81 = arith.constant 0.707106769 : f32
    %188 = vector.broadcast %cst_81 : f32 to vector<64x128xf32>
    %189 = arith.mulf %185, %188 : vector<64x128xf32>
    %190 = math.erf %189 : vector<64x128xf32>
    %cst_82 = arith.constant 1.000000e+00 : f32
    %191 = vector.broadcast %cst_82 : f32 to vector<64x128xf32>
    %192 = arith.addf %191, %190 : vector<64x128xf32>
    %193 = arith.mulf %187, %192 : vector<64x128xf32>
    %194 = arith.truncf %193 : vector<64x128xf32> to vector<64x128xbf16>
    %c0_83 = arith.constant 0 : index
    %c0_84 = arith.constant 0 : index
    %c0_85 = arith.constant 0 : index
    %195 = vector.load %arg16[%c0_83, %c0_84, %c0_85] : memref<1x128x32xbf16, #tpu.memory_space<vmem>>, vector<1x128x32xbf16>
    %196 = vector.shape_cast %195 : vector<1x128x32xbf16> to vector<128x32xbf16>
    %cst_86 = arith.constant dense<0.000000e+00> : vector<64x32xf32>
    %197 = tpu.matmul %194, %196, %cst_86 {dimension_numbers = #tpu.dot_dimension_numbers<[1], [0], [0], [1], [0, 0, 1, 1], [], []>} : vector<64x128xbf16>, vector<128x32xbf16>, vector<64x32xf32> -> vector<64x32xf32>
    %c0_87 = arith.constant 0 : index
    %c0_88 = arith.constant 0 : index
    %c0_89 = arith.constant 0 : index
    %198 = vector.load %arg17[%c0_87, %c0_88, %c0_89] : memref<1x1x32xf32, #tpu.memory_space<vmem>>, vector<1x1x32xf32>
    %199 = vector.shape_cast %198 : vector<1x1x32xf32> to vector<1x32xf32>
    %200 = vector.broadcast %199 : vector<1x32xf32> to vector<64x32xf32>
    %201 = arith.addf %197, %200 : vector<64x32xf32>
    %202 = arith.addf %88, %201 : vector<64x32xf32>
    %c0_90 = arith.constant 0 : index
    %c0_91 = arith.constant 0 : index
    %c0_92 = arith.constant 0 : index
    %203 = vector.load %arg18[%c0_90, %c0_91, %c0_92] : memref<1x64x32xf32, #tpu.memory_space<vmem>>, vector<1x64x32xf32>
    %204 = vector.shape_cast %203 : vector<1x64x32xf32> to vector<64x32xf32>
    %205 = vector.shape_cast %202 : vector<64x32xf32> to vector<1x64x32xf32>
    tpu.vector_store %arg18[%c0_90, %c0_91, %c0_92], %205 {strides = array<i32>} : memref<1x64x32xf32, #tpu.memory_space<vmem>>, vector<1x64x32xf32>,
    return
  }
  func.func @transform_0(%arg0: i32, %arg1: i32) -> (i32, i32, i32) {
    %c0_i32 = arith.constant 0 : i32
    %c0_i32_0 = arith.constant 0 : i32
    %c0_i32_1 = arith.constant 0 : i32
    return %arg0, %c0_i32, %c0_i32_0 : i32, i32, i32
  }
  func.func @transform_1(%arg0: i32, %arg1: i32) -> (i32, i32, i32) {
    %c0_i32 = arith.constant 0 : i32
    %c0_i32_0 = arith.constant 0 : i32
    %c0_i32_1 = arith.constant 0 : i32
    %c0_i32_2 = arith.constant 0 : i32
    return %c0_i32, %c0_i32_0, %c0_i32_1 : i32, i32, i32
  }
  func.func @transform_2(%arg0: i32, %arg1: i32) -> (i32, i32, i32) {
    %c0_i32 = arith.constant 0 : i32
    %c0_i32_0 = arith.constant 0 : i32
    %c0_i32_1 = arith.constant 0 : i32
    return %arg1, %c0_i32, %c0_i32_0 : i32, i32, i32
  }
  func.func @transform_3(%arg0: i32, %arg1: i32) -> (i32, i32, i32) {
    %c0_i32 = arith.constant 0 : i32
    %c0_i32_0 = arith.constant 0 : i32
    %c0_i32_1 = arith.constant 0 : i32
    return %arg1, %c0_i32, %c0_i32_0 : i32, i32, i32
  }
  func.func @transform_4(%arg0: i32, %arg1: i32) -> (i32, i32, i32) {
    %c0_i32 = arith.constant 0 : i32
    %c0_i32_0 = arith.constant 0 : i32
    %c0_i32_1 = arith.constant 0 : i32
    return %arg1, %c0_i32, %c0_i32_0 : i32, i32, i32
  }
  func.func @transform_5(%arg0: i32, %arg1: i32) -> (i32, i32, i32) {
    %c0_i32 = arith.constant 0 : i32
    %c0_i32_0 = arith.constant 0 : i32
    %c0_i32_1 = arith.constant 0 : i32
    return %arg1, %c0_i32, %c0_i32_0 : i32, i32, i32
  }
  func.func @transform_6(%arg0: i32, %arg1: i32) -> (i32, i32, i32) {
    %c0_i32 = arith.constant 0 : i32
    %c0_i32_0 = arith.constant 0 : i32
    %c0_i32_1 = arith.constant 0 : i32
    return %arg1, %c0_i32, %c0_i32_0 : i32, i32, i32
  }
  func.func @transform_7(%arg0: i32, %arg1: i32) -> (i32, i32, i32) {
    %c0_i32 = arith.constant 0 : i32
    %c0_i32_0 = arith.constant 0 : i32
    %c0_i32_1 = arith.constant 0 : i32
    return %arg1, %c0_i32, %c0_i32_0 : i32, i32, i32
  }
  func.func @transform_8(%arg0: i32, %arg1: i32) -> (i32, i32, i32) {
    %c0_i32 = arith.constant 0 : i32
    %c0_i32_0 = arith.constant 0 : i32
    %c0_i32_1 = arith.constant 0 : i32
    return %arg1, %c0_i32, %c0_i32_0 : i32, i32, i32
  }
  func.func @transform_9(%arg0: i32, %arg1: i32) -> (i32, i32, i32) {
    %c0_i32 = arith.constant 0 : i32
    %c0_i32_0 = arith.constant 0 : i32
    %c0_i32_1 = arith.constant 0 : i32
    return %arg1, %c0_i32, %c0_i32_0 : i32, i32, i32
  }
  func.func @transform_10(%arg0: i32, %arg1: i32) -> (i32, i32, i32) {
    %c0_i32 = arith.constant 0 : i32
    %c0_i32_0 = arith.constant 0 : i32
    %c0_i32_1 = arith.constant 0 : i32
    return %arg1, %c0_i32, %c0_i32_0 : i32, i32, i32
  }
  func.func @transform_11(%arg0: i32, %arg1: i32) -> (i32, i32, i32) {
    %c0_i32 = arith.constant 0 : i32
    %c0_i32_0 = arith.constant 0 : i32
    %c0_i32_1 = arith.constant 0 : i32
    return %arg1, %c0_i32, %c0_i32_0 : i32, i32, i32
  }
  func.func @transform_12(%arg0: i32, %arg1: i32) -> (i32, i32, i32) {
    %c0_i32 = arith.constant 0 : i32
    %c0_i32_0 = arith.constant 0 : i32
    %c0_i32_1 = arith.constant 0 : i32
    return %arg1, %c0_i32, %c0_i32_0 : i32, i32, i32
  }
  func.func @transform_13(%arg0: i32, %arg1: i32) -> (i32, i32, i32) {
    %c0_i32 = arith.constant 0 : i32
    %c0_i32_0 = arith.constant 0 : i32
    %c0_i32_1 = arith.constant 0 : i32
    return %arg1, %c0_i32, %c0_i32_0 : i32, i32, i32
  }
  func.func @transform_14(%arg0: i32, %arg1: i32) -> (i32, i32, i32) {
    %c0_i32 = arith.constant 0 : i32
    %c0_i32_0 = arith.constant 0 : i32
    %c0_i32_1 = arith.constant 0 : i32
    return %arg1, %c0_i32, %c0_i32_0 : i32, i32, i32
  }
  func.func @transform_15(%arg0: i32, %arg1: i32) -> (i32, i32, i32) {
    %c0_i32 = arith.constant 0 : i32
    %c0_i32_0 = arith.constant 0 : i32
    %c0_i32_1 = arith.constant 0 : i32
    return %arg1, %c0_i32, %c0_i32_0 : i32, i32, i32
  }
  func.func @transform_16(%arg0: i32, %arg1: i32) -> (i32, i32, i32) {
    %c0_i32 = arith.constant 0 : i32
    %c0_i32_0 = arith.constant 0 : i32
    %c0_i32_1 = arith.constant 0 : i32
    return %arg0, %c0_i32, %c0_i32_0 : i32, i32, i32
  }
}

</mosaic_0001>

<bundles_post_ra>
// kernel: transformer_forward.1
= control target key start
LH: loop header
LB: loop body
LE: loop exit
PB: predicated region body
PF: predicated region fallthrough
CT: control target
= control target key end

     0   :  { %s6415_s0 = inlined_call_operand.vmem [shape: f32[2,64,32], index: 0, kind: input, shape index: {}]   ;;  %s6416_s1 = inlined_call_operand.hbm [shape: f32[4,64,64], index: 1, kind: input, shape index: {}]   ;;  %s6417_s2 = inlined_call_operand.vmem [shape: f32[2,1,32], index: 2, kind: input, shape index: {}]   ;;  %s6418_s3 = inlined_call_operand.vmem [shape: f32[2,1,32], index: 3, kind: input, shape index: {}]   ;;  %s6419_s4 = inlined_call_operand.vmem [shape: bf16[2,32,96], index: 4, kind: input, shape index: {}]   ;;  %s6420_s5 = inlined_call_operand.vmem [shape: f32[2,1,96], index: 5, kind: input, shape index: {}]   ;;  %s6421_s6 = inlined_call_operand.hbm [shape: bf16[2,32,32], index: 6, kind: input, shape index: {}]   ;;  %s6422_s7 = inlined_call_operand.vmem [shape: f32[2,1,32], index: 7, kind: input, shape index: {}]   ;;  %s6423_s8 = inlined_call_operand.vmem [shape: f32[2,1,32], index: 8, kind: input, shape index: {}]   ;;  %s6424_s9 = inlined_call_operand.vmem [shape: f32[2,1,32], index: 9, kind: input, shape index: {}]   ;;  %s6425_s10 = inlined_call_operand.hbm [shape: bf16[2,32,128], index: 10, kind: input, shape index: {}]   ;;  %s6426_s11 = inlined_call_operand.vmem [shape: f32[2,1,128], index: 11, kind: input, shape index: {}]   ;;  %s6427_s12 = inlined_call_operand.vmem [shape: f32[2,9,128], index: 12, kind: input, shape index: {}]   ;;  %s6428_s13 = inlined_call_operand.vmem [shape: f32[2,1,128], index: 13, kind: input, shape index: {}]   ;;  %s6429_s14 = inlined_call_operand.vmem [shape: bf16[2,128,32], index: 14, kind: input, shape index: {}]   ;;  %s6430_s15 = inlined_call_operand.vmem [shape: f32[2,1,32], index: 15, kind: input, shape index: {}]   ;;  %s6431_s16 = inlined_call_operand.hbm [shape: f32[2,64,32], index: 16, kind: output, shape index: {}]  }
   0x1   :  { %6459 = sst [smem:[#allocation37_spill]] %s6415_s0 }
   0x2   :  { %6460 = sst [smem:[#allocation38_spill]] %s6416_s1 }
   0x3   :  { %6461 = sst [smem:[#allocation39_spill]] %s6419_s4 }
   0x4   :  { %6462 = sst [smem:[#allocation40_spill]] %s6420_s5 }
   0x5   :  { %6463 = sst [smem:[#allocation41_spill]] %s6421_s6 }
   0x6   :  { %6464 = sst [smem:[#allocation42_spill]] %s6422_s7 }
   0x7   :  { %6465 = sst [smem:[#allocation43_spill]] %s6423_s8 }
   0x8   :  { %6466 = sst [smem:[#allocation44_spill]] %s6424_s9 }
   0x9   :  { %6467 = sst [smem:[#allocation45_spill]] %s6425_s10 }
   0xa   :  { %6468 = sst [smem:[#allocation46_spill]] %s6426_s11 }
   0xb   :  { %6469 = sst [smem:[#allocation47_spill]] %s6427_s12 }
   0xc   :  { %6470 = sst [smem:[#allocation48_spill]] %s6428_s13 }
   0xd   :  { %6471 = sst [smem:[#allocation49_spill]] %s6429_s14 }
   0xe   :  { %6472 = sst [smem:[#allocation50_spill]] %s6430_s15 }
   0xf   :  { %6473 = sst [smem:[#allocation51_spill]] %s6431_s16 }
  0x10   :  { %21 = vsyncpa [#allocation3], 0 }
  0x11   :  { %22 = vsyncpa [#allocation6], 0 }
  0x12   :  { %24 = vsyncpa [#allocation6 + $0x1], 0 }
  0x13   :  { %25 = vsyncpa [#allocation4], 0 }
  0x14   :  { %27 = vsyncpa [#allocation4 + $0x1], 0  ;;  %s4467_s21 = smov 0   ;;  %s4469_s22 = smov 0  }
  0x15   :  { %s4471_s23 = smov 0   ;;  %s4473_s24 = smov 0  }
  0x16   :  { %s4475_s25 = smov 0   ;;  %s4477_s26 = smov 0  }
  0x17   :  { %s4479_s27 = smov 0   ;;  %s4481_s28 = smov 0  }
  0x18   :  { %s4483_s29 = smov 0   ;;  %s4485_s30 = smov 0  }
  0x19   :  { %s4487_s0 = smov 0  }
  0x1a LB: > { %6474 = sst [smem:[#allocation12_spill]] %s4327_s21  ;;  %s42_s17 = sadd.s32 1, %s4359_s29  ;;  %s4367_s0 = sphi %s4487_s0, %s33_s0   ;;  %s4363_s30 = sphi %s4485_s30, %s6600_s30   ;;  %s4359_s29 = sphi %s4483_s29, %s6599_s29   ;;  %s4355_s28 = sphi %s4481_s28, %s6598_s28   ;;  %s4351_s27 = sphi %s4479_s27, %s6597_s27   ;;  %s4347_s26 = sphi %s4477_s26, %s6596_s26   ;;  %s4343_s25 = sphi %s4475_s25, %s6595_s25   ;;  %s4339_s24 = sphi %s4473_s24, %s6594_s24   ;;  %s4335_s23 = sphi %s4471_s23, %s6593_s23   ;;  %s4331_s22 = sphi %s4469_s22, %s6592_s22   ;;  %s4327_s21 = sphi %s4467_s21, %s6591_s21  }
  0x1b   : > { %6475 = sst [smem:[#allocation13_spill]] %s4331_s22  ;;  %s45_s18 = sadd.s32 1, %s4363_s30 }
  0x1c   : > { %6476 = sst [smem:[#allocation14_spill]] %s4335_s23  ;;  %p43_p0 = scmp.ge.s32.totalorder %s42_s17, 2 }
  0x1d   : > { %6477 = sst [smem:[#allocation15_spill]] %s4343_s25  ;;  %s203_s19 = sadd.s32 1, %s4347_s26 }
  0x1e   : > { %6478 = sst [smem:[#allocation16_spill]] %s4347_s26  ;;  %p210_p1 = scmp.ne.s32.totalorder %s4347_s26, %s4343_s25 }
  0x1f   : > { %6479 = sst [smem:[#allocation17_spill]] %s4355_s28  ;;  %p211_p2 = scmp.eq.s32.totalorder %s4367_s0, 0 }
  0x20   : > { %6480 = sst [smem:[#allocation18_spill]] %s4359_s29  ;;  %s6602_s17 = smov (%p43_p0, %s42_s17), 0 }
  0x21   : > { %6481 = sst [smem:[#allocation19_spill]] %s4363_s30  ;;  %s6604_s18 = smov (!%p43_p0, %s45_s18), %s4363_s30 }
  0x22   : > { %6482 = sst [smem:[#allocation20_spill]] %s4367_s0  ;;  %s200_s20 = ssub.s32 %s4359_s29, %s6602_s17 }
  0x23   : > { %6483 = sst [smem:[#allocation21_spill]] %s6602_s17  ;;  %p4533_p3 = por %p211_p2, %p210_p1 }
  0x24   : > { %p47_p4 = scmp.ge.s32.totalorder %s6604_s18, 2  ;;  %p201_p5 = scmp.eq.s32.totalorder %s200_s20, 0 }
  0x25   : > { %p3859_p6 = scmp.lt.s32.totalorder %s4367_s0, 4  ;;  %s548_s13 = sand.u32 1, %s4367_s0  }
  0x26   : > { %s6606_s18 = smov (%p47_p4, %s6604_s18), 0  ;;  %s550_s17 = sand.u32 1, %s4347_s26  }
  0x27   : > { %6485 = sst [smem:[#allocation22_spill]] %s6606_s18  ;;  %s460_s15 = ssub.s32 %s4363_s30, %s6606_s18 }
  0x28   : > { %s4541_s14 = scalar_select %p201_p5, %s4347_s26, %s203_s19  }
  0x29   : > { %p4546_p7 = scmp.eq.s32.totalorder %s460_s15, 0  ;;  %s3810_s11 = sshll.u32 %s4359_s29, 4 }
  0x2a   : > { %6486 = sst [smem:[#allocation23_spill]] %s4541_s14  ;;  %s3617_s9 = sshll.u32 %s550_s17, 4 }
  0x2b   : > { %s6488_s6 = sld [smem:[#allocation41_spill]]  ;;  %s552_s4 = scalar_lea.vmem [#allocation5], %s3617_s9 }
  0x2c   : > { %s560_s19 = sshll.u32 %s552_s4, 4  ;;  %p4559_p8 = pnand %p3859_p6, %p4533_p3  ;;  %s561_s19 = int_to_ptr.vmem [resolvable:$true] %s560_s19 }
  0x2d   : > { %s4563_s7 = scalar_lea.sflag [#allocation6], %s548_s13  ;;  %s4369_s8 = smov 64  }
  0x2e   : > { %s4370_s17 = smov 4   ;;  %s6490_s10 = sld [smem:[#allocation45_spill]] }
  0x2f   : > { %s4578_s30 = sadd.s32 4294967295, %s4367_s0   ;;  %p216_p9 = scmp.ne.s32.totalorder %s4343_s25, %s4339_s24 }
  0x30   : > { %p217_p10 = scmp.eq.s32.totalorder %s4578_s30, 0  ;;  %p473_p12 = scmp.ne.s32.totalorder %s4335_s23, %s4331_s22 }
  0x31   : > { %s557_s20 = scalar_lea.hbm %s6488_s6, %s3810_s11  ;;  %s592_s6 = scalar_lea.vmem [#allocation7], %s3617_s9 }
  0x32   : > { %s558_s5 = sshll.u32 %s557_s20, 4  ;;  %s4574_s13 = sshll.u32 %s592_s6, 4  ;;  %s559_s5 = int_to_ptr.hbm [resolvable:$true] %s558_s5  ;;  %s601_s13 = int_to_ptr.vmem [resolvable:$true] %s4574_s13 }
  0x33   : > { %3850 = dma.hbm_to_vmem [thread:$0]  (!%p4559_p8), %s559_s5, 256, %s561_s19, %s4563_s7, %s4369_s8, %s4369_s8, %s4370_s17  }
  0x34   : > { %s597_s20 = scalar_lea.hbm %s6490_s10, %s3810_s11  ;;  %s3613_s5 = sadd.s32 4294967294, %s4367_s0  }
  0x35   : > { %s598_s18 = sshll.u32 %s597_s20, 4  ;;  %s463_s19 = sadd.s32 1, %s4335_s23  ;;  %s599_s18 = int_to_ptr.hbm [resolvable:$true] %s598_s18 }
  0x36   : > { %s4588_s11 = scalar_select %p4546_p7, %s4335_s23, %s463_s19  }
  0x37   : > { %p4592_p11 = por %p217_p10, %p216_p9  ;;  %p474_p13 = scmp.eq.s32.totalorder %s4578_s30, 3 }
  0x38   : > { %6491 = sst [smem:[#allocation24_spill]] %s4588_s11  ;;  %p479_p0 = scmp.ne.s32.totalorder %s4331_s22, %s4327_s21 }
  0x39   : > { %p480_p1 = scmp.eq.s32.totalorder %s3613_s5, 3  ;;  %p3614_p2 = scmp.ge.s32.totalorder %s4367_s0, 1 }
  0x3a   : > { %p4602_p3 = por %p474_p13, %p473_p12  ;;  %p487_p4 = scmp.lt.s32.totalorder %s4367_s0, 5 }
  0x3b   : > { %p4607_p5 = por %p480_p1, %p479_p0  ;;  %s6497_s1 = sld [smem:[#allocation38_spill]] }
  0x3c   : > { %s6493_s9 = scalar_select %p4602_p3, 1, 0 }
  0x3d   : > { %s6495_s12 = scalar_select %p4607_p5, 1, 0 }
  0x3e   : > { %6494 = sst [smem:[#allocation25_spill]] %s6493_s9  ;;  %p488_p6 = pnand %p3614_p2, %p487_p4 }
  0x3f   : > { %6496 = sst [smem:[#allocation26_spill]] %s6495_s12  ;;  %s4371_s20 = smov [#allocation2]  }
  0x40   : > { %p3843_p7 = pneg %p488_p6  ;;  %s500_s19 = sshll.u32 %s4371_s20, 4  ;;  %s501_s19 = int_to_ptr.vmem [resolvable:$true] %s500_s19 }
  0x41   : > { %s498_s16 = sshll.u32 %s6497_s1, 4  ;;  %s4372_s5 = smov 128   ;;  %s499_s16 = int_to_ptr.hbm [resolvable:$true] %s498_s16 }
  0x42   : > { %p3844_p9 = pnand %p3843_p7, %p217_p10  ;;  %s4373_s10 = smov 8  }
  0x43   : > { %3853 = dma.hbm_to_vmem [thread:$0]  (!%p4559_p8), %s599_s18, 256, %s601_s13, %s4563_s7, %s4369_s8, %s4369_s8, %s4370_s17  }
  0x44   : > { %3846 = dma.hbm_to_vmem [thread:$0]  (!%p3844_p9), %s499_s16, 4096, %s501_s19, [#allocation3], %s4372_s5, %s4372_s5, %s4373_s10  }
  0x45   : > { %646 = sbr.rel (%p488_p6) target bundleno = 2620 (0xa3c), region = 84 }
  0x4a   : > { %4314 = dma.done.wait (%p217_p10), [#allocation3], 4096  }
  0x4b   : > { %4316 = vsyncadd (%p217_p10), [#allocation3], 4294963200  ;;  %s653_s24 = sand.u32 1, %s4578_s30   ;;  %s655_s15 = sand.u32 1, %s4343_s25  }
  0x4c   : > { %s4630_s4 = sshll.u32 %s655_s15, 4  ;;  %s654_s20 = scalar_lea.sflag [#allocation6], %s653_s24 }
  0x4d   : > { %4318 = dma.done.wait (%p4592_p11), %s654_s20, 512  }
  0x4e   : > { %4320 = vsyncadd (%p4592_p11), %s654_s20, 4294966784  ;;  %s6436_s10 = sand.u32 1, %s4331_s22   ;;  %p769_p8 = scmp.lt.s32.totalorder %s4355_s28, 1 }
  0x4f   : > { %s3627_s30 = sshll.u32 %s6436_s10, 6  ;;  %p774_p10 = scmp.lt.s32.totalorder %s4351_s27, 1 }
  0x50   : > { %s770_s7 = scalar_select %p769_p8, %s4355_s28, 1 }
  0x51   : > { %s4644_s8 = scalar_select %p774_p10, %s4351_s27, 1 }
  0x52   : > { %s3812_s17 = sshll.u32 %s770_s7, 6  ;;  %s6498_s16 = sld [smem:[#allocation37_spill]] }
  0x53   : > { %s3813_s1 = sshll.u32 %s4644_s8, 4  ;;  %s6499_s26 = sld [smem:[#allocation39_spill]] }
  0x54   : > { %s6500_s13 = sld [smem:[#allocation40_spill]]  ;;  %s3815_s12 = sshll.u32 %s4644_s8, 6 }
  0x55   : > { %s6505_s11 = sld [smem:[#allocation47_spill]]  ;;  %s667_s9 = scalar_lea.vmem [#allocation7], %s4630_s4 }
  0x56   : > { %s6506_s23 = sld [smem:[#allocation48_spill]]  ;;  %s4705_s14 = scalar_lea.vmem [#allocation8], %s3627_s30 }
  0x57   : > { %s6507_s24 = sld [smem:[#allocation50_spill]]  ;;  %p3636_p11 = scmp.ne.s32.totalorder %s4351_s27, 0 }
  0x58   : > { %s4649_s19 = scalar_lea.vmem %s6498_s16, %s3812_s17  ;;  %s6508_s20 = sld [smem:[#allocation49_spill]] }
  0x59   : > { %s4663_s25 = scalar_lea.vmem %s6499_s26, %s3813_s1  ;;  %s6504_s26 = sld [smem:[#allocation46_spill]] }
  0x5a   : > { %s787_s6 = scalar_lea.vmem %s6500_s13, %s4644_s8 }
  0x5b   : > { %s4688_s7 = scalar_lea.vmem %s6505_s11, %s3813_s1  ;;  %820 = sbr.rel (%p3636_p11) target bundleno = 105 (0x69), region = 100 }
  0x5c   : > { %s807_s16 = scalar_lea.vmem %s6506_s23, %s4644_s8 }
  0x5d   : > { %s815_s21 = scalar_lea.vmem %s6507_s24, %s4644_s8 }
  0x5e   : > { %s4702_s0 = scalar_lea.vmem %s6508_s20, %s3815_s12 }
  0x5f   : > { %s799_s29 = scalar_lea.vmem %s6504_s26, %s4644_s8 }
  0x60   : > { %v821_v0 = vld [vmem:[%s4649_s19] sm:$0xff]  ;;  %vm829_vm0 = vcmask 261120   ;;  %v822_v1 = vld [vmem:[%s4649_s19 + $0x8] sm:$0xff]  ;;  %v823_v2 = vld [vmem:[%s4649_s19 + $0x10] sm:$0xff] }
  0x61   : > { %830 = vst.msk [vmem:[%s4705_s14] sm:$0xff] %vm829_vm0, %v821_v0  ;;  %v824_v3 = vld [vmem:[%s4649_s19 + $0x18] sm:$0xff]  ;;  %v825_v4 = vld [vmem:[%s4649_s19 + $0x20] sm:$0xff]  ;;  %v826_v5 = vld [vmem:[%s4649_s19 + $0x28] sm:$0xff] }
  0x62   : > { %831 = vst.msk [vmem:[%s4705_s14 + $0x8] sm:$0xff] %vm829_vm0, %v822_v1  ;;  %v827_v6 = vld [vmem:[%s4649_s19 + $0x30] sm:$0xff]  ;;  %v828_v7 = vld [vmem:[%s4649_s19 + $0x38] sm:$0xff] }
  0x63   : > { %832 = vst.msk [vmem:[%s4705_s14 + $0x10] sm:$0xff] %vm829_vm0, %v823_v2 }
  0x64   : > { %833 = vst.msk [vmem:[%s4705_s14 + $0x18] sm:$0xff] %vm829_vm0, %v824_v3 }
  0x65   : > { %834 = vst.msk [vmem:[%s4705_s14 + $0x20] sm:$0xff] %vm829_vm0, %v825_v4 }
  0x66   : > { %835 = vst.msk [vmem:[%s4705_s14 + $0x28] sm:$0xff] %vm829_vm0, %v826_v5 }
  0x67   : > { %836 = vst.msk [vmem:[%s4705_s14 + $0x30] sm:$0xff] %vm829_vm0, %v827_v6 }
  0x68   : > { %837 = vst.msk [vmem:[%s4705_s14 + $0x38] sm:$0xff] %vm829_vm0, %v828_v7 }
  0x69 PF: > { %vm848_vm1 = vcmask 261120   ;;  %v838_v10 = vld [vmem:[%s4705_s14] sm:$0xff]  ;;  %v839_v16 = vld [vmem:[%s4705_s14 + $0x8] sm:$0xff]  ;;  %v4374_v24 = vmov 32.0   ;;  %s6514_s12 = scalar_lea.vmem %s6418_s3, %s4644_s8  ;;  %s4375_s11 = smov 80  }
  0x6a   : > { %v849_v13 = vsel %vm848_vm1, %v838_v10, 0.0  ;;  %v852_v19 = vsel %vm848_vm1, %v839_v16, 0.0  ;;  %v840_v20 = vld [vmem:[%s4705_s14 + $0x10] sm:$0xff]  ;;  %4013 = vrcp.f32 %v4374_v24  ;;  %s4377_s13 = smov 112   ;;  %s4378_s17 = smov 48  }
  0x6b   : > { %850 = vadd.xlane.f32.xlu2 %v849_v13  ;;  %v841_v21 = vld [vmem:[%s4705_s14 + $0x18] sm:$0xff]  ;;  %v855_v22 = vsel %vm848_vm1, %v840_v20, 0.0  ;;  %v3816_v13 = vld [vmem:[%s4663_s25] sm:$0xff]  ;;  %s4379_s23 = smov 64   ;;  %s6520_s5 = scalar_lea.vmem [#allocation5], %s4630_s4 }
  0x6c   : > { %v842_v9 = vld [vmem:[%s4705_s14 + $0x20] sm:$0xff]  ;;  %v858_v23 = vsel %vm848_vm1, %v841_v21, 0.0  ;;  %s6521_s15 = smov %s6520_s5  ;;  %s6522_s18 = sld [smem:[#allocation42_spill]] }
  0x6d   : > { %v861_v12 = vsel %vm848_vm1, %v842_v9, 0.0  ;;  %v843_v15 = vld [vmem:[%s4705_s14 + $0x28] sm:$0xff]  ;;  %s6532_s1 = sld [smem:[#allocation43_spill]]  ;;  %s3364_s10 = sshll.u32 %s4705_s14, 4  ;;  %s3365_s10 = int_to_ptr.vmem [resolvable:$true] %s3364_s10 }
  0x6e   : > { %v844_v8 = vld [vmem:[%s4705_s14 + $0x30] sm:$0xff]  ;;  %862 = vadd.xlane.f32.xlu0 %v861_v12  ;;  %v864_v18 = vsel %vm848_vm1, %v843_v15, 0.0  ;;  %s6534_s28 = sld [smem:[#allocation44_spill]] }
  0x6f   : > { %v867_v11 = vsel %vm848_vm1, %v844_v8, 0.0  ;;  %v845_v14 = vld [vmem:[%s4705_s14 + $0x38] sm:$0xff] }
  0x70   : > { %868 = vadd.xlane.f32.xlu1 %v867_v11  ;;  %v870_v17 = vsel %vm848_vm1, %v845_v14, 0.0  ;;  %v4014_v25 = vpop.eup %4013 }
  0x71   : > { %v874_v26 = vmul.f32 32.0, %v4014_v25  ;;  %vm878_vm2 = vweird.f32 %v4014_v25 }
  0x72   : > { %s6523_s20 = scalar_lea.vmem %s6522_s18, %s4644_s8 }
  0x73   : > { %853 = vadd.xlane.f32.xlu2 %v852_v19  ;;  %v875_v27 = vsub.f32 1.0, %v874_v26  ;;  %s6533_s22 = scalar_lea.vmem %s6532_s1, %s4644_s8 }
  0x75   : > { %v876_v28 = vmul.f32 %v4014_v25, %v875_v27 }
  0x76   : > { %865 = vadd.xlane.f32.xlu0 %v864_v18 }
  0x77   : > { %v877_v29 = vadd.f32 %v4014_v25, %v876_v28 }
  0x78   : > { %871 = vadd.xlane.f32.xlu1 %v870_v17 }
  0x79   : > { %v4740_v30 = vsel %vm878_vm2, %v4014_v25, %v877_v29 }
  0x7e   : > { %856 = vadd.xlane.f32.xlu0 %v855_v22 }
  0x80   : > { %859 = vadd.xlane.f32.xlu1 %v858_v23 }
  0xde   : > { %v851_v35 = vpop.xlane.xlu2 %850 }
  0xdf   : > { %v880_v44 = vmul.f32 %v4740_v30, %v851_v35 }
  0xe1   : > { %v863_v32 = vpop.xlane.xlu0 %862  ;;  %v4764_v52 = vsub.f32 %v838_v10, %v880_v44  ;;  %v3817_v10 = vld [vmem:[%s4663_s25 + $0x8] sm:$0xff]  ;;  %s6511_s25 = scalar_lea.vmem %s6417_s2, %s4644_s8 }
  0xe2   : > { %v884_v34 = vmul.f32 %v4740_v30, %v863_v32  ;;  %3831 = vmatpush.bf16.msra.mxu2 %v3817_v10  ;;  %1096 = vmatpush.bf16.msra.mxu0 %v3817_v10 }
  0xe3   : > { %v869_v31 = vpop.xlane.xlu1 %868  ;;  %v896_v63 = vmul.f32 %v4764_v52, %v4764_v52 }
  0xe4   : > { %v886_v33 = vmul.f32 %v4740_v30, %v869_v31  ;;  %v4746_v37 = vsub.f32 %v842_v9, %v884_v34 }
  0xe5   : > { %v904_v3 = vsel %vm848_vm1, %v896_v63, 0.0 }
  0xe6   : > { %v4744_v36 = vsub.f32 %v844_v8, %v886_v33  ;;  %v900_v39 = vmul.f32 %v4746_v37, %v4746_v37  ;;  %v854_v47 = vpop.xlane.xlu2 %853  ;;  %3832 = vmatpush.bf16.msra.mxu2 %v3816_v13  ;;  %1097 = vmatpush.bf16.msra.mxu0 %v3816_v13 }
  0xe7   : > { %v881_v48 = vmul.f32 %v4740_v30, %v854_v47 }
  0xe8   : > { %v902_v38 = vmul.f32 %v4744_v36, %v4744_v36  ;;  %v916_v41 = vsel %vm848_vm1, %v900_v39, 0.0 }
  0xe9   : > { %v866_v43 = vpop.xlane.xlu0 %865  ;;  %917 = vadd.xlane.f32.xlu2 %v916_v41  ;;  %v4762_v51 = vsub.f32 %v839_v16, %v881_v48 }
  0xea   : > { %v922_v40 = vsel %vm848_vm1, %v902_v38, 0.0  ;;  %v885_v46 = vmul.f32 %v4740_v30, %v866_v43 }
  0xeb   : > { %v872_v42 = vpop.xlane.xlu1 %871  ;;  %923 = vadd.xlane.f32.xlu1 %v922_v40  ;;  %v897_v55 = vmul.f32 %v4762_v51, %v4762_v51 }
  0xec   : > { %v887_v45 = vmul.f32 %v4740_v30, %v872_v42  ;;  %v4760_v50 = vsub.f32 %v843_v15, %v885_v46 }
  0xed   : > { %v907_v59 = vsel %vm848_vm1, %v897_v55, 0.0 }
  0xee   : > { %v4758_v49 = vsub.f32 %v845_v14, %v887_v45  ;;  %v901_v53 = vmul.f32 %v4760_v50, %v4760_v50 }
  0xf0   : > { %v903_v54 = vmul.f32 %v4758_v49, %v4758_v49  ;;  %v919_v56 = vsel %vm848_vm1, %v901_v53, 0.0 }
  0xf1   : > { %920 = vadd.xlane.f32.xlu0 %v919_v56  ;;  %v857_v58 = vpop.xlane.xlu0 %856 }
  0xf2   : > { %v925_v57 = vsel %vm848_vm1, %v903_v54, 0.0  ;;  %v882_v61 = vmul.f32 %v4740_v30, %v857_v58 }
  0xf3   : > { %926 = vadd.xlane.f32.xlu2 %v925_v57  ;;  %v860_v60 = vpop.xlane.xlu1 %859  ;;  %908 = vadd.xlane.f32.xlu1 %v907_v59 }
  0xf4   : > { %v883_v62 = vmul.f32 %v4740_v30, %v860_v60  ;;  %v4779_v0 = vsub.f32 %v840_v20, %v882_v61 }
  0xf6   : > { %v4781_v1 = vsub.f32 %v841_v21, %v883_v62  ;;  %v898_v2 = vmul.f32 %v4779_v0, %v4779_v0 }
  0xf8   : > { %v910_v4 = vsel %vm848_vm1, %v898_v2, 0.0  ;;  %v899_v5 = vmul.f32 %v4781_v1, %v4781_v1 }
  0xf9   : > { %905 = vadd.xlane.f32.xlu0 %v904_v3 }
  0xfa   : > { %v913_v6 = vsel %vm848_vm1, %v899_v5, 0.0 }
  0xfb   : > { %911 = vadd.xlane.f32.xlu2 %v910_v4 }
 0x101   : > { %914 = vadd.xlane.f32.xlu0 %v913_v6  ;;  %v4839_v6 = vld [vmem:[%s6511_s25] ss:$0 sm:$0xff] }
 0x15c   : > { %v918_v8 = vpop.xlane.xlu2 %917 }
 0x15d   : > { %v932_v9 = vmul.f32 %v918_v8, %v4740_v30 }
 0x15e   : > { %v924_v7 = vpop.xlane.xlu1 %923 }
 0x15f   : > { %v934_v11 = vmul.f32 %v924_v7, %v4740_v30  ;;  %v940_v12 = vadd.f32 1e-06, %v932_v9 }
 0x161   : > { %v4794_v14 = vadd.f32 1e-06, %v934_v11  ;;  %4015 = vrsqrt.f32 %v940_v12  ;;  %vm990_vm4 = vweird.f32 %v940_v12 }
 0x163   : > { %4017 = vrsqrt.f32 %v4794_v14  ;;  %vm1010_vm14 = vweird.f32 %v4794_v14 }
 0x164   : > { %v921_v15 = vpop.xlane.xlu0 %920 }
 0x165   : > { %v933_v17 = vmul.f32 %v921_v15, %v4740_v30 }
 0x166   : > { %v927_v16 = vpop.xlane.xlu2 %926  ;;  %v909_v18 = vpop.xlane.xlu1 %908 }
 0x167   : > { %v935_v19 = vmul.f32 %v927_v16, %v4740_v30  ;;  %v929_v20 = vmul.f32 %v909_v18, %v4740_v30  ;;  %v941_v21 = vadd.f32 1e-06, %v933_v17  ;;  %v4016_v23 = vpop.eup %4015 }
 0x168   : > { %v985_v25 = vmul.f32 %v4016_v23, %v940_v12  ;;  %vm991_vm3 = vweird.f32 %v4016_v23 }
 0x169   : > { %v4800_v22 = vadd.f32 1e-06, %v935_v19  ;;  %v937_v24 = vadd.f32 1e-06, %v929_v20  ;;  %4019 = vrsqrt.f32 %v941_v21  ;;  %v4803_v27 = vpop.eup %4017  ;;  %vm4822_vm5 = vmor %vm990_vm4, %vm991_vm3  ;;  %vm1000_vm6 = vweird.f32 %v941_v21  ;;  %v4859_v19 = vld [vmem:[%s6514_s12] ss:$0 sm:$0xff]  ;;  %s6535_s12 = scalar_lea.vmem %s6534_s28, %s4644_s8 }
 0x16a   : > { %v986_v26 = vmul.f32 %v4016_v23, %v985_v25  ;;  %v1005_v35 = vmul.f32 %v4803_v27, %v4794_v14  ;;  %vm1011_vm15 = vweird.f32 %v4803_v27  ;;  %s6582_s8 = sld [smem:[#allocation13_spill]] }
 0x16b   : > { %4021 = vrsqrt.f32 %v937_v24  ;;  %vm960_vm8 = vweird.f32 %v937_v24  ;;  %vm1020_vm12 = vweird.f32 %v4800_v22  ;;  %vm4880_vm4 = vmor %vm1010_vm14, %vm1011_vm15 }
 0x16c   : > { %4023 = vrsqrt.f32 %v4800_v22  ;;  %v906_v28 = vpop.xlane.xlu0 %905  ;;  %v987_v31 = vmul.f32 0.5, %v986_v26  ;;  %v1006_v48 = vmul.f32 %v4803_v27, %v1005_v35 }
 0x16d   : > { %v928_v32 = vmul.f32 %v906_v28, %v4740_v30 }
 0x16e   : > { %v912_v29 = vpop.xlane.xlu2 %911  ;;  %v988_v38 = vsub.f32 1.5, %v987_v31  ;;  %v1007_v2 = vmul.f32 0.5, %v1006_v48 }
 0x16f   : > { %v930_v33 = vmul.f32 %v912_v29, %v4740_v30  ;;  %v4020_v34 = vpop.eup %4019  ;;  %v4809_v39 = vadd.f32 1e-06, %v928_v32 }
 0x170   : > { %v995_v41 = vmul.f32 %v4020_v34, %v941_v21  ;;  %v989_v44 = vmul.f32 %v4016_v23, %v988_v38  ;;  %vm1001_vm7 = vweird.f32 %v4020_v34  ;;  %v1008_v15 = vsub.f32 1.5, %v1007_v2 }
 0x171   : > { %v4811_v40 = vpop.eup %4021  ;;  %v4813_v42 = vadd.f32 1e-06, %v930_v33  ;;  %4025 = vrsqrt.f32 %v4809_v39  ;;  %vm1002_vm10 = vmor %vm1000_vm6, %vm1001_vm7  ;;  %vm950_vm0 = vweird.f32 %v4809_v39 }
 0x172   : > { %v4815_v43 = vpop.eup %4023  ;;  %v955_v45 = vmul.f32 %v4811_v40, %v937_v24  ;;  %v996_v46 = vmul.f32 %v4020_v34, %v995_v41  ;;  %v993_v55 = vsel %vm4822_vm5, %v4016_v23, %v989_v44  ;;  %vm961_vm9 = vweird.f32 %v4811_v40 }
 0x173   : > { %v1015_v47 = vmul.f32 %v4815_v43, %v4800_v22  ;;  %4027 = vrsqrt.f32 %v4813_v42  ;;  %v1028_v3 = vmul.f32 %v993_v55, %v4746_v37  ;;  %vm4844_vm11 = vmor %vm960_vm8, %vm961_vm9  ;;  %vm1021_vm13 = vweird.f32 %v4815_v43 }
 0x174   : > { %v956_v54 = vmul.f32 %v4811_v40, %v955_v45  ;;  %v997_v56 = vmul.f32 0.5, %v996_v46  ;;  %v915_v58 = vpop.xlane.xlu0 %914  ;;  %v1009_v22 = vmul.f32 %v4803_v27, %v1008_v15  ;;  %vm4874_vm3 = vmor %vm1020_vm12, %vm1021_vm13  ;;  %vm970_vm8 = vweird.f32 %v4813_v42 }
 0x175   : > { %v1016_v57 = vmul.f32 %v4815_v43, %v1015_v47  ;;  %v931_v60 = vmul.f32 %v915_v58, %v4740_v30  ;;  %v1039_v18 = vmul.f32 %v4839_v6, %v1028_v3  ;;  %vm1147_vm12 = vcmask 130048  }
 0x176   : > { %v957_v59 = vmul.f32 0.5, %v956_v54  ;;  %v998_v61 = vsub.f32 1.5, %v997_v56  ;;  %v1013_v41 = vsel %vm4880_vm4, %v4803_v27, %v1009_v22  ;;  %vm1229_vm13 = vcmask 523264  }
 0x177   : > { %v1017_v62 = vmul.f32 0.5, %v1016_v57  ;;  %v4026_v63 = vpop.eup %4025  ;;  %v939_v5 = vadd.f32 1e-06, %v931_v60  ;;  %v1050_v14 = vadd.f32 %v4859_v19, %v1039_v18  ;;  %v1030_v27 = vmul.f32 %v1013_v41, %v4744_v36 }
 0x178   : > { %v958_v4 = vsub.f32 1.5, %v957_v59  ;;  %v999_v7 = vmul.f32 %v4020_v34, %v998_v61  ;;  %v945_v8 = vmul.f32 %v4026_v63, %v4809_v39  ;;  %vm951_vm2 = vweird.f32 %v4026_v63 }
 0x179   : > { %4029 = vrsqrt.f32 %v939_v5  ;;  %v4848_v37 = vpop.eup %4027  ;;  %v1018_v12 = vsub.f32 1.5, %v1017_v62  ;;  %vm952_vm5 = vmor %vm950_vm0, %vm951_vm2  ;;  %vm980_vm6 = vweird.f32 %v939_v5 }
 0x17a   : > { %v959_v9 = vmul.f32 %v4811_v40, %v958_v4  ;;  %v1003_v11 = vsel %vm1002_vm10, %v4020_v34, %v999_v7  ;;  %v946_v13 = vmul.f32 %v4026_v63, %v945_v8  ;;  %v965_v17 = vmul.f32 %v4848_v37, %v4813_v42 }
 0x17b   : > { %v1029_v16 = vmul.f32 %v1003_v11, %v4760_v50  ;;  %v1019_v24 = vmul.f32 %v4815_v43, %v1018_v12  ;;  %vm971_vm9 = vweird.f32 %v4848_v37  ;;  %v1041_v42 = vmul.f32 %v4839_v6, %v1030_v27 }
 0x17c   : > { %v963_v20 = vsel %vm4844_vm11, %v4811_v40, %v959_v9  ;;  %v947_v50 = vmul.f32 0.5, %v946_v13  ;;  %v966_v21 = vmul.f32 %v4848_v37, %v965_v17  ;;  %vm972_vm11 = vmor %vm970_vm8, %vm971_vm9 }
 0x17d   : > { %v1040_v23 = vmul.f32 %v4839_v6, %v1029_v16  ;;  %v1025_v28 = vmul.f32 %v963_v20, %v4762_v51  ;;  %v1023_v51 = vsel %vm4874_vm3, %v4815_v43, %v1019_v24  ;;  %v1052_v62 = vadd.f32 %v4859_v19, %v1041_v42 }
 0x17e   : > { %v948_v25 = vsub.f32 1.5, %v947_v50  ;;  %v967_v34 = vmul.f32 0.5, %v966_v21  ;;  %v1031_v48 = vmul.f32 %v1023_v51, %v4758_v49 }
 0x17f   : > { %v4030_v26 = vpop.eup %4029  ;;  %v1051_v31 = vadd.f32 %v4859_v19, %v1040_v23  ;;  %v1036_v45 = vmul.f32 %v4839_v6, %v1025_v28 }
 0x180   : > { %v949_v33 = vmul.f32 %v4026_v63, %v948_v25  ;;  %v975_v35 = vmul.f32 %v4030_v26, %v939_v5  ;;  %v968_v46 = vsub.f32 1.5, %v967_v34  ;;  %vm981_vm7 = vweird.f32 %v4030_v26 }
 0x181   : > { %v1056_v38 = vpack.c.bf16 %v1051_v31, %v1050_v14  ;;  %vm982_vm10 = vmor %vm980_vm6, %vm981_vm7  ;;  %v1047_v54 = vadd.f32 %v4859_v19, %v1036_v45  ;;  %v1042_v49 = vmul.f32 %v4839_v6, %v1031_v48 }
 0x182   : > { %v953_v39 = vsel %vm952_vm5, %v4026_v63, %v949_v33  ;;  %v976_v40 = vmul.f32 %v4030_v26, %v975_v35  ;;  %v969_v55 = vmul.f32 %v4848_v37, %v968_v46 }
 0x183   : > { %v1024_v44 = vmul.f32 %v953_v39, %v4764_v52  ;;  %3647 = vmatmul.msk.bf16.vlgmr.msra.gmra.mxu2 %vm848_vm1, %v1056_v38  ;;  %v1053_v60 = vadd.f32 %v4859_v19, %v1042_v49 }
 0x184   : > { %v977_v47 = vmul.f32 0.5, %v976_v40  ;;  %v973_v36 = vsel %vm972_vm11, %v4848_v37, %v969_v55 }
 0x185   : > { %v1035_v43 = vmul.f32 %v4839_v6, %v1024_v44  ;;  %v1026_v61 = vmul.f32 %v973_v36, %v4779_v0  ;;  %v1057_v63 = vpack.c.bf16 %v1053_v60, %v1052_v62  ;;  %v4005_v0 = vld [vmem:[%s787_s6] ss:$0 sm:$0xff]  ;;  %s4376_s6 = smov 96  }
 0x186   : > { %v978_v53 = vsub.f32 1.5, %v977_v47 }
 0x187   : > { %v1046_v52 = vadd.f32 %v4859_v19, %v1035_v43  ;;  %v1037_v3 = vmul.f32 %v4839_v6, %v1026_v61 }
 0x188   : > { %v979_v56 = vmul.f32 %v4030_v26, %v978_v53 }
 0x189   : > { %v1054_v57 = vpack.c.bf16 %v1047_v54, %v1046_v52  ;;  %v1048_v5 = vadd.f32 %v4859_v19, %v1037_v3 }
 0x18a   : > { %v983_v58 = vsel %vm982_vm10, %v4030_v26, %v979_v56 }
 0x18b   : > { %3645 = vmatmul.msk.bf16.vlgmr.msra.gmra.mxu0 %vm848_vm1, %v1054_v57  ;;  %v1027_v59 = vmul.f32 %v983_v58, %v4781_v1 }
 0x18d   : > { %v1038_v2 = vmul.f32 %v4839_v6, %v1027_v59 }
 0x18f   : > { %v1049_v4 = vadd.f32 %v4859_v19, %v1038_v2 }
 0x191   : > { %v1055_v7 = vpack.c.bf16 %v1049_v4, %v1048_v5 }
 0x193   : > { %3648 = vmatmul.msk.bf16.gmra.mxu2 %vm848_vm1, %v1057_v63 }
 0x19b   : > { %3646 = vmatmul.msk.bf16.gmra.mxu0 %vm848_vm1, %v1055_v7 }
 0x206   : > { %v1109_v1 = vpop.f32.mrf.mxu2 }
 0x207   : > { %v4920_v8 = vadd.f32 %v4005_v0, %v1109_v1 }
 0x208   : > { %v1099_v6 = vpop.f32.mrf.mxu0 }
 0x209   : > { %1435 = vrot.lane.b32.xlu0 %v4920_v8, %s4375_s11  ;;  %v4953_v50 = vadd.f32 %v4005_v0, %v1099_v6 }
 0x20e   : > { %v1111_v9 = vpop.f32.mrf.mxu2 }
 0x20f   : > { %v4924_v10 = vadd.f32 %v4005_v0, %v1111_v9 }
 0x210   : > { %v1101_v12 = vpop.f32.mrf.mxu0 }
 0x211   : > { %1437 = vrot.lane.b32.xlu2 %v4924_v10, %s4375_s11  ;;  %v4944_v19 = vadd.f32 %v4005_v0, %v1101_v12  ;;  %v3968_v21 = vpack.i.bf16 %v4920_v8, %v4924_v10 }
 0x216   : > { %v1114_v37 = vpop.f32.mrf.mxu2 }
 0x217   : > { %v4928_v11 = vadd.f32 %v4005_v0, %v1114_v37 }
 0x218   : > { %v1104_v16 = vpop.f32.mrf.mxu0 }
 0x219   : > { %1439 = vrot.lane.b32.xlu2 %v4928_v11, %s4375_s11  ;;  %v4938_v17 = vadd.f32 %v4005_v0, %v1104_v16 }
 0x21e   : > { %v1116_v13 = vpop.f32.mrf.mxu2 }
 0x21f   : > { %v4932_v15 = vadd.f32 %v4005_v0, %v1116_v13 }
 0x220   : > { %v1106_v18 = vpop.f32.mrf.mxu0 }
 0x221   : > { %1145 = vrot.lane.b32.xlu0 %v4932_v15, %s4376_s6  ;;  %1441 = vrot.lane.b32.xlu1 %v4932_v15, %s4375_s11  ;;  %v4946_v20 = vadd.f32 %v4005_v0, %v1106_v18  ;;  %v3983_v23 = vpack.i.bf16 %v4928_v11, %v4932_v15 }
 0x222   : > { %1141 = vrot.lane.b32.xlu2 %v4924_v10, %s4376_s6 }
 0x223   : > { %v3973_v24 = vpack.i.bf16 %v4938_v17, %v4946_v20 }
 0x229   : > { %1139 = vrot.lane.b32.xlu0 %v4920_v8, %s4376_s6  ;;  %1143 = vrot.lane.b32.xlu1 %v4928_v11, %s4376_s6 }
 0x22a   : > { %1431 = vrot.lane.b32.xlu2 %v4938_v17, %s4375_s11 }
 0x231   : > { %1429 = vrot.lane.b32.xlu0 %v4944_v19, %s4375_s11  ;;  %1433 = vrot.lane.b32.xlu1 %v4946_v20, %s4375_s11 }
 0x232   : > { %1135 = vrot.lane.b32.xlu2 %v4938_v17, %s4376_s6 }
 0x239   : > { %1133 = vrot.lane.b32.xlu0 %v4944_v19, %s4376_s6  ;;  %1137 = vrot.lane.b32.xlu1 %v4946_v20, %s4376_s6 }
 0x23a   : > { %1411 = vrot.lane.b32.xlu2 %v4953_v50, %s4377_s13 }
 0x241   : > { %1413 = vrot.lane.b32.xlu0 %v4944_v19, %s4377_s13  ;;  %1427 = vrot.lane.b32.xlu1 %v4953_v50, %s4375_s11 }
 0x242   : > { %1415 = vrot.lane.b32.xlu2 %v4938_v17, %s4377_s13 }
 0x249   : > { %1419 = vrot.lane.b32.xlu0 %v4920_v8, %s4377_s13  ;;  %1131 = vrot.lane.b32.xlu1 %v4953_v50, %s4376_s6 }
 0x24a   : > { %1421 = vrot.lane.b32.xlu2 %v4924_v10, %s4377_s13 }
 0x251   : > { %1425 = vrot.lane.b32.xlu0 %v4932_v15, %s4377_s13  ;;  %1417 = vrot.lane.b32.xlu1 %v4946_v20, %s4377_s13 }
 0x252   : > { %3969 = vrot.lane.b32.xlu2 %v3968_v21, %s4378_s17 }
 0x259   : > { %3964 = vrot.lane.b32.xlu0 %v3968_v21, %s4379_s23  ;;  %1423 = vrot.lane.b32.xlu1 %v4928_v11, %s4377_s13 }
 0x25a   : > { %3984 = vrot.lane.b32.xlu2 %v3983_v23, %s4379_s23 }
 0x261   : > { %3989 = vrot.lane.b32.xlu1 %v3983_v23, %s4378_s17  ;;  %3974 = vrot.lane.b32.xlu0 %v3973_v24, %s4379_s23 }
 0x269   : > { %3979 = vrot.lane.b32.xlu0 %v3973_v24, %s4378_s17 }
 0x26b   : > { %v1438_v25 = vpop.permute.xlu2 %1437 }
 0x273   : > { %v1440_v26 = vpop.permute.xlu2 %1439 }
 0x27b   : > { %v1436_v29 = vpop.permute.xlu0 %1435 }
 0x27c   : > { %v1142_v22 = vpop.permute.xlu2 %1141 }
 0x284   : > { %v1432_v28 = vpop.permute.xlu2 %1431 }
 0x28c   : > { %v1136_v14 = vpop.permute.xlu2 %1135 }
 0x293   : > { %v1146_v31 = vpop.permute.xlu0 %1145  ;;  %v1442_v32 = vpop.permute.xlu1 %1441 }
 0x294   : > { %v1412_v33 = vpop.permute.xlu2 %1411  ;;  %3649 = vmatpush.xpose.msk.msra.mxu1 %vm1147_vm12, %v1146_v31  ;;  %3673 = vmatpush.xpose.msk.msra.mxu3 %vm1147_vm12, %v1442_v32 }
 0x298   : > { %3674 = vmatpush.xpose.msk.msra.mxu3 %vm1147_vm12, %v1440_v26 }
 0x29b   : > { %v1140_v34 = vpop.permute.xlu0 %1139  ;;  %v1144_v35 = vpop.permute.xlu1 %1143 }
 0x29c   : > { %v1416_v38 = vpop.permute.xlu2 %1415  ;;  %3650 = vmatpush.xpose.msk.msra.mxu1 %vm1147_vm12, %v1144_v35  ;;  %3675 = vmatpush.xpose.msk.msra.mxu3 %vm1147_vm12, %v1438_v25 }
 0x2a0   : > { %3651 = vmatpush.xpose.msk.msra.mxu1 %vm1147_vm12, %v1142_v22  ;;  %3676 = vmatpush.xpose.msk.msra.mxu3 %vm1147_vm12, %v1436_v29 }
 0x2a3   : > { %v1430_v51 = vpop.permute.xlu0 %1429  ;;  %v1434_v39 = vpop.permute.xlu1 %1433 }
 0x2a4   : > { %v1422_v40 = vpop.permute.xlu2 %1421  ;;  %3652 = vmatpush.xpose.msk.msra.mxu1 %vm1147_vm12, %v1140_v34  ;;  %3677 = vmatpush.xpose.msk.msra.mxu3 %vm1147_vm12, %v1434_v39 }
 0x2a8   : > { %3678 = vmatpush.xpose.msk.msra.mxu3 %vm1147_vm12, %v1432_v28 }
 0x2ab   : > { %v1134_v41 = vpop.permute.xlu0 %1133  ;;  %v1138_v44 = vpop.permute.xlu1 %1137 }
 0x2ac   : > { %v3970_v45 = vpop.permute.xlu2 %3969  ;;  %3653 = vmatpush.xpose.msk.msra.mxu1 %vm1147_vm12, %v1138_v44  ;;  %3679 = vmatpush.xpose.msk.msra.mxu3 %vm1147_vm12, %v1430_v51 }
 0x2ad   : > { %v3971_v63 = vunpack.i.l.bf16 %v3970_v45  ;;  %v3972_v2 = vunpack.i.h.bf16 %v3970_v45 }
 0x2b0   : > { %3654 = vmatpush.xpose.msk.msra.mxu1 %vm1147_vm12, %v1136_v14 }
 0x2b3   : > { %v1414_v46 = vpop.permute.xlu0 %1413  ;;  %v1428_v47 = vpop.permute.xlu1 %1427 }
 0x2b4   : > { %v3985_v48 = vpop.permute.xlu2 %3984  ;;  %3655 = vmatpush.xpose.msk.msra.mxu1 %vm1147_vm12, %v1134_v41  ;;  %3680 = vmatpush.xpose.msk.msra.mxu3 %vm1147_vm12, %v1428_v47 }
 0x2b5   : > { %v3986_v43 = vunpack.i.l.bf16 %v3985_v48  ;;  %v3987_v53 = vunpack.i.h.bf16 %v3985_v48 }
 0x2b7   : > { %1374 = vmatpush.msrb.mxu2 %v3986_v43  ;;  %3681 = vmatmul.msk.f32.vlgmr.msra.gmra.mxu3 %vm1147_vm12, %v1412_v33 }
 0x2b9   : > { %1375 = vmatpush.msrb.mxu2 %v3987_v53 }
 0x2bb   : > { %v1420_v27 = vpop.permute.xlu0 %1419  ;;  %v1132_v52 = vpop.permute.xlu1 %1131 }
 0x2bc   : > { %3656 = vmatpush.xpose.msk.msra.mxu1 %vm1147_vm12, %v1132_v52 }
 0x2bf   : > { %3657 = vmatmul.msk.f32.vlgmr.msra.gmra.mxu1 %vm1147_vm12, %v4953_v50  ;;  %3682 = vmatmul.msk.f32.gmra.mxu3 %vm1147_vm12, %v1414_v46 }
 0x2c3   : > { %v1426_v54 = vpop.permute.xlu0 %1425  ;;  %v1418_v55 = vpop.permute.xlu1 %1417 }
 0x2c7   : > { %3658 = vmatmul.msk.f32.gmra.mxu1 %vm1147_vm12, %v4944_v19  ;;  %3683 = vmatmul.msk.f32.gmra.mxu3 %vm1147_vm12, %v1416_v38 }
 0x2cb   : > { %v3965_v56 = vpop.permute.xlu0 %3964  ;;  %v1424_v57 = vpop.permute.xlu1 %1423 }
 0x2cc   : > { %v3966_v49 = vunpack.i.l.bf16 %v3965_v56  ;;  %v3967_v58 = vunpack.i.h.bf16 %v3965_v56 }
 0x2ce   : > { %1376 = vmatpush.msrb.mxu2 %v3966_v49 }
 0x2cf   : > { %3659 = vmatmul.msk.f32.gmra.mxu1 %vm1147_vm12, %v4938_v17  ;;  %3684 = vmatmul.msk.f32.gmra.mxu3 %vm1147_vm12, %v1418_v55 }
 0x2d0   : > { %1377 = vmatpush.msrb.mxu2 %v3967_v58 }
 0x2d3   : > { %v3990_v42 = vpop.permute.xlu1 %3989  ;;  %v3975_v36 = vpop.permute.xlu0 %3974 }
 0x2d4   : > { %v3976_v59 = vunpack.i.l.bf16 %v3975_v36  ;;  %v3991_v60 = vunpack.i.l.bf16 %v3990_v42  ;;  %v3977_v61 = vunpack.i.h.bf16 %v3975_v36  ;;  %v3992_v62 = vunpack.i.h.bf16 %v3990_v42 }
 0x2d6   : > { %1378 = vmatpush.msrb.mxu2 %v3976_v59  ;;  %1668 = vmatpush.msrb.mxu0 %v3991_v60 }
 0x2d7   : > { %3660 = vmatmul.msk.f32.gmra.mxu1 %vm1147_vm12, %v4946_v20  ;;  %3685 = vmatmul.msk.f32.gmra.mxu3 %vm1147_vm12, %v1420_v27 }
 0x2d8   : > { %1379 = vmatpush.msrb.mxu2 %v3977_v61  ;;  %1669 = vmatpush.msrb.mxu0 %v3992_v62 }
 0x2da   : > { %1670 = vmatpush.msrb.mxu0 %v3971_v63 }
 0x2db   : > { %v3980_v3 = vpop.permute.xlu0 %3979 }
 0x2dc   : > { %1671 = vmatpush.msrb.mxu0 %v3972_v2  ;;  %v3981_v4 = vunpack.i.l.bf16 %v3980_v3  ;;  %v3982_v5 = vunpack.i.h.bf16 %v3980_v3 }
 0x2de   : > { %1672 = vmatpush.msrb.mxu0 %v3981_v4 }
 0x2df   : > { %3661 = vmatmul.msk.f32.gmra.mxu1 %vm1147_vm12, %v4920_v8  ;;  %3686 = vmatmul.msk.f32.gmra.mxu3 %vm1147_vm12, %v1422_v40 }
 0x2e0   : > { %1673 = vmatpush.msrb.mxu0 %v3982_v5 }
 0x2e7   : > { %3662 = vmatmul.msk.f32.gmra.mxu1 %vm1147_vm12, %v4924_v10  ;;  %3687 = vmatmul.msk.f32.gmra.mxu3 %vm1147_vm12, %v1424_v57 }
 0x2ef   : > { %3663 = vmatmul.msk.f32.gmra.mxu1 %vm1147_vm12, %v4928_v11  ;;  %3688 = vmatmul.msk.f32.gmra.mxu3 %vm1147_vm12, %v1426_v54  ;;  %v3993_v54 = vpack.i.bf16 %v4953_v50, %v4944_v19 }
 0x2f7   : > { %3664 = vmatmul.msk.f32.gmra.mxu1 %vm1147_vm12, %v4932_v15 }
 0x33a   : > { %v1492_v7 = vpop.f32.mrf.mxu3 }
 0x33b   : > { %v5020_v0 = vmul.f32 0.25, %v1492_v7 }
 0x33c   : > { %v1197_v1 = vpop.f32.mrf.mxu1 }
 0x33d   : > { %v5022_v8 = vmul.f32 0.25, %v1197_v1  ;;  %v1524_v6 = vsel %vm1229_vm13, %v5020_v0, -inf }
 0x33e   : > { %1525 = vmax.xlane.f32.xlu1 %v1524_v6 }
 0x33f   : > { %v1230_v9 = vsel %vm1229_vm13, %v5022_v8, -inf }
 0x340   : > { %1231 = vmax.xlane.f32.xlu2 %v1230_v9 }
 0x342   : > { %v1495_v10 = vpop.f32.mrf.mxu3 }
 0x343   : > { %v5028_v37 = vmul.f32 0.25, %v1495_v10 }
 0x344   : > { %v1200_v11 = vpop.f32.mrf.mxu1 }
 0x345   : > { %v5030_v12 = vmul.f32 0.25, %v1200_v11  ;;  %v1527_v15 = vsel %vm1229_vm13, %v5028_v37, -inf }
 0x347   : > { %v1233_v13 = vsel %vm1229_vm13, %v5030_v12, -inf }
 0x348   : > { %1234 = vmax.xlane.f32.xlu0 %v1233_v13  ;;  %1528 = vmax.xlane.f32.xlu2 %v1527_v15 }
 0x34a   : > { %v1498_v16 = vpop.f32.mrf.mxu3 }
 0x34b   : > { %v5036_v17 = vmul.f32 0.25, %v1498_v16 }
 0x34c   : > { %v1203_v18 = vpop.f32.mrf.mxu1 }
 0x34d   : > { %v5038_v20 = vmul.f32 0.25, %v1203_v18  ;;  %v1530_v23 = vsel %vm1229_vm13, %v5036_v17, -inf }
 0x34f   : > { %v1236_v21 = vsel %vm1229_vm13, %v5038_v20, -inf }
 0x350   : > { %1237 = vmax.xlane.f32.xlu1 %v1236_v21  ;;  %1531 = vmax.xlane.f32.xlu0 %v1530_v23 }
 0x352   : > { %v1501_v24 = vpop.f32.mrf.mxu3 }
 0x353   : > { %v5044_v25 = vmul.f32 0.25, %v1501_v24 }
 0x354   : > { %v1206_v26 = vpop.f32.mrf.mxu1 }
 0x355   : > { %v5046_v22 = vmul.f32 0.25, %v1206_v26  ;;  %v1533_v29 = vsel %vm1229_vm13, %v5044_v25, -inf }
 0x357   : > { %v1239_v28 = vsel %vm1229_vm13, %v5046_v22, -inf }
 0x358   : > { %1240 = vmax.xlane.f32.xlu2 %v1239_v28  ;;  %1534 = vmax.xlane.f32.xlu1 %v1533_v29 }
 0x35a   : > { %v1504_v14 = vpop.f32.mrf.mxu3 }
 0x35b   : > { %v5052_v31 = vmul.f32 0.25, %v1504_v14 }
 0x35c   : > { %v1209_v32 = vpop.f32.mrf.mxu1 }
 0x35d   : > { %v5054_v33 = vmul.f32 0.25, %v1209_v32  ;;  %v1536_v35 = vsel %vm1229_vm13, %v5052_v31, -inf }
 0x35f   : > { %v1242_v34 = vsel %vm1229_vm13, %v5054_v33, -inf }
 0x360   : > { %1243 = vmax.xlane.f32.xlu0 %v1242_v34  ;;  %1537 = vmax.xlane.f32.xlu2 %v1536_v35 }
 0x362   : > { %v1507_v38 = vpop.f32.mrf.mxu3 }
 0x363   : > { %v5060_v51 = vmul.f32 0.25, %v1507_v38 }
 0x364   : > { %v1212_v39 = vpop.f32.mrf.mxu1 }
 0x365   : > { %v5062_v40 = vmul.f32 0.25, %v1212_v39  ;;  %v1539_v44 = vsel %vm1229_vm13, %v5060_v51, -inf }
 0x367   : > { %v1245_v41 = vsel %vm1229_vm13, %v5062_v40, -inf }
 0x368   : > { %1246 = vmax.xlane.f32.xlu1 %v1245_v41  ;;  %1540 = vmax.xlane.f32.xlu0 %v1539_v44 }
 0x36a   : > { %v1510_v45 = vpop.f32.mrf.mxu3 }
 0x36b   : > { %v5072_v53 = vmul.f32 0.25, %v1510_v45 }
 0x36c   : > { %v1215_v46 = vpop.f32.mrf.mxu1 }
 0x36d   : > { %v5068_v47 = vmul.f32 0.25, %v1215_v46  ;;  %v1542_v55 = vsel %vm1229_vm13, %v5072_v53, -inf }
 0x36f   : > { %v1248_v48 = vsel %vm1229_vm13, %v5068_v47, -inf }
 0x370   : > { %1249 = vmax.xlane.f32.xlu0 %v1248_v48 }
 0x372   : > { %v1513_v43 = vpop.f32.mrf.mxu3 }
 0x373   : > { %v5074_v27 = vmul.f32 0.25, %v1513_v43 }
 0x374   : > { %v1218_v56 = vpop.f32.mrf.mxu1 }
 0x375   : > { %v1545_v52 = vsel %vm1229_vm13, %v5074_v27, -inf  ;;  %v5083_v57 = vmul.f32 0.25, %v1218_v56 }
 0x376   : > { %1546 = vmax.xlane.f32.xlu1 %v1545_v52 }
 0x377   : > { %v1251_v49 = vsel %vm1229_vm13, %v5083_v57, -inf }
 0x378   : > { %3994 = vrot.lane.b32.xlu2 %v3993_v54, %s4379_s23  ;;  %1543 = vmax.xlane.f32.xlu0 %v1542_v55 }
 0x380   : > { %1252 = vmax.xlane.f32.xlu0 %v1251_v49 }
 0x3b1   : > { %v1526_v58 = vpop.xlane.xlu1 %1525 }
 0x3b2   : > { %v1548_v42 = vsub.f32 %v5020_v0, %v1526_v58 }
 0x3b3   : > { %v1232_v36 = vpop.xlane.xlu2 %1231 }
 0x3b4   : > { %v1556_v59 = vmul.f32 1.442695, %v1548_v42  ;;  %v1254_v19 = vsub.f32 %v5022_v8, %v1232_v36 }
 0x3b6   : > { %4031 = vpow2.f32 %v1556_v59  ;;  %v1262_v50 = vmul.f32 1.442695, %v1254_v19 }
 0x3b8   : > { %4033 = vpow2.f32 %v1262_v50 }
 0x3bb   : > { %v1235_v60 = vpop.xlane.xlu0 %1234  ;;  %v1529_v61 = vpop.xlane.xlu2 %1528 }
 0x3bc   : > { %v5089_v62 = vpop.eup %4031  ;;  %v1255_v63 = vsub.f32 %v5030_v12, %v1235_v60  ;;  %v1549_v2 = vsub.f32 %v5028_v37, %v1529_v61 }
 0x3bd   : > { %v1572_v3 = vsel %vm1229_vm13, %v5089_v62, 0.0 }
 0x3be   : > { %v5095_v4 = vpop.eup %4033  ;;  %v1264_v5 = vmul.f32 1.442695, %v1255_v63  ;;  %v1558_v7 = vmul.f32 1.442695, %v1549_v2  ;;  %1573 = vadd.xlane.f32.xlu2 %v1572_v3 }
 0x3bf   : > { %v1278_v0 = vsel %vm1229_vm13, %v5095_v4, 0.0 }
 0x3c0   : > { %4035 = vpow2.f32 %v1264_v5  ;;  %1279 = vadd.xlane.f32.xlu1 %v1278_v0 }
 0x3c1   : > { %4037 = vpow2.f32 %v1558_v7 }
 0x3c3   : > { %v5099_v1 = vpop.xlane.xlu1 %1237  ;;  %v1532_v8 = vpop.xlane.xlu0 %1531 }
 0x3c4   : > { %v1550_v6 = vsub.f32 %v5036_v17, %v1532_v8 }
 0x3c6   : > { %v5102_v9 = vpop.eup %4035  ;;  %v1560_v10 = vmul.f32 1.442695, %v1550_v6 }
 0x3c7   : > { %v5104_v37 = vpop.eup %4037  ;;  %v1281_v11 = vsel %vm1229_vm13, %v5102_v9, 0.0 }
 0x3c8   : > { %1282 = vadd.xlane.f32.xlu2 %v1281_v11  ;;  %v1575_v12 = vsel %vm1229_vm13, %v5104_v37, 0.0  ;;  %4039 = vpow2.f32 %v1560_v10 }
 0x3c9   : > { %1576 = vadd.xlane.f32.xlu0 %v1575_v12 }
 0x3cb   : > { %v1241_v13 = vpop.xlane.xlu2 %1240  ;;  %v1535_v15 = vpop.xlane.xlu1 %1534 }
 0x3cc   : > { %v1257_v16 = vsub.f32 %v5046_v22, %v1241_v13  ;;  %v1551_v21 = vsub.f32 %v5044_v25, %v1535_v15 }
 0x3ce   : > { %v1268_v18 = vmul.f32 1.442695, %v1257_v16  ;;  %v5111_v17 = vpop.eup %4039  ;;  %v1562_v24 = vmul.f32 1.442695, %v1551_v21 }
 0x3cf   : > { %v1578_v23 = vsel %vm1229_vm13, %v5111_v17, 0.0 }
 0x3d0   : > { %4041 = vpow2.f32 %v1268_v18 }
 0x3d1   : > { %1579 = vadd.xlane.f32.xlu0 %v1578_v23  ;;  %4043 = vpow2.f32 %v1562_v24 }
 0x3d3   : > { %v1244_v26 = vpop.xlane.xlu0 %1243  ;;  %v1538_v28 = vpop.xlane.xlu2 %1537 }
 0x3d4   : > { %v1552_v29 = vsub.f32 %v5052_v31, %v1538_v28  ;;  %v1258_v22 = vsub.f32 %v5054_v33, %v1244_v26 }
 0x3d6   : > { %v1564_v14 = vmul.f32 1.442695, %v1552_v29  ;;  %v5117_v32 = vpop.eup %4041  ;;  %v1270_v25 = vmul.f32 1.442695, %v1258_v22 }
 0x3d7   : > { %v1287_v34 = vsel %vm1229_vm13, %v5117_v32, 0.0  ;;  %v5123_v41 = vpop.eup %4043 }
 0x3d8   : > { %4045 = vpow2.f32 %v1564_v14  ;;  %v1581_v33 = vsel %vm1229_vm13, %v5123_v41, 0.0 }
 0x3d9   : > { %1288 = vadd.xlane.f32.xlu0 %v1287_v34  ;;  %3999 = vrot.lane.b32.xlu1 %v3993_v54, %s4378_s17  ;;  %4047 = vpow2.f32 %v1270_v25 }
 0x3db   : > { %v1541_v35 = vpop.xlane.xlu0 %1540  ;;  %v1247_v38 = vpop.xlane.xlu1 %1246 }
 0x3dc   : > { %v3995_v39 = vpop.permute.xlu2 %3994  ;;  %v1259_v45 = vsub.f32 %v5062_v40, %v1247_v38  ;;  %v1553_v7 = vsub.f32 %v5060_v51, %v1541_v35 }
 0x3dd   : > { %v3996_v31 = vunpack.i.l.bf16 %v3995_v39  ;;  %v3997_v48 = vunpack.i.h.bf16 %v3995_v39 }
 0x3de   : > { %v5125_v44 = vpop.eup %4045  ;;  %v1272_v43 = vmul.f32 1.442695, %v1259_v45  ;;  %v1566_v0 = vmul.f32 1.442695, %v1553_v7 }
 0x3df   : > { %1380 = vmatpush.msrb.mxu2 %v3996_v31  ;;  %v1584_v46 = vsel %vm1229_vm13, %v5125_v44, 0.0  ;;  %v5133_v55 = vpop.eup %4047 }
 0x3e0   : > { %1585 = vadd.xlane.f32.xlu2 %v1584_v46  ;;  %4049 = vpow2.f32 %v1272_v43  ;;  %v1290_v40 = vsel %vm1229_vm13, %v5133_v55, 0.0 }
 0x3e1   : > { %1582 = vadd.xlane.f32.xlu0 %v1581_v33  ;;  %1381 = vmatpush.msrb.mxu2 %v3997_v48 }
 0x3e3   : > { %v1250_v52 = vpop.xlane.xlu0 %1249 }
 0x3e4   : > { %v1260_v54 = vsub.f32 %v5068_v47, %v1250_v52 }
 0x3e6   : > { %v1274_v56 = vmul.f32 1.442695, %v1260_v54  ;;  %v5139_v19 = vpop.eup %4049 }
 0x3e7   : > { %v1293_v61 = vsel %vm1229_vm13, %v5139_v19, 0.0 }
 0x3e8   : > { %4051 = vpow2.f32 %v1274_v56 }
 0x3e9   : > { %1291 = vadd.xlane.f32.xlu0 %v1290_v40  ;;  %v1547_v49 = vpop.xlane.xlu1 %1546 }
 0x3ea   : > { %v1555_v58 = vsub.f32 %v5074_v27, %v1547_v49  ;;  %v1256_v27 = vsub.f32 %v5038_v20, %v5099_v1 }
 0x3eb   : > { %v1544_v42 = vpop.xlane.xlu0 %1543 }
 0x3ec   : > { %v1570_v36 = vmul.f32 1.442695, %v1555_v58  ;;  %v1554_v59 = vsub.f32 %v5072_v53, %v1544_v42  ;;  %v1266_v53 = vmul.f32 1.442695, %v1256_v27 }
 0x3ee   : > { %v5141_v50 = vpop.eup %4051  ;;  %4053 = vpow2.f32 %v1570_v36  ;;  %v1568_v47 = vmul.f32 1.442695, %v1554_v59 }
 0x3ef   : > { %v1296_v60 = vsel %vm1229_vm13, %v5141_v50, 0.0 }
 0x3f0   : > { %4055 = vpow2.f32 %v1568_v47  ;;  %1297 = vadd.xlane.f32.xlu2 %v1296_v60 }
 0x3f1   : > { %1294 = vadd.xlane.f32.xlu0 %v1293_v61  ;;  %4057 = vpow2.f32 %v1266_v53 }
 0x3f2   : > { %4059 = vpow2.f32 %v1566_v0 }
 0x3f3   : > { %v1253_v8 = vpop.xlane.xlu0 %1252 }
 0x3f4   : > { %v5149_v63 = vpop.eup %4053  ;;  %v1261_v1 = vsub.f32 %v5083_v57, %v1253_v8 }
 0x3f5   : > { %v1593_v5 = vsel %vm1229_vm13, %v5149_v63, 0.0 }
 0x3f6   : > { %v5151_v2 = vpop.eup %4055  ;;  %v1276_v10 = vmul.f32 1.442695, %v1261_v1 }
 0x3f7   : > { %v1590_v3 = vsel %vm1229_vm13, %v5151_v2, 0.0  ;;  %v4058_v20 = vpop.eup %4057 }
 0x3f8   : > { %1594 = vadd.xlane.f32.xlu2 %v1593_v5  ;;  %v1284_v6 = vsel %vm1229_vm13, %v4058_v20, 0.0  ;;  %v5160_v11 = vpop.eup %4059  ;;  %4061 = vpow2.f32 %v1276_v10 }
 0x3f9   : > { %1591 = vadd.xlane.f32.xlu0 %v1590_v3  ;;  %v1587_v12 = vsel %vm1229_vm13, %v5160_v11, 0.0 }
 0x3fe   : > { %v5164_v13 = vpop.eup %4061 }
 0x3ff   : > { %v1299_v51 = vsel %vm1229_vm13, %v5164_v13, 0.0 }
 0x403   : > { %1285 = vadd.xlane.f32.xlu1 %v1284_v6 }
 0x40b   : > { %1588 = vadd.xlane.f32.xlu1 %v1587_v12 }
 0x413   : > { %1300 = vadd.xlane.f32.xlu1 %v1299_v51 }
 0x431   : > { %v1574_v15 = vpop.xlane.xlu2 %1573 }
 0x433   : > { %v1280_v16 = vpop.xlane.xlu1 %1279 }
 0x434   : > { %4063 = vrcp.f32 %v1280_v16 }
 0x43a   : > { %v4064_v57 = vpop.eup %4063 }
 0x43b   : > { %v1283_v18 = vpop.xlane.xlu2 %1282  ;;  %v1310_v21 = vmul.f32 %v4064_v57, %v5095_v4 }
 0x43c   : > { %4065 = vrcp.f32 %v1283_v18  ;;  %v1577_v23 = vpop.xlane.xlu0 %1576 }
 0x43d   : > { %3665 = vmatmul.msk.f32.vlgmr.msrb.gmra.mxu2 %vm1229_vm13, %v1310_v21  ;;  %4067 = vrcp.f32 %v1574_v15 }
 0x43e   : > { %4069 = vrcp.f32 %v1577_v23 }
 0x442   : > { %v4066_v24 = vpop.eup %4065 }
 0x443   : > { %v1311_v26 = vmul.f32 %v4066_v24, %v5102_v9  ;;  %v4068_v14 = vpop.eup %4067 }
 0x444   : > { %v1580_v28 = vpop.xlane.xlu0 %1579  ;;  %v1604_v25 = vmul.f32 %v4068_v14, %v5089_v62  ;;  %v4070_v35 = vpop.eup %4069 }
 0x445   : > { %3666 = vmatmul.msk.f32.gmra.mxu2 %vm1229_vm13, %v1311_v26  ;;  %4071 = vrcp.f32 %v1580_v28  ;;  %v1605_v9 = vmul.f32 %v4070_v35, %v5104_v37 }
 0x44b   : > { %v4000_v29 = vpop.permute.xlu1 %3999  ;;  %v4072_v39 = vpop.eup %4071 }
 0x44c   : > { %v4001_v22 = vunpack.i.l.bf16 %v4000_v29  ;;  %v4002_v34 = vunpack.i.h.bf16 %v4000_v29  ;;  %v1289_v4 = vpop.xlane.xlu0 %1288  ;;  %v1606_v31 = vmul.f32 %v4072_v39, %v5111_v17  ;;  %v4143_v39 = vld [vmem:[%s4705_s14] sm:$0xff] }
 0x44e   : > { %1674 = vmatpush.msrb.mxu0 %v4001_v22 }
 0x450   : > { %1675 = vmatpush.msrb.mxu0 %v4002_v34 }
 0x451   : > { %3689 = vmatmul.msk.f32.vlgmr.msrb.gmra.mxu0 %vm1229_vm13, %v1604_v25 }
 0x453   : > { %v1586_v45 = vpop.xlane.xlu2 %1585 }
 0x454   : > { %v1583_v38 = vpop.xlane.xlu0 %1582 }
 0x455   : > { %4073 = vrcp.f32 %v1583_v38  ;;  %v5216_v38 = vld [vmem:[%s6523_s20] ss:$0 sm:$0xff]  ;;  %s6587_s20 = sand.u32 1, %s6582_s8  }
 0x456   : > { %4075 = vrcp.f32 %v1586_v45  ;;  %s3352_s4 = scalar_lea.sflag [#allocation4], %s6587_s20 }
 0x459   : > { %3690 = vmatmul.msk.f32.gmra.mxu0 %vm1229_vm13, %v1605_v9 }
 0x45b   : > { %v4074_v33 = vpop.eup %4073 }
 0x45c   : > { %v1607_v62 = vmul.f32 %v4074_v33, %v5123_v41  ;;  %v4076_v46 = vpop.eup %4075  ;;  %v1292_v48 = vpop.xlane.xlu0 %1291 }
 0x45d   : > { %v1608_v37 = vmul.f32 %v4076_v46, %v5125_v44 }
 0x461   : > { %3691 = vmatmul.msk.f32.gmra.mxu0 %vm1229_vm13, %v1606_v31 }
 0x463   : > { %v1298_v40 = vpop.xlane.xlu2 %1297 }
 0x464   : > { %v1295_v52 = vpop.xlane.xlu0 %1294 }
 0x469   : > { %3692 = vmatmul.msk.f32.gmra.mxu0 %vm1229_vm13, %v1607_v62 }
 0x46b   : > { %v1595_v59 = vpop.xlane.xlu2 %1594 }
 0x46c   : > { %v1592_v41 = vpop.xlane.xlu0 %1591 }
 0x471   : > { %3693 = vmatmul.msk.f32.gmra.mxu0 %vm1229_vm13, %v1608_v37  ;;  %v4144_v37 = vld [vmem:[%s4705_s14 + $0x8] sm:$0xff] }
 0x476   : > { %v1286_v43 = vpop.xlane.xlu1 %1285 }
 0x477   : > { %4077 = vrcp.f32 %v1286_v43 }
 0x478   : > { %4079 = vrcp.f32 %v1289_v4 }
 0x47d   : > { %v4078_v54 = vpop.eup %4077 }
 0x47e   : > { %v1589_v17 = vpop.xlane.xlu1 %1588  ;;  %v1312_v56 = vmul.f32 %v4078_v54, %v4058_v20  ;;  %v4080_v49 = vpop.eup %4079 }
 0x47f   : > { %4081 = vrcp.f32 %v1589_v17  ;;  %v1313_v44 = vmul.f32 %v4080_v49, %v5117_v32 }
 0x480   : > { %3667 = vmatmul.msk.f32.gmra.mxu2 %vm1229_vm13, %v1312_v56  ;;  %4083 = vrcp.f32 %v1292_v48 }
 0x481   : > { %4085 = vrcp.f32 %v1592_v41  ;;  %v4145_v41 = vld [vmem:[%s4705_s14 + $0x10] sm:$0xff] }
 0x482   : > { %4087 = vrcp.f32 %v1295_v52 }
 0x483   : > { %4089 = vrcp.f32 %v1595_v59 }
 0x484   : > { %4091 = vrcp.f32 %v1298_v40 }
 0x485   : > { %v4082_v58 = vpop.eup %4081 }
 0x486   : > { %v1609_v42 = vmul.f32 %v4082_v58, %v5160_v11  ;;  %v4084_v36 = vpop.eup %4083 }
 0x487   : > { %v4086_v47 = vpop.eup %4085  ;;  %v1314_v60 = vmul.f32 %v4084_v36, %v5133_v55  ;;  %v1301_v55 = vpop.xlane.xlu1 %1300 }
 0x488   : > { %3668 = vmatmul.msk.f32.gmra.mxu2 %vm1229_vm13, %v1313_v44  ;;  %3694 = vmatmul.msk.f32.gmra.mxu0 %vm1229_vm13, %v1609_v42  ;;  %v1610_v61 = vmul.f32 %v4086_v47, %v5151_v2  ;;  %v4088_v32 = vpop.eup %4087  ;;  %4093 = vrcp.f32 %v1301_v55  ;;  %v4146_v47 = vld [vmem:[%s4705_s14 + $0x18] sm:$0xff]  ;;  %v4147_v55 = vld [vmem:[%s4705_s14 + $0x20] sm:$0xff] }
 0x489   : > { %v4090_v27 = vpop.eup %4089  ;;  %v1315_v53 = vmul.f32 %v4088_v32, %v5139_v19  ;;  %v3818_v19 = vld [vmem:[%s6520_s5] sm:$0xff]  ;;  %s6584_s5 = sld [smem:[#allocation51_spill]] }
 0x48a   : > { %v1611_v3 = vmul.f32 %v4090_v27, %v5149_v63  ;;  %v4092_v5 = vpop.eup %4091  ;;  %v3819_v63 = vld [vmem:[%s6521_s15 + $0x8] sm:$0xff]  ;;  %1777 = vmatpush.bf16.msrb.mxu1 %v3818_v19 }
 0x48b   : > { %v1316_v2 = vmul.f32 %v4092_v5, %v5141_v50  ;;  %1730 = vmatpush.bf16.msra.mxu2 %v3819_v63 }
 0x48e   : > { %v4094_v7 = vpop.eup %4093 }
 0x48f   : > { %v1317_v0 = vmul.f32 %v4094_v7, %v5164_v13  ;;  %s4261_s27 = scalar_lea.hbm %s6584_s5, 128 }
 0x490   : > { %3669 = vmatmul.msk.f32.gmra.mxu2 %vm1229_vm13, %v1314_v60  ;;  %3695 = vmatmul.msk.f32.gmra.mxu0 %vm1229_vm13, %v1610_v61 }
 0x498   : > { %3670 = vmatmul.msk.f32.gmra.mxu2 %vm1229_vm13, %v1315_v53  ;;  %3696 = vmatmul.msk.f32.gmra.mxu0 %vm1229_vm13, %v1611_v3 }
 0x4a0   : > { %3671 = vmatmul.msk.f32.gmra.mxu2 %vm1229_vm13, %v1316_v2 }
 0x4a8   : > { %3672 = vmatmul.msk.f32.gmra.mxu2 %vm1229_vm13, %v1317_v0 }
 0x4c0   : > { %v1383_v8 = vpop.f32.mrf.mxu2 }
 0x4c8   : > { %v1386_v20 = vpop.f32.mrf.mxu2 }
 0x4c9   : > { %v1407_v1 = vpack.c.bf16 %v1386_v20, %v1383_v8  ;;  %v4148_v8 = vld [vmem:[%s4705_s14 + $0x28] sm:$0xff] }
 0x4cb   : > { %3709 = vmatmul.msk.bf16.vlgmr.msrb.gmra.mxu1 %vm1147_vm12, %v1407_v1 }
 0x4ce   : > { %v1677_v6 = vpop.f32.mrf.mxu0 }
 0x4d6   : > { %v1680_v50 = vpop.f32.mrf.mxu0 }
 0x4d7   : > { %v1701_v10 = vpack.c.bf16 %v1680_v50, %v1677_v6 }
 0x4d9   : > { %3701 = vmatmul.msk.bf16.vlgmr.msra.gmra.mxu2 %vm1147_vm12, %v1701_v10 }
 0x4de   : > { %v1683_v11 = vpop.f32.mrf.mxu0 }
 0x4e6   : > { %v1686_v12 = vpop.f32.mrf.mxu0 }
 0x4e7   : > { %v1702_v13 = vpack.c.bf16 %v1686_v12, %v1683_v11  ;;  %v4149_v12 = vld [vmem:[%s4705_s14 + $0x30] sm:$0xff] }
 0x4e9   : > { %3702 = vmatmul.msk.bf16.gmra.mxu2 %vm1147_vm12, %v1702_v13 }
 0x4ee   : > { %v1689_v51 = vpop.f32.mrf.mxu0 }
 0x503   : > { %v1389_v15 = vpop.f32.mrf.mxu2 }
 0x505   : > { %v1692_v16 = vpop.f32.mrf.mxu0 }
 0x506   : > { %v1703_v57 = vpack.c.bf16 %v1692_v16, %v1689_v51 }
 0x508   : > { %3703 = vmatmul.msk.bf16.gmra.mxu2 %vm1147_vm12, %v1703_v57 }
 0x50b   : > { %v1392_v18 = vpop.f32.mrf.mxu2 }
 0x50c   : > { %v1408_v21 = vpack.c.bf16 %v1392_v18, %v1389_v15 }
 0x50d   : > { %v1695_v23 = vpop.f32.mrf.mxu0 }
 0x50e   : > { %3710 = vmatmul.msk.bf16.gmra.mxu1 %vm1147_vm12, %v1408_v21 }
 0x513   : > { %v1395_v24 = vpop.f32.mrf.mxu2 }
 0x515   : > { %v1698_v26 = vpop.f32.mrf.mxu0 }
 0x516   : > { %v1704_v28 = vpack.c.bf16 %v1698_v26, %v1695_v23 }
 0x518   : > { %3704 = vmatmul.msk.bf16.gmra.mxu2 %vm1147_vm12, %v1704_v28  ;;  %v4150_v28 = vld [vmem:[%s4705_s14 + $0x38] sm:$0xff] }
 0x51b   : > { %v1398_v29 = vpop.f32.mrf.mxu2 }
 0x51c   : > { %v1409_v14 = vpack.c.bf16 %v1398_v29, %v1395_v24 }
 0x51e   : > { %3711 = vmatmul.msk.bf16.gmra.mxu1 %vm1147_vm12, %v1409_v14 }
 0x523   : > { %v1401_v22 = vpop.f32.mrf.mxu2 }
 0x52b   : > { %v1404_v34 = vpop.f32.mrf.mxu2 }
 0x52c   : > { %v1410_v25 = vpack.c.bf16 %v1404_v34, %v1401_v22 }
 0x52e   : > { %3712 = vmatmul.msk.bf16.gmra.mxu1 %vm1147_vm12, %v1410_v25 }
 0x548   : > { %v1779_v4 = vpop.f32.mrf.mxu1 }
 0x550   : > { %v1781_v62 = vpop.f32.mrf.mxu1 }
 0x55c   : > { %v1732_v35 = vpop.f32.mrf.mxu2 }
 0x55d   : > { %v1780_v9 = vadd.f32 %v1779_v4, %v1732_v35 }
 0x55f   : > { %v1799_v31 = vadd.f32 %v4143_v39, %v1780_v9 }
 0x561   : > { %v5220_v45 = vadd.f32 %v5216_v38, %v1799_v31 }
 0x563   : > { %6524 = vst [vmem:[#allocation27_spill] sm:$0xff] %v5220_v45  ;;  %v1821_v33 = vsel %vm848_vm1, %v5220_v45, 0.0 }
 0x564   : > { %1822 = vadd.xlane.f32.xlu0 %v1821_v33  ;;  %v1734_v46 = vpop.f32.mrf.mxu2 }
 0x565   : > { %v1782_v48 = vadd.f32 %v1781_v62, %v1734_v46 }
 0x567   : > { %v1800_v43 = vadd.f32 %v4144_v37, %v1782_v48 }
 0x569   : > { %v5226_v52 = vadd.f32 %v5216_v38, %v1800_v43 }
 0x56b   : > { %6525 = vst [vmem:[#allocation28_spill] sm:$0xff] %v5226_v52  ;;  %v1824_v54 = vsel %vm848_vm1, %v5226_v52, 0.0 }
 0x56c   : > { %1825 = vadd.xlane.f32.xlu1 %v1824_v54  ;;  %v1737_v17 = vpop.f32.mrf.mxu2 }
 0x574   : > { %v1739_v58 = vpop.f32.mrf.mxu2 }
 0x58b   : > { %v1784_v56 = vpop.f32.mrf.mxu1  ;;  %v1742_v61 = vpop.f32.mrf.mxu2 }
 0x58c   : > { %v1785_v40 = vadd.f32 %v1784_v56, %v1737_v17 }
 0x58e   : > { %v1801_v49 = vadd.f32 %v4145_v41, %v1785_v40 }
 0x590   : > { %v5232_v44 = vadd.f32 %v5216_v38, %v1801_v49 }
 0x592   : > { %6526 = vst [vmem:[#allocation29_spill] sm:$0xff] %v5232_v44  ;;  %v1827_v42 = vsel %vm848_vm1, %v5232_v44, 0.0 }
 0x593   : > { %v1786_v36 = vpop.f32.mrf.mxu1  ;;  %1828 = vadd.xlane.f32.xlu2 %v1827_v42  ;;  %v1744_v7 = vpop.f32.mrf.mxu2 }
 0x594   : > { %v1787_v59 = vadd.f32 %v1786_v36, %v1739_v58 }
 0x596   : > { %v1802_v60 = vadd.f32 %v4146_v47, %v1787_v59 }
 0x598   : > { %v5238_v32 = vadd.f32 %v5216_v38, %v1802_v60 }
 0x59a   : > { %6527 = vst [vmem:[#allocation30_spill] sm:$0xff] %v5238_v32  ;;  %v1830_v27 = vsel %vm848_vm1, %v5238_v32, 0.0 }
 0x59b   : > { %v1789_v53 = vpop.f32.mrf.mxu1  ;;  %1831 = vadd.xlane.f32.xlu0 %v1830_v27  ;;  %v1747_v50 = vpop.f32.mrf.mxu2 }
 0x59c   : > { %v1790_v3 = vadd.f32 %v1789_v53, %v1742_v61 }
 0x59e   : > { %v1803_v5 = vadd.f32 %v4147_v55, %v1790_v3 }
 0x5a0   : > { %v5244_v2 = vadd.f32 %v5216_v38, %v1803_v5  ;;  %v3821_v5 = vld [vmem:[%s667_s9 + $0x8] sm:$0xff] }
 0x5a1   : > { %2061 = vmatpush.bf16.msrb.mxu3 %v3821_v5 }
 0x5a2   : > { %6528 = vst [vmem:[#allocation31_spill] sm:$0xff] %v5244_v2  ;;  %v1833_v0 = vsel %vm848_vm1, %v5244_v2, 0.0 }
 0x5a3   : > { %v1791_v19 = vpop.f32.mrf.mxu1  ;;  %1834 = vadd.xlane.f32.xlu1 %v1833_v0  ;;  %v1749_v21 = vpop.f32.mrf.mxu2 }
 0x5a4   : > { %v1792_v63 = vadd.f32 %v1791_v19, %v1744_v7  ;;  %v3820_v19 = vld [vmem:[%s667_s9] sm:$0xff] }
 0x5a5   : > { %2062 = vmatpush.bf16.msrb.mxu3 %v3820_v19 }
 0x5a6   : > { %v1804_v20 = vadd.f32 %v4148_v8, %v1792_v63 }
 0x5a8   : > { %v5250_v1 = vadd.f32 %v5216_v38, %v1804_v20 }
 0x5aa   : > { %6529 = vst [vmem:[#allocation32_spill] sm:$0xff] %v5250_v1  ;;  %v1836_v6 = vsel %vm848_vm1, %v5250_v1, 0.0 }
 0x5ab   : > { %v1794_v10 = vpop.f32.mrf.mxu1  ;;  %1837 = vadd.xlane.f32.xlu2 %v1836_v6 }
 0x5ac   : > { %v1795_v11 = vadd.f32 %v1794_v10, %v1747_v50 }
 0x5ae   : > { %v1805_v13 = vadd.f32 %v4149_v12, %v1795_v11 }
 0x5b0   : > { %v5256_v51 = vadd.f32 %v5216_v38, %v1805_v13 }
 0x5b2   : > { %6530 = vst [vmem:[#allocation33_spill] sm:$0xff] %v5256_v51  ;;  %v1839_v15 = vsel %vm848_vm1, %v5256_v51, 0.0 }
 0x5b3   : > { %1840 = vadd.xlane.f32.xlu2 %v1839_v15  ;;  %v1796_v16 = vpop.f32.mrf.mxu1 }
 0x5b4   : > { %v1797_v23 = vadd.f32 %v1796_v16, %v1749_v21 }
 0x5b6   : > { %v1806_v29 = vadd.f32 %v4150_v28, %v1797_v23 }
 0x5b8   : > { %v5270_v25 = vadd.f32 %v5216_v38, %v1806_v29 }
 0x5ba   : > { %6531 = vst [vmem:[#allocation34_spill] sm:$0xff] %v5270_v25  ;;  %v1842_v39 = vsel %vm848_vm1, %v5270_v25, 0.0 }
 0x5d7   : > { %v1823_v57 = vpop.xlane.xlu0 %1822 }
 0x5d8   : > { %v1845_v18 = vmul.f32 %v1823_v57, %v4740_v30 }
 0x5da   : > { %v5262_v24 = vsub.f32 %v5220_v45, %v1845_v18 }
 0x5dc   : > { %v1861_v26 = vmul.f32 %v5262_v24, %v5262_v24 }
 0x5de   : > { %v1869_v14 = vsel %vm848_vm1, %v1861_v26, 0.0 }
 0x5df   : > { %v1826_v22 = vpop.xlane.xlu1 %1825  ;;  %1870 = vadd.xlane.f32.xlu0 %v1869_v14 }
 0x5e0   : > { %v1846_v34 = vmul.f32 %v1826_v22, %v4740_v30 }
 0x5e2   : > { %v5273_v4 = vsub.f32 %v5226_v52, %v1846_v34 }
 0x5e4   : > { %v1862_v35 = vmul.f32 %v5273_v4, %v5273_v4 }
 0x5e6   : > { %v1872_v9 = vsel %vm848_vm1, %v1862_v35, 0.0 }
 0x5e7   : > { %1873 = vadd.xlane.f32.xlu1 %v1872_v9  ;;  %1843 = vadd.xlane.f32.xlu0 %v1842_v39  ;;  %v5334_v9 = vld [vmem:[%s6533_s22] ss:$0 sm:$0xff] }
 0x606   : > { %v1829_v31 = vpop.xlane.xlu2 %1828 }
 0x607   : > { %v1847_v33 = vmul.f32 %v1829_v31, %v4740_v30 }
 0x609   : > { %v5282_v62 = vsub.f32 %v5232_v44, %v1847_v33 }
 0x60b   : > { %v1863_v38 = vmul.f32 %v5282_v62, %v5282_v62 }
 0x60d   : > { %v1875_v46 = vsel %vm848_vm1, %v1863_v38, 0.0 }
 0x60e   : > { %v1832_v48 = vpop.xlane.xlu0 %1831  ;;  %1876 = vadd.xlane.f32.xlu1 %v1875_v46  ;;  %v5343_v46 = vld [vmem:[%s6535_s12] ss:$0 sm:$0xff] }
 0x60f   : > { %v1848_v37 = vmul.f32 %v1832_v48, %v4740_v30 }
 0x611   : > { %v5289_v43 = vsub.f32 %v5238_v32, %v1848_v37 }
 0x613   : > { %v1864_v54 = vmul.f32 %v5289_v43, %v5289_v43 }
 0x615   : > { %v1878_v17 = vsel %vm848_vm1, %v1864_v54, 0.0 }
 0x616   : > { %v1835_v56 = vpop.xlane.xlu1 %1834  ;;  %1879 = vadd.xlane.f32.xlu2 %v1878_v17 }
 0x617   : > { %v1849_v40 = vmul.f32 %v1835_v56, %v4740_v30 }
 0x619   : > { %v5296_v41 = vsub.f32 %v5244_v2, %v1849_v40 }
 0x61b   : > { %v1865_v49 = vmul.f32 %v5296_v41, %v5296_v41 }
 0x61d   : > { %v1881_v58 = vsel %vm848_vm1, %v1865_v49, 0.0 }
 0x61e   : > { %v1838_v42 = vpop.xlane.xlu2 %1837  ;;  %1882 = vadd.xlane.f32.xlu0 %v1881_v58 }
 0x61f   : > { %v1850_v36 = vmul.f32 %v1838_v42, %v4740_v30 }
 0x621   : > { %v5303_v59 = vsub.f32 %v5250_v1, %v1850_v36 }
 0x623   : > { %v1866_v47 = vmul.f32 %v5303_v59, %v5303_v59 }
 0x625   : > { %v1884_v60 = vsel %vm848_vm1, %v1866_v47, 0.0 }
 0x626   : > { %1885 = vadd.xlane.f32.xlu1 %v1884_v60  ;;  %v1841_v61 = vpop.xlane.xlu2 %1840 }
 0x627   : > { %v1851_v27 = vmul.f32 %v1841_v61, %v4740_v30 }
 0x629   : > { %v5310_v53 = vsub.f32 %v5256_v51, %v1851_v27 }
 0x62b   : > { %v1867_v3 = vmul.f32 %v5310_v53, %v5310_v53 }
 0x62d   : > { %v1887_v55 = vsel %vm848_vm1, %v1867_v3, 0.0 }
 0x62e   : > { %1888 = vadd.xlane.f32.xlu2 %v1887_v55 }
 0x652   : > { %v1871_v7 = vpop.xlane.xlu0 %1870 }
 0x653   : > { %v1893_v0 = vmul.f32 %v1871_v7, %v4740_v30 }
 0x655   : > { %v1901_v63 = vadd.f32 1e-06, %v1893_v0 }
 0x657   : > { %4095 = vrsqrt.f32 %v1901_v63  ;;  %vm1915_vm15 = vweird.f32 %v1901_v63 }
 0x65a   : > { %v1874_v8 = vpop.xlane.xlu1 %1873  ;;  %v1844_v20 = vpop.xlane.xlu0 %1843 }
 0x65b   : > { %v1894_v6 = vmul.f32 %v1874_v8, %v4740_v30  ;;  %v1852_v50 = vmul.f32 %v1844_v20, %v4740_v30 }
 0x65d   : > { %v4096_v10 = vpop.eup %4095  ;;  %v1902_v11 = vadd.f32 1e-06, %v1894_v6  ;;  %v5323_v12 = vsub.f32 %v5270_v25, %v1852_v50 }
 0x65e   : > { %v1910_v13 = vmul.f32 %v4096_v10, %v1901_v63  ;;  %vm1916_vm14 = vweird.f32 %v4096_v10 }
 0x65f   : > { %4097 = vrsqrt.f32 %v1902_v11  ;;  %v1868_v15 = vmul.f32 %v5323_v12, %v5323_v12  ;;  %vm1917_vm0 = vmor %vm1915_vm15, %vm1916_vm14  ;;  %vm1925_vm3 = vweird.f32 %v1902_v11 }
 0x660   : > { %v1911_v16 = vmul.f32 %v4096_v10, %v1910_v13 }
 0x661   : > { %v1890_v57 = vsel %vm848_vm1, %v1868_v15, 0.0 }
 0x662   : > { %v1912_v18 = vmul.f32 0.5, %v1911_v16  ;;  %1891 = vadd.xlane.f32.xlu0 %v1890_v57 }
 0x664   : > { %v1913_v21 = vsub.f32 1.5, %v1912_v18 }
 0x665   : > { %v4098_v23 = vpop.eup %4097 }
 0x666   : > { %v1914_v26 = vmul.f32 %v4096_v10, %v1913_v21  ;;  %v1920_v28 = vmul.f32 %v4098_v23, %v1902_v11  ;;  %vm1926_vm2 = vweird.f32 %v4098_v23 }
 0x667   : > { %vm1927_vm4 = vmor %vm1925_vm3, %vm1926_vm2 }
 0x668   : > { %v1921_v29 = vmul.f32 %v4098_v23, %v1920_v28  ;;  %v1918_v14 = vsel %vm1917_vm0, %v4096_v10, %v1914_v26 }
 0x669   : > { %v1989_v35 = vmul.f32 %v1918_v14, %v5262_v24 }
 0x66a   : > { %v1922_v22 = vmul.f32 0.5, %v1921_v29 }
 0x66b   : > { %v2000_v38 = vmul.f32 %v5334_v9, %v1989_v35 }
 0x66c   : > { %v1923_v34 = vsub.f32 1.5, %v1922_v22 }
 0x66d   : > { %v2011_v48 = vadd.f32 %v5343_v46, %v2000_v38 }
 0x66e   : > { %v1924_v39 = vmul.f32 %v4098_v23, %v1923_v34 }
 0x670   : > { %v1928_v31 = vsel %vm1927_vm4, %v4098_v23, %v1924_v39 }
 0x671   : > { %v1990_v33 = vmul.f32 %v1928_v31, %v5273_v4 }
 0x673   : > { %v2001_v24 = vmul.f32 %v5334_v9, %v1990_v33 }
 0x675   : > { %v2012_v37 = vadd.f32 %v5343_v46, %v2001_v24 }
 0x677   : > { %v2019_v54 = vpack.c.bf16 %v2012_v37, %v2011_v48 }
 0x679   : > { %3721 = vmatmul.msk.bf16.vlgmr.msrb.gmra.mxu3 %vm848_vm1, %v2019_v54 }
 0x681   : > { %v1877_v17 = vpop.xlane.xlu1 %1876 }
 0x682   : > { %v1895_v4 = vmul.f32 %v1877_v17, %v4740_v30 }
 0x684   : > { %v1903_v56 = vadd.f32 1e-06, %v1895_v4 }
 0x686   : > { %4099 = vrsqrt.f32 %v1903_v56  ;;  %vm1935_vm6 = vweird.f32 %v1903_v56 }
 0x689   : > { %v1880_v40 = vpop.xlane.xlu2 %1879 }
 0x68a   : > { %v1896_v49 = vmul.f32 %v1880_v40, %v4740_v30 }
 0x68c   : > { %v4100_v58 = vpop.eup %4099  ;;  %v1904_v42 = vadd.f32 1e-06, %v1896_v49 }
 0x68d   : > { %v1930_v36 = vmul.f32 %v4100_v58, %v1903_v56  ;;  %vm1936_vm5 = vweird.f32 %v4100_v58 }
 0x68e   : > { %4101 = vrsqrt.f32 %v1904_v42  ;;  %vm1937_vm7 = vmor %vm1935_vm6, %vm1936_vm5  ;;  %vm1945_vm9 = vweird.f32 %v1904_v42 }
 0x68f   : > { %v1931_v47 = vmul.f32 %v4100_v58, %v1930_v36 }
 0x691   : > { %v1932_v60 = vmul.f32 0.5, %v1931_v47  ;;  %v1883_v61 = vpop.xlane.xlu0 %1882 }
 0x692   : > { %v1897_v27 = vmul.f32 %v1883_v61, %v4740_v30 }
 0x693   : > { %v1933_v3 = vsub.f32 1.5, %v1932_v60 }
 0x694   : > { %v4102_v55 = vpop.eup %4101  ;;  %v1905_v5 = vadd.f32 1e-06, %v1897_v27 }
 0x695   : > { %v1934_v7 = vmul.f32 %v4100_v58, %v1933_v3  ;;  %v1940_v0 = vmul.f32 %v4102_v55, %v1904_v42  ;;  %vm1946_vm8 = vweird.f32 %v4102_v55 }
 0x696   : > { %4103 = vrsqrt.f32 %v1905_v5  ;;  %vm1947_vm10 = vmor %vm1945_vm9, %vm1946_vm8  ;;  %vm1955_vm12 = vweird.f32 %v1905_v5 }
 0x697   : > { %v1941_v19 = vmul.f32 %v4102_v55, %v1940_v0  ;;  %v1938_v63 = vsel %vm1937_vm7, %v4100_v58, %v1934_v7 }
 0x698   : > { %v1991_v11 = vmul.f32 %v1938_v63, %v5282_v62 }
 0x699   : > { %v1942_v8 = vmul.f32 0.5, %v1941_v19  ;;  %v1886_v20 = vpop.xlane.xlu1 %1885 }
 0x69a   : > { %v1898_v6 = vmul.f32 %v1886_v20, %v4740_v30  ;;  %v2002_v23 = vmul.f32 %v5334_v9, %v1991_v11 }
 0x69b   : > { %v1943_v50 = vsub.f32 1.5, %v1942_v8 }
 0x69c   : > { %v4104_v10 = vpop.eup %4103  ;;  %v1906_v13 = vadd.f32 1e-06, %v1898_v6  ;;  %v2013_v22 = vadd.f32 %v5343_v46, %v2002_v23 }
 0x69d   : > { %v1944_v15 = vmul.f32 %v4102_v55, %v1943_v50  ;;  %v1950_v16 = vmul.f32 %v4104_v10, %v1905_v5  ;;  %vm1956_vm11 = vweird.f32 %v4104_v10 }
 0x69e   : > { %4105 = vrsqrt.f32 %v1906_v13  ;;  %vm1957_vm14 = vmor %vm1955_vm12, %vm1956_vm11  ;;  %vm1965_vm0 = vweird.f32 %v1906_v13 }
 0x69f   : > { %v1948_v57 = vsel %vm1947_vm10, %v4102_v55, %v1944_v15  ;;  %v1951_v18 = vmul.f32 %v4104_v10, %v1950_v16 }
 0x6a0   : > { %v1992_v21 = vmul.f32 %v1948_v57, %v5289_v43 }
 0x6a1   : > { %v1952_v26 = vmul.f32 0.5, %v1951_v18  ;;  %v1889_v58 = vpop.xlane.xlu2 %1888 }
 0x6a2   : > { %v2003_v28 = vmul.f32 %v5334_v9, %v1992_v21 }
 0x6a3   : > { %v1953_v29 = vsub.f32 1.5, %v1952_v26 }
 0x6a4   : > { %v4106_v14 = vpop.eup %4105  ;;  %v2014_v62 = vadd.f32 %v5343_v46, %v2003_v28 }
 0x6a5   : > { %v1954_v34 = vmul.f32 %v4104_v10, %v1953_v29  ;;  %v1960_v35 = vmul.f32 %v4106_v14, %v1906_v13  ;;  %vm1966_vm15 = vweird.f32 %v4106_v14 }
 0x6a6   : > { %v2020_v39 = vpack.c.bf16 %v2014_v62, %v2013_v22  ;;  %vm1967_vm2 = vmor %vm1965_vm0, %vm1966_vm15 }
 0x6a7   : > { %v1961_v31 = vmul.f32 %v4106_v14, %v1960_v35  ;;  %v1958_v43 = vsel %vm1957_vm14, %v4104_v10, %v1954_v34 }
 0x6a8   : > { %3722 = vmatmul.msk.bf16.gmra.mxu3 %vm848_vm1, %v2020_v39  ;;  %v1993_v24 = vmul.f32 %v1958_v43, %v5296_v41  ;;  %v1899_v41 = vmul.f32 %v1889_v58, %v4740_v30 }
 0x6a9   : > { %v1962_v33 = vmul.f32 0.5, %v1961_v31 }
 0x6aa   : > { %v2004_v17 = vmul.f32 %v5334_v9, %v1993_v24  ;;  %v1907_v42 = vadd.f32 1e-06, %v1899_v41 }
 0x6ab   : > { %v1963_v38 = vsub.f32 1.5, %v1962_v33 }
 0x6ac   : > { %v2015_v56 = vadd.f32 %v5343_v46, %v2004_v17  ;;  %4107 = vrsqrt.f32 %v1907_v42  ;;  %vm1975_vm4 = vweird.f32 %v1907_v42 }
 0x6ad   : > { %v1964_v48 = vmul.f32 %v4106_v14, %v1963_v38 }
 0x6af   : > { %v1968_v37 = vsel %vm1967_vm2, %v4106_v14, %v1964_v48 }
 0x6b0   : > { %v1994_v54 = vmul.f32 %v1968_v37, %v5303_v59 }
 0x6b2   : > { %v2005_v4 = vmul.f32 %v5334_v9, %v1994_v54  ;;  %v4108_v36 = vpop.eup %4107 }
 0x6b3   : > { %v1970_v47 = vmul.f32 %v4108_v36, %v1907_v42  ;;  %vm1976_vm3 = vweird.f32 %v4108_v36 }
 0x6b4   : > { %v2016_v40 = vadd.f32 %v5343_v46, %v2005_v4  ;;  %vm1977_vm5 = vmor %vm1975_vm4, %vm1976_vm3 }
 0x6b5   : > { %v1971_v60 = vmul.f32 %v4108_v36, %v1970_v47 }
 0x6b6   : > { %v2021_v49 = vpack.c.bf16 %v2016_v40, %v2015_v56 }
 0x6b7   : > { %v1972_v3 = vmul.f32 0.5, %v1971_v60 }
 0x6b8   : > { %3723 = vmatmul.msk.bf16.gmra.mxu3 %vm848_vm1, %v2021_v49 }
 0x6b9   : > { %v1973_v55 = vsub.f32 1.5, %v1972_v3 }
 0x6bb   : > { %v1974_v7 = vmul.f32 %v4108_v36, %v1973_v55 }
 0x6bd   : > { %v1978_v63 = vsel %vm1977_vm5, %v4108_v36, %v1974_v7 }
 0x6be   : > { %v1995_v6 = vmul.f32 %v1978_v63, %v5310_v53 }
 0x6c0   : > { %v2006_v11 = vmul.f32 %v5334_v9, %v1995_v6 }
 0x6c2   : > { %v2017_v15 = vadd.f32 %v5343_v46, %v2006_v11 }
 0x6d5   : > { %v1892_v59 = vpop.xlane.xlu0 %1891 }
 0x6d6   : > { %v1900_v61 = vmul.f32 %v1892_v59, %v4740_v30 }
 0x6d8   : > { %v1908_v27 = vadd.f32 1e-06, %v1900_v61 }
 0x6da   : > { %4109 = vrsqrt.f32 %v1908_v27  ;;  %vm1985_vm7 = vweird.f32 %v1908_v27 }
 0x6e0   : > { %v4110_v5 = vpop.eup %4109 }
 0x6e1   : > { %v1980_v0 = vmul.f32 %v4110_v5, %v1908_v27  ;;  %vm1986_vm6 = vweird.f32 %v4110_v5 }
 0x6e2   : > { %vm1987_vm8 = vmor %vm1985_vm7, %vm1986_vm6 }
 0x6e3   : > { %v1981_v19 = vmul.f32 %v4110_v5, %v1980_v0 }
 0x6e5   : > { %v1982_v8 = vmul.f32 0.5, %v1981_v19 }
 0x6e7   : > { %v1983_v20 = vsub.f32 1.5, %v1982_v8 }
 0x6e9   : > { %v1984_v50 = vmul.f32 %v4110_v5, %v1983_v20 }
 0x6eb   : > { %v1988_v30 = vsel %vm1987_vm8, %v4110_v5, %v1984_v50 }
 0x6ec   : > { %v1996_v10 = vmul.f32 %v1988_v30, %v5323_v12  ;;  %v5381_v12 = vld [vmem:[%s799_s29] ss:$0 sm:$0xff] }
 0x6ee   : > { %v2007_v13 = vmul.f32 %v5334_v9, %v1996_v10 }
 0x6f0   : > { %v2018_v16 = vadd.f32 %v5343_v46, %v2007_v13 }
 0x6f2   : > { %v2022_v57 = vpack.c.bf16 %v2018_v16, %v2017_v15 }
 0x6f4   : > { %3724 = vmatmul.msk.bf16.gmra.mxu3 %vm848_vm1, %v2022_v57 }
 0x6fc   : > { %v2064_v18 = vpop.f32.mrf.mxu3 }
 0x6fd   : > { %v5384_v26 = vadd.f32 %v5381_v12, %v2064_v18 }
 0x6ff   : > { %6537 = vst [vmem:[#allocation35_spill] sm:$0xff] %v5384_v26  ;;  %v5390_v46 = vmul.f32 0.70710677, %v5384_v26 }
 0x701   : > { %v2100_v14 = vmul.f32 %v5390_v46, %v5390_v46 }
 0x703   : > { %v5402_v34 = vmin.f32 %v2100_v14, 16.0 }
 0x704   : > { %v2066_v53 = vpop.f32.mrf.mxu3 }
 0x705   : > { %v5387_v9 = vadd.f32 %v5381_v12, %v2066_v53  ;;  %v2113_v33 = vmul.f32 3.8918573e-05, %v5402_v34  ;;  %v2102_v41 = vmul.f32 2.1237322e-06, %v5402_v34 }
 0x707   : > { %6538 = vst [vmem:[#allocation36_spill] sm:$0xff] %v5387_v9  ;;  %v5393_v29 = vmul.f32 0.70710677, %v5387_v9  ;;  %v2114_v17 = vadd.f32 0.001143296, %v2113_v33 }
 0x708   : > { %v2103_v27 = vadd.f32 0.00028619796, %v2102_v41 }
 0x709   : > { %v2140_v22 = vmul.f32 %v5393_v29, %v5393_v29  ;;  %v2115_v42 = vmul.f32 %v2114_v17, %v5402_v34 }
 0x70a   : > { %v2104_v20 = vmul.f32 %v2103_v27, %v5402_v34 }
 0x70b   : > { %v5404_v35 = vmin.f32 %v2140_v22, 16.0  ;;  %v2116_v3 = vadd.f32 0.014752088, %v2115_v42 }
 0x70c   : > { %v2105_v16 = vadd.f32 0.0036580483, %v2104_v20 }
 0x70d   : > { %v2153_v38 = vmul.f32 3.8918573e-05, %v5404_v35  ;;  %v2142_v55 = vmul.f32 2.1237322e-06, %v5404_v35  ;;  %v2117_v8 = vmul.f32 %v2116_v3, %v5402_v34 }
 0x70e   : > { %v2106_v22 = vmul.f32 %v2105_v16, %v5402_v34 }
 0x70f   : > { %v2154_v4 = vadd.f32 0.001143296, %v2153_v38  ;;  %v2143_v6 = vadd.f32 0.00028619796, %v2142_v55  ;;  %v2118_v15 = vadd.f32 0.112945676, %v2117_v8 }
 0x710   : > { %v2107_v41 = vadd.f32 0.05243302, %v2106_v22 }
 0x711   : > { %v2155_v36 = vmul.f32 %v2154_v4, %v5404_v35  ;;  %v2144_v57 = vmul.f32 %v2143_v6, %v5404_v35  ;;  %v2119_v14 = vmul.f32 %v2118_v15, %v5402_v34 }
 0x713   : > { %v2156_v5 = vadd.f32 0.014752088, %v2155_v36 }
 0x715   : > { %v2157_v50 = vmul.f32 %v2156_v5, %v5404_v35  ;;  %v2108_v5 = vmul.f32 %v2107_v41, %v5402_v34 }
 0x717   : > { %v2158_v18 = vadd.f32 0.112945676, %v2157_v50  ;;  %v2109_v16 = vadd.f32 0.18741608, %v2108_v5 }
 0x719   : > { %v2159_v33 = vmul.f32 %v2158_v18, %v5404_v35 }
 0x71b   : > { %v2160_v36 = vadd.f32 0.4994258, %v2159_v33 }
 0x72b   : > { %v2069_v21 = vpop.f32.mrf.mxu3 }
 0x72c   : > { %v5400_v62 = vadd.f32 %v5381_v12, %v2069_v21 }
 0x72e   : > { %v5407_v31 = vmul.f32 0.70710677, %v5400_v62 }
 0x730   : > { %v2180_v37 = vmul.f32 %v5407_v31, %v5407_v31 }
 0x732   : > { %v5431_v49 = vmin.f32 %v2180_v37, 16.0 }
 0x733   : > { %v2071_v23 = vpop.f32.mrf.mxu3 }
 0x734   : > { %v5410_v43 = vadd.f32 %v5381_v12, %v2071_v23  ;;  %v2193_v59 = vmul.f32 3.8918573e-05, %v5431_v49 }
 0x736   : > { %v5423_v54 = vmul.f32 0.70710677, %v5410_v43  ;;  %v2194_v19 = vadd.f32 0.001143296, %v2193_v59  ;;  %v2182_v59 = vmul.f32 2.1237322e-06, %v5431_v49 }
 0x738   : > { %v2220_v58 = vmul.f32 %v5423_v54, %v5423_v54  ;;  %v2195_v11 = vmul.f32 %v2194_v19, %v5431_v49  ;;  %v2183_v6 = vadd.f32 0.00028619796, %v2182_v59 }
 0x73a   : > { %v5443_v61 = vmin.f32 %v2220_v58, 16.0  ;;  %v2196_v23 = vadd.f32 0.014752088, %v2195_v11  ;;  %v2120_v58 = vadd.f32 0.4994258, %v2119_v14  ;;  %v2184_v14 = vmul.f32 %v2183_v6, %v5431_v49 }
 0x73b   : > { %v2074_v28 = vpop.f32.mrf.mxu3 }
 0x73c   : > { %v5418_v48 = vadd.f32 %v5381_v12, %v2074_v28  ;;  %v2233_v63 = vmul.f32 3.8918573e-05, %v5443_v61  ;;  %v2197_v17 = vmul.f32 %v2196_v23, %v5431_v49  ;;  %v2121_v55 = vmul.f32 %v2120_v58, %v5402_v34 }
 0x73e   : > { %v5429_v40 = vmul.f32 0.70710677, %v5418_v48  ;;  %v2234_v13 = vadd.f32 0.001143296, %v2233_v63  ;;  %v2198_v27 = vadd.f32 0.112945676, %v2197_v17  ;;  %v2161_v63 = vmul.f32 %v2160_v36, %v5404_v35 }
 0x73f   : > { %v2185_v36 = vadd.f32 0.0036580483, %v2184_v14 }
 0x740   : > { %v2260_v60 = vmul.f32 %v5429_v40, %v5429_v40  ;;  %v2235_v28 = vmul.f32 %v2234_v13, %v5443_v61  ;;  %v2199_v50 = vmul.f32 %v2198_v27, %v5431_v49  ;;  %v5475_v13 = vadd.f32 1.0, %v2121_v55 }
 0x741   : > { %v5481_v18 = vadd.f32 1.0, %v2161_v63 }
 0x742   : > { %v5448_v0 = vmin.f32 %v2260_v60, 16.0  ;;  %v2236_v4 = vadd.f32 0.014752088, %v2235_v28  ;;  %v2200_v22 = vadd.f32 0.4994258, %v2199_v50  ;;  %4111 = vrcp.f32 %v5475_v13 }
 0x743   : > { %v2076_v39 = vpop.f32.mrf.mxu3  ;;  %4113 = vrcp.f32 %v5481_v18  ;;  %vm2128_vm10 = vweird.f32 %v5475_v13  ;;  %vm2168_vm11 = vweird.f32 %v5481_v18 }
 0x744   : > { %v5415_v24 = vadd.f32 %v5381_v12, %v2076_v39  ;;  %v2273_v10 = vmul.f32 3.8918573e-05, %v5448_v0  ;;  %v2145_v39 = vadd.f32 0.0036580483, %v2144_v57  ;;  %v2237_v3 = vmul.f32 %v2236_v4, %v5443_v61 }
 0x746   : > { %v5426_v56 = vmul.f32 0.70710677, %v5415_v24  ;;  %v2274_v21 = vadd.f32 0.001143296, %v2273_v10  ;;  %v2146_v42 = vmul.f32 %v2145_v39, %v5404_v35  ;;  %v2238_v10 = vadd.f32 0.112945676, %v2237_v3 }
 0x748   : > { %v2300_v47 = vmul.f32 %v5426_v56, %v5426_v56  ;;  %v2275_v37 = vmul.f32 %v2274_v21, %v5448_v0  ;;  %v2147_v19 = vadd.f32 0.05243302, %v2146_v42  ;;  %v2262_v21 = vmul.f32 2.1237322e-06, %v5448_v0  ;;  %v5510_v6 = vpop.eup %4111 }
 0x749   : > { %v2239_v33 = vmul.f32 %v2238_v10, %v5443_v61  ;;  %vm2129_vm9 = vweird.f32 %v5510_v6 }
 0x74a   : > { %v5446_v7 = vmin.f32 %v2300_v47, 16.0  ;;  %v2276_v60 = vadd.f32 0.014752088, %v2275_v37  ;;  %v2148_v57 = vmul.f32 %v2147_v19, %v5404_v35  ;;  %v2110_v37 = vmul.f32 %v2109_v16, %v5402_v34  ;;  %v5514_v16 = vpop.eup %4113  ;;  %vm5594_vm14 = vmor %vm2128_vm10, %vm2129_vm9 }
 0x74b   : > { %v2263_v58 = vadd.f32 0.00028619796, %v2262_v21  ;;  %v2240_v59 = vadd.f32 0.4994258, %v2239_v33  ;;  %vm2169_vm12 = vweird.f32 %v5514_v16 }
 0x74c   : > { %v2313_v30 = vmul.f32 3.8918573e-05, %v5446_v7  ;;  %v2277_v20 = vmul.f32 %v2276_v60, %v5448_v0  ;;  %v2149_v17 = vadd.f32 0.18741608, %v2148_v57  ;;  %v2302_v3 = vmul.f32 2.1237322e-06, %v5446_v7  ;;  %vm5611_vm15 = vmor %vm2168_vm11, %vm2169_vm12 }
 0x74d   : > { %v5506_v19 = vadd.f32 1.1283791, %v2110_v37 }
 0x74e   : > { %v2314_v53 = vadd.f32 0.001143296, %v2313_v30  ;;  %v2222_v30 = vmul.f32 2.1237322e-06, %v5443_v61  ;;  %v2278_v23 = vadd.f32 0.112945676, %v2277_v20 }
 0x74f   : > { %v2303_v14 = vadd.f32 0.00028619796, %v2302_v3 }
 0x750   : > { %v2315_v38 = vmul.f32 %v2314_v53, %v5446_v7  ;;  %v2223_v39 = vadd.f32 0.00028619796, %v2222_v30  ;;  %v2279_v41 = vmul.f32 %v2278_v23, %v5448_v0  ;;  %v2264_v30 = vmul.f32 %v2263_v58, %v5448_v0 }
 0x751   : > { %v2304_v3 = vmul.f32 %v2303_v14, %v5446_v7 }
 0x752   : > { %v2316_v47 = vadd.f32 0.014752088, %v2315_v38  ;;  %v2224_v60 = vmul.f32 %v2223_v39, %v5443_v61  ;;  %v2280_v10 = vadd.f32 0.4994258, %v2279_v41  ;;  %v2124_v39 = vmul.f32 %v5510_v6, %v5475_v13 }
 0x754   : > { %v2317_v8 = vmul.f32 %v2316_v47, %v5446_v7  ;;  %v2201_v47 = vmul.f32 %v2200_v22, %v5431_v49  ;;  %v2225_v57 = vadd.f32 0.0036580483, %v2224_v60  ;;  %v2281_v58 = vmul.f32 %v2280_v10, %v5448_v0 }
 0x756   : > { %v2318_v53 = vadd.f32 0.112945676, %v2317_v8  ;;  %v2150_v8 = vmul.f32 %v2149_v17, %v5404_v35  ;;  %v5520_v23 = vadd.f32 1.0, %v2201_v47  ;;  %v2241_v35 = vmul.f32 %v2240_v59, %v5443_v61 }
 0x757   : > { %v2164_v17 = vmul.f32 %v5514_v16, %v5481_v18  ;;  %v2226_v47 = vmul.f32 %v2225_v57, %v5443_v61 }
 0x758   : > { %v2319_v4 = vmul.f32 %v2318_v53, %v5446_v7  ;;  %v5526_v33 = vadd.f32 1.1283791, %v2150_v8  ;;  %4115 = vrcp.f32 %v5520_v23  ;;  %vm2208_vm6 = vweird.f32 %v5520_v23 }
 0x759   : > { %v2165_v10 = vsub.f32 1.0, %v2164_v17 }
 0x75a   : > { %v2320_v20 = vadd.f32 0.4994258, %v2319_v4  ;;  %v2265_v4 = vadd.f32 0.0036580483, %v2264_v30 }
 0x777   : > { %v2079_v11 = vpop.f32.mrf.mxu3 }
 0x778   : > { %v5478_v15 = vadd.f32 %v5381_v12, %v2079_v11 }
 0x77a   : > { %v5485_v28 = vmul.f32 0.70710677, %v5478_v15 }
 0x77c   : > { %v2340_v38 = vmul.f32 %v5485_v28, %v5485_v28 }
 0x77e   : > { %v5496_v42 = vmin.f32 %v2340_v38, 16.0  ;;  %v2321_v38 = vmul.f32 %v2320_v20, %v5446_v7 }
 0x77f   : > { %v2081_v27 = vpop.f32.mrf.mxu3 }
 0x780   : > { %v2342_v34 = vmul.f32 2.1237322e-06, %v5496_v42  ;;  %v2353_v55 = vmul.f32 3.8918573e-05, %v5496_v42  ;;  %v5504_v5 = vadd.f32 %v5381_v12, %v2081_v27  ;;  %v2186_v12 = vmul.f32 %v2185_v36, %v5431_v49 }
 0x781   : > { %v5539_v27 = vadd.f32 1.0, %v2241_v35  ;;  %v5544_v8 = vadd.f32 1.0, %v2321_v38  ;;  %v2305_v38 = vadd.f32 0.0036580483, %v2304_v3 }
 0x782   : > { %v2354_v11 = vadd.f32 0.001143296, %v2353_v55  ;;  %v2343_v53 = vadd.f32 0.00028619796, %v2342_v34  ;;  %v5518_v21 = vmul.f32 0.70710677, %v5504_v5 }
 0x783   : > { %v2187_v36 = vadd.f32 0.05243302, %v2186_v12  ;;  %v2125_v55 = vsub.f32 1.0, %v2124_v39  ;;  %v5549_v12 = vadd.f32 1.0, %v2281_v58  ;;  %v2227_v39 = vadd.f32 0.05243302, %v2226_v47 }
 0x784   : > { %v2355_v22 = vmul.f32 %v2354_v11, %v5496_v42  ;;  %v2380_v37 = vmul.f32 %v5518_v21, %v5518_v21  ;;  %v2344_v60 = vmul.f32 %v2343_v53, %v5496_v42  ;;  %v2266_v11 = vmul.f32 %v2265_v4, %v5448_v0 }
 0x785   : > { %v2188_v53 = vmul.f32 %v2187_v36, %v5431_v49  ;;  %4117 = vrcp.f32 %v5539_v27  ;;  %v2126_v17 = vmul.f32 %v5510_v6, %v2125_v55  ;;  %v2254_v52 = vand.u32 2147483648, %v5539_v27 }
 0x786   : > { %v2356_v41 = vadd.f32 0.014752088, %v2355_v22  ;;  %v5536_v59 = vmin.f32 %v2380_v37, 16.0  ;;  %v2345_v35 = vadd.f32 0.0036580483, %v2344_v60  ;;  %4119 = vrcp.f32 %v5544_v8 }
 0x787   : > { %v2267_v36 = vadd.f32 0.05243302, %v2266_v11  ;;  %4121 = vrcp.f32 %v5549_v12  ;;  %v2166_v60 = vmul.f32 %v5514_v16, %v2165_v10  ;;  %v2189_v3 = vadd.f32 0.18741608, %v2188_v53 }
 0x788   : > { %v2357_v34 = vmul.f32 %v2356_v41, %v5496_v42  ;;  %v2382_v20 = vmul.f32 2.1237322e-06, %v5536_v59  ;;  %v2393_v30 = vmul.f32 3.8918573e-05, %v5536_v59  ;;  %v5559_v41 = vpop.eup %4115  ;;  %v2174_v11 = vand.u32 2147483648, %v5481_v18 }
 0x789   : > { %v2252_v44 = vand.u32 2147483647, %v5539_v27  ;;  %vm2209_vm2 = vweird.f32 %v5559_v41  ;;  %vm2248_vm3 = vweird.f32 %v5539_v27  ;;  %vm2288_vm4 = vweird.f32 %v5549_v12 }
 0x78a   : > { %v2358_v57 = vadd.f32 0.112945676, %v2357_v34  ;;  %v2383_v14 = vadd.f32 0.00028619796, %v2382_v20  ;;  %v2394_v22 = vadd.f32 0.001143296, %v2393_v30  ;;  %v2346_v34 = vmul.f32 %v2345_v35, %v5496_v42 }
 0x78b   : > { %v2228_v20 = vmul.f32 %v2227_v39, %v5443_v61  ;;  %v2306_v30 = vmul.f32 %v2305_v38, %v5446_v7  ;;  %v5575_v53 = vpop.eup %4117  ;;  %v2268_v39 = vmul.f32 %v2267_v36, %v5448_v0  ;;  %vm5684_vm11 = vcmp.eq.f32.partialorder %v2252_v44, 8.507059e+37 }
 0x78c   : > { %v2359_v37 = vmul.f32 %v2358_v57, %v5496_v42  ;;  %v2384_v4 = vmul.f32 %v2383_v14, %v5536_v59  ;;  %v2395_v58 = vmul.f32 %v2394_v22, %v5536_v59  ;;  %v5569_v22 = vadd.f32 %v5510_v6, %v2126_v17 }
 0x78d   : > { %v5585_v17 = vadd.f32 %v5514_v16, %v2166_v60  ;;  %v2229_v36 = vadd.f32 0.18741608, %v2228_v20  ;;  %v2269_v63 = vadd.f32 0.18741608, %v2268_v39  ;;  %vm2249_vm0 = vweird.f32 %v5575_v53 }
 0x78e   : > { %v2360_v47 = vadd.f32 0.4994258, %v2359_v37  ;;  %v2396_v55 = vadd.f32 0.014752088, %v2395_v58  ;;  %v2385_v14 = vadd.f32 0.0036580483, %v2384_v4  ;;  %v2204_v37 = vmul.f32 %v5559_v41, %v5520_v23  ;;  %v5582_v4 = vpop.eup %4119 }
 0x78f   : > { %v2190_v58 = vmul.f32 %v2189_v3, %v5431_v49  ;;  %v5604_v3 = vor.u32 1.1754944e-38, %v2174_v11  ;;  %v2324_v11 = vmul.f32 %v5582_v4, %v5544_v8  ;;  %v2230_v1 = vmul.f32 %v2229_v36, %v5443_v61 }
 0x790   : > { %v2361_v57 = vmul.f32 %v2360_v47, %v5496_v42  ;;  %v2397_v10 = vmul.f32 %v2396_v55, %v5536_v59  ;;  %v2347_v47 = vadd.f32 0.05243302, %v2346_v34  ;;  %v5588_v55 = vpop.eup %4121  ;;  %v2386_v60 = vmul.f32 %v2385_v14, %v5536_v59 }
 0x791   : > { %v2205_v34 = vsub.f32 1.0, %v2204_v37  ;;  %v2244_v14 = vmul.f32 %v5575_v53, %v5539_v27  ;;  %v2284_v37 = vmul.f32 %v5588_v55, %v5549_v12  ;;  %v5627_v51 = vadd.f32 1.1283791, %v2190_v58 }
 0x792   : > { %v5580_v38 = vadd.f32 1.0, %v2361_v57  ;;  %v2398_v50 = vadd.f32 0.112945676, %v2397_v10  ;;  %v2307_v57 = vadd.f32 0.05243302, %v2306_v30  ;;  %v2214_v30 = vand.u32 2147483648, %v5520_v23 }
 0x793   : > { %v2348_v49 = vmul.f32 %v2347_v47, %v5496_v42  ;;  %v2387_v2 = vadd.f32 0.05243302, %v2386_v60  ;;  %v2206_v32 = vmul.f32 %v5559_v41, %v2205_v34  ;;  %v2245_v47 = vsub.f32 1.0, %v2244_v14 }
 0x794   : > { %4123 = vrcp.f32 %v5580_v38  ;;  %v2399_v10 = vmul.f32 %v2398_v50, %v5536_v59  ;;  %v2308_v39 = vmul.f32 %v2307_v57, %v5446_v7  ;;  %v5637_v26 = vor.u32 1.1754944e-38, %v2214_v30 }
 0x795   : > { %v2270_v58 = vmul.f32 %v2269_v63, %v5448_v0  ;;  %v2285_v61 = vsub.f32 1.0, %v2284_v37  ;;  %v2349_v36 = vadd.f32 0.18741608, %v2348_v49  ;;  %v5644_v34 = vadd.f32 1.1283791, %v2230_v1 }
 0x796   : > { %v2400_v25 = vadd.f32 0.4994258, %v2399_v10  ;;  %v2325_v10 = vsub.f32 1.0, %v2324_v11  ;;  %v2388_v9 = vmul.f32 %v2387_v2, %v5536_v59  ;;  %v5649_v30 = vadd.f32 %v5559_v41, %v2206_v32 }
 0x797   : > { %v5651_v14 = vor.u32 1.1754944e-38, %v2254_v52  ;;  %v2246_v63 = vmul.f32 %v5575_v53, %v2245_v47  ;;  %v2271_v49 = vadd.f32 1.1283791, %v2270_v58  ;;  %v2286_v2 = vmul.f32 %v5588_v55, %v2285_v61 }
 0x798   : > { %v2401_v50 = vmul.f32 %v2400_v25, %v5536_v59  ;;  %v2309_v25 = vadd.f32 0.18741608, %v2308_v39  ;;  %v2326_v1 = vmul.f32 %v5582_v4, %v2325_v10  ;;  %v2350_v52 = vmul.f32 %v2349_v36, %v5496_v42 }
 0x799   : > { %v2292_v11 = vand.u32 2147483647, %v5549_v12  ;;  %v2389_v37 = vadd.f32 0.18741608, %v2388_v9  ;;  %v2332_v39 = vand.u32 2147483647, %v5544_v8  ;;  %vm2329_vm7 = vweird.f32 %v5582_v4 }
 0x79a   : > { %v5635_v45 = vpop.eup %4123  ;;  %v5642_v60 = vadd.f32 1.0, %v2401_v50  ;;  %v2310_v50 = vmul.f32 %v2309_v25, %v5446_v7  ;;  %v2334_v47 = vand.u32 2147483648, %v5544_v8  ;;  %v2374_v10 = vand.u32 2147483648, %v5580_v38 }
 0x79b   : > { %v2364_v57 = vmul.f32 %v5635_v45, %v5580_v38  ;;  %vm2369_vm5 = vweird.f32 %v5635_v45  ;;  %v2327_v42 = vadd.f32 %v5582_v4, %v2326_v1  ;;  %vm2368_vm8 = vweird.f32 %v5580_v38 }
 0x79c   : > { %4125 = vrcp.f32 %v5642_v60  ;;  %v2372_v7 = vand.u32 2147483647, %v5580_v38  ;;  %v2247_v9 = vadd.f32 %v5575_v53, %v2246_v63  ;;  %v2287_v36 = vadd.f32 %v5588_v55, %v2286_v2  ;;  %vm5680_vm10 = vmor %vm2368_vm8, %vm2369_vm5 }
 0x79d   : > { %v2365_v0 = vsub.f32 1.0, %v2364_v57  ;;  %vm2289_vm9 = vweird.f32 %v5588_v55  ;;  %v2351_v57 = vadd.f32 1.1283791, %v2350_v52  ;;  %vm2328_vm12 = vweird.f32 %v5544_v8 }
 0x79e   : > { %v2390_v63 = vmul.f32 %v2389_v37, %v5536_v59  ;;  %v2294_v2 = vand.u32 2147483648, %v5549_v12  ;;  %v2311_v52 = vadd.f32 1.1283791, %v2310_v50  ;;  %vm5697_vm5 = vmor %vm2328_vm12, %vm2329_vm7  ;;  %vm5701_vm8 = vcmp.eq.f32.partialorder %v2332_v39, 8.507059e+37 }
 0x79f   : > { %v2366_v32 = vmul.f32 %v5635_v45, %v2365_v0  ;;  %v2375_v8 = vor.u32 1.1754944e-38, %v2374_v10  ;;  %v2331_v59 = vsel %vm5697_vm5, %v5582_v4, %v2327_v42  ;;  %v2335_v50 = vor.u32 1.1754944e-38, %v2334_v47 }
 0x7a0   : > { %vm2373_vm7 = vcmp.eq.f32.partialorder %v2372_v7, 8.507059e+37  ;;  %v2414_v12 = vand.u32 2147483648, %v5642_v60  ;;  %v2391_v4 = vadd.f32 1.1283791, %v2390_v63  ;;  %v2412_v42 = vand.u32 2147483647, %v5642_v60 }
 0x7a1   : > { %v2367_v58 = vadd.f32 %v5635_v45, %v2366_v32  ;;  %vm2293_vm12 = vcmp.eq.f32.partialorder %v2292_v11, 8.507059e+37  ;;  %v2336_v7 = vsel %vm5701_vm8, %v2335_v50, %v2331_v59  ;;  %v2272_v11 = vmul.f32 %v2271_v49, %v5429_v40 }
 0x7a2   : > { %v4126_v61 = vpop.eup %4125  ;;  %v2415_v63 = vor.u32 1.1754944e-38, %v2414_v12  ;;  %v2152_v59 = vmul.f32 %v5526_v33, %v5393_v29  ;;  %v2091_v50 = vmul.f32 0.5, %v5504_v5  ;;  %v2090_v35 = vmul.f32 0.5, %v5478_v15 }
 0x7a3   : > { %v2371_v38 = vsel %vm5680_vm10, %v5635_v45, %v2367_v58  ;;  %v2404_v1 = vmul.f32 %v4126_v61, %v5642_v60  ;;  %vm5707_vm10 = vmor %vm2288_vm4, %vm2289_vm9  ;;  %v2352_v58 = vmul.f32 %v2351_v57, %v5485_v28  ;;  %vm2409_vm9 = vweird.f32 %v4126_v61 }
 0x7a4   : > { %v2291_v39 = vsel %vm5707_vm10, %v5588_v55, %v2287_v36  ;;  %v2376_v10 = vsel %vm2373_vm7, %v2375_v8, %v2371_v38  ;;  %vm5723_vm4 = vmor %vm2248_vm3, %vm2249_vm0  ;;  %v2295_v55 = vor.u32 1.1754944e-38, %v2294_v2  ;;  %v2312_v36 = vmul.f32 %v2311_v52, %v5426_v56 }
 0x7a5   : > { %v2405_v37 = vsub.f32 1.0, %v2404_v1  ;;  %v2251_v28 = vsel %vm5723_vm4, %v5575_v53, %v2247_v9  ;;  %vm5737_vm0 = vmor %vm2208_vm6, %vm2209_vm2  ;;  %v2377_v57 = vmul.f32 %v2376_v10, %v2352_v58  ;;  %vm2408_vm3 = vweird.f32 %v5642_v60 }
 0x7a6   : > { %v2211_v53 = vsel %vm5737_vm0, %v5559_v41, %v5649_v30  ;;  %v2296_v9 = vsel %vm2293_vm12, %v2295_v55, %v2291_v39  ;;  %vm2410_vm5 = vmor %vm2408_vm3, %vm2409_vm9  ;;  %v2337_v1 = vmul.f32 %v2336_v7, %v2312_v36  ;;  %v2392_v2 = vmul.f32 %v2391_v4, %v5518_v21  ;;  %v6563_v55 = vld [vmem:[#allocation36_spill] sm:$0xff] }
 0x7a7   : > { %v2406_v47 = vmul.f32 %v4126_v61, %v2405_v37  ;;  %vm2413_vm2 = vcmp.eq.f32.partialorder %v2412_v42, 8.507059e+37  ;;  %v6557_v56 = vand.u32 2147483647, %v5520_v23  ;;  %v2232_v60 = vmul.f32 %v5644_v34, %v5423_v54 }
 0x7a8   : > { %v2256_v41 = vsel %vm5684_vm11, %v5651_v14, %v2251_v28  ;;  %v2297_v49 = vmul.f32 %v2296_v9, %v2272_v11  ;;  %v3731_v52 = vclamps-f32 %v2377_v57, 1.0  ;;  %v6558_v21 = vand.u32 2147483647, %v5475_v13  ;;  %v2439_v11 = vld [vmem:[#allocation2 + $0x8] sm:$0xff] }
 0x7a9   : > { %v2407_v38 = vadd.f32 %v4126_v61, %v2406_v47  ;;  %vm2213_vm6 = vcmp.eq.f32.partialorder %v6557_v56, 8.507059e+37  ;;  %v6560_v8 = vand.u32 2147483647, %v5481_v18  ;;  %v2192_v54 = vmul.f32 %v5627_v51, %v5407_v31  ;;  %v2513_v9 = vld [vmem:[#allocation2 + $0x48] sm:$0xff]  ;;  %v2442_v56 = vld [vmem:[#allocation2 + $0x20] sm:$0xff] }
 0x7aa   : > { %v2216_v40 = vsel %vm2213_vm6, %v5637_v26, %v2211_v53  ;;  %vm2133_vm8 = vcmp.eq.f32.partialorder %v6558_v21, 8.507059e+37  ;;  %v6561_v26 = vsel %vm5611_vm15, %v5514_v16, %v5585_v17  ;;  %v2257_v14 = vmul.f32 %v2256_v41, %v2232_v60  ;;  %v2512_v53 = vld [vmem:[#allocation2 + $0x40] sm:$0xff]  ;;  %v2443_v41 = vld [vmem:[#allocation2 + $0x28] sm:$0xff] }
 0x7ab   : > { %v2411_v44 = vsel %vm2410_vm5, %v4126_v61, %v2407_v38  ;;  %v6559_v61 = vand.u32 2147483648, %v5475_v13  ;;  %vm2173_vm10 = vcmp.eq.f32.partialorder %v6560_v8, 8.507059e+37  ;;  %v3730_v0 = vclamps-f32 %v2337_v1, 1.0  ;;  %v2438_v38 = vld [vmem:[#allocation2] sm:$0xff]  ;;  %v2514_v1 = vld [vmem:[#allocation2 + $0x50] sm:$0xff] }
 0x7ac   : > { %v2416_v30 = vsel %vm2413_vm2, %v2415_v63, %v2411_v44  ;;  %v2176_v34 = vsel %vm2173_vm10, %v5604_v3, %v6561_v26  ;;  %v6562_v13 = vsel %vm5594_vm14, %v5510_v6, %v5569_v22  ;;  %v2217_v51 = vmul.f32 %v2216_v40, %v2192_v54  ;;  %v2440_v63 = vld [vmem:[#allocation2 + $0x10] sm:$0xff]  ;;  %v2515_v44 = vld [vmem:[#allocation2 + $0x58] sm:$0xff]  ;;  %v2516_v60 = vld [vmem:[#allocation2 + $0x60] sm:$0xff] }
 0x7ad   : > { %v2417_v32 = vmul.f32 %v2416_v30, %v2392_v2  ;;  %v2135_v23 = vor.u32 1.1754944e-38, %v6559_v61  ;;  %v3729_v31 = vclamps-f32 %v2297_v49, 1.0  ;;  %v2426_v20 = vadd.f32 1.0, %v3731_v52  ;;  %v2441_v2 = vld [vmem:[#allocation2 + $0x18] sm:$0xff]  ;;  %v2517_v30 = vld [vmem:[#allocation2 + $0x68] sm:$0xff]  ;;  %v2444_v40 = vld [vmem:[#allocation2 + $0x30] sm:$0xff] }
 0x7ae   : > { %v2112_v17 = vmul.f32 %v5506_v19, %v5390_v46  ;;  %v2177_v3 = vmul.f32 %v2176_v34, %v2152_v59  ;;  %v3728_v37 = vclamps-f32 %v2257_v14, 1.0  ;;  %v2425_v39 = vadd.f32 1.0, %v3730_v0  ;;  %v2518_v49 = vld [vmem:[#allocation2 + $0x70] sm:$0xff]  ;;  %v2445_v52 = vld [vmem:[#allocation2 + $0x38] sm:$0xff]  ;;  %v2436_v21 = vld [vmem:[%s4688_s7] sm:$0xff] }
 0x7af   : > { %v3732_v45 = vclamps-f32 %v2417_v32, 1.0  ;;  %v2136_v18 = vsel %vm2133_vm8, %v2135_v23, %v6562_v13  ;;  %v3727_v22 = vclamps-f32 %v2217_v51, 1.0  ;;  %v2424_v10 = vadd.f32 1.0, %v3729_v31  ;;  %v2519_v32 = vld [vmem:[#allocation2 + $0x78] sm:$0xff] }
 0x7b0   : > { %v2137_v6 = vmul.f32 %v2136_v18, %v2112_v17  ;;  %v2089_v29 = vmul.f32 0.5, %v5415_v24  ;;  %v5785_v33 = vmul.f32 %v2426_v20, %v2090_v35  ;;  %v3726_v5 = vclamps-f32 %v2177_v3, 1.0  ;;  %v5851_v18 = vld [vmem:[%s4688_s7 + $0x8] ss:$0 sm:$0xff] }
 0x7b1   : > { %v2427_v16 = vadd.f32 1.0, %v3732_v45  ;;  %v2423_v46 = vadd.f32 1.0, %v3728_v37  ;;  %v2088_v19 = vmul.f32 0.5, %v5418_v48  ;;  %v2422_v25 = vadd.f32 1.0, %v3727_v22 }
 0x7b2   : > { %v5790_v12 = vmul.f32 %v2425_v39, %v2089_v29  ;;  %v3725_v15 = vclamps-f32 %v2137_v6, 1.0  ;;  %v2087_v24 = vmul.f32 0.5, %v5410_v43  ;;  %v2421_v47 = vadd.f32 1.0, %v3726_v5  ;;  %v6564_v43 = vld [vmem:[#allocation35_spill] sm:$0xff] }
 0x7b3   : > { %v5782_v58 = vmul.f32 %v2427_v16, %v2091_v50  ;;  %v5795_v4 = vmul.f32 %v2424_v10, %v2088_v19  ;;  %v2086_v42 = vmul.f32 0.5, %v5400_v62  ;;  %v2085_v7 = vmul.f32 0.5, %v6563_v55 }
 0x7b4   : > { %v5800_v48 = vmul.f32 %v2423_v46, %v2087_v24  ;;  %v2420_v28 = vadd.f32 1.0, %v3725_v15  ;;  %v2084_v36 = vmul.f32 0.5, %v6564_v43  ;;  %v5833_v61 = vperm.slane %v2436_v21, 0 }
 0x7b5   : > { %2478 = vmatpush.msra.mxu0 %v5782_v58  ;;  %2552 = vmatpush.msrb.mxu2 %v5782_v58  ;;  %v5805_v27 = vmul.f32 %v2422_v25, %v2086_v42  ;;  %v5810_v57 = vmul.f32 %v2421_v47, %v2085_v7  ;;  %v5835_v8 = vperm.slane %v2436_v21, 3  ;;  %v5837_v54 = vperm.slane %v2436_v21, 6 }
 0x7b6   : > { %v2428_v62 = vmul.f32 %v2420_v28, %v2084_v36  ;;  %v5839_v26 = vperm.slane %v2436_v21, 1  ;;  %v5841_v34 = vperm.slane %v2436_v21, 7  ;;  %v5843_v14 = vperm.slane %v2436_v21, 4 }
 0x7b7   : > { %2479 = vmatpush.msra.mxu0 %v5785_v33  ;;  %2553 = vmatpush.msrb.mxu2 %v5785_v33  ;;  %v5846_v45 = vperm.slane %v2436_v21, 2  ;;  %v5848_v13 = vperm.slane %v2436_v21, 5 }
 0x7b8   : > { %v2595_v31 = vmul.f32 %v5839_v26, %v2428_v62  ;;  %v2755_v20 = vmul.f32 %v5841_v34, %v2428_v62  ;;  %v2647_v16 = vmul.f32 %v5843_v14, %v2428_v62  ;;  %v2648_v15 = vmul.f32 %v5843_v14, %v5810_v57 }
 0x7b9   : > { %2480 = vmatpush.msra.mxu0 %v5790_v12  ;;  %2554 = vmatpush.msrb.mxu2 %v5790_v12  ;;  %v2649_v7 = vmul.f32 %v5843_v14, %v5805_v27 }
 0x7bb   : > { %2481 = vmatpush.msra.mxu0 %v5795_v4  ;;  %2555 = vmatpush.msrb.mxu2 %v5795_v4 }
 0x7bd   : > { %2482 = vmatpush.msra.mxu0 %v5800_v48  ;;  %2556 = vmatpush.msrb.mxu2 %v5800_v48 }
 0x7bf   : > { %2483 = vmatpush.msra.mxu0 %v5805_v27  ;;  %2557 = vmatpush.msrb.mxu2 %v5805_v27 }
 0x7c1   : > { %2484 = vmatpush.msra.mxu0 %v5810_v57  ;;  %2558 = vmatpush.msrb.mxu2 %v5810_v57 }
 0x7c3   : > { %2485 = vmatpush.msra.mxu0 %v2428_v62  ;;  %2559 = vmatpush.msrb.mxu2 %v2428_v62 }
 0x7c4   : > { %3733 = vmatmul.msk.f32.vlgmr.msra.gmra.mxu0 %vm1229_vm13, %v2438_v38  ;;  %3741 = vmatmul.msk.f32.vlgmr.msrb.gmra.mxu2 %vm1229_vm13, %v2512_v53 }
 0x7cc   : > { %3734 = vmatmul.msk.f32.gmra.mxu0 %vm1229_vm13, %v2439_v11  ;;  %3742 = vmatmul.msk.f32.gmra.mxu2 %vm1229_vm13, %v2513_v9  ;;  %v2650_v9 = vmul.f32 %v5843_v14, %v5800_v48 }
 0x7d4   : > { %3735 = vmatmul.msk.f32.gmra.mxu0 %vm1229_vm13, %v2440_v63  ;;  %3743 = vmatmul.msk.f32.gmra.mxu2 %vm1229_vm13, %v2514_v1 }
 0x7dc   : > { %3736 = vmatmul.msk.f32.gmra.mxu0 %vm1229_vm13, %v2441_v2  ;;  %3744 = vmatmul.msk.f32.gmra.mxu2 %vm1229_vm13, %v2515_v44 }
 0x7e4   : > { %3737 = vmatmul.msk.f32.gmra.mxu0 %vm1229_vm13, %v2442_v56  ;;  %3745 = vmatmul.msk.f32.gmra.mxu2 %vm1229_vm13, %v2516_v60 }
 0x7ec   : > { %3738 = vmatmul.msk.f32.gmra.mxu0 %vm1229_vm13, %v2443_v41  ;;  %3746 = vmatmul.msk.f32.gmra.mxu2 %vm1229_vm13, %v2517_v30  ;;  %v2651_v41 = vmul.f32 %v5843_v14, %v5795_v4 }
 0x7f4   : > { %3739 = vmatmul.msk.f32.gmra.mxu0 %vm1229_vm13, %v2444_v40  ;;  %3747 = vmatmul.msk.f32.gmra.mxu2 %vm1229_vm13, %v2518_v49 }
 0x7fc   : > { %3740 = vmatmul.msk.f32.gmra.mxu0 %vm1229_vm13, %v2445_v52  ;;  %3748 = vmatmul.msk.f32.gmra.mxu2 %vm1229_vm13, %v2519_v32  ;;  %v2652_v32 = vmul.f32 %v5843_v14, %v5790_v12 }
 0x841   : > { %v2487_v23 = vpop.f32.mrf.mxu0 }
 0x842   : > { %v2586_v0 = vmul.f32 %v5833_v61, %v2487_v23  ;;  %v2638_v59 = vmul.f32 %v5835_v8, %v2487_v23  ;;  %v2746_v51 = vmul.f32 %v5837_v54, %v2487_v23 }
 0x844   : > { %v2603_v17 = vadd.f32 %v2595_v31, %v2586_v0  ;;  %v2763_v35 = vadd.f32 %v2755_v20, %v2746_v51  ;;  %v2655_v22 = vadd.f32 %v2647_v16, %v2638_v59  ;;  %v2653_v20 = vmul.f32 %v5843_v14, %v5785_v33 }
 0x847   : > { %v2561_v50 = vpop.f32.mrf.mxu2 }
 0x848   : > { %v2612_v3 = vmul.f32 %v5846_v45, %v2561_v50  ;;  %v2664_v37 = vmul.f32 %v5848_v13, %v2561_v50  ;;  %v2772_v39 = vmul.f32 %v5851_v18, %v2561_v50 }
 0x849   : > { %v5861_v6 = vpop.f32.mrf.mxu0 }
 0x84a   : > { %v5863_v10 = vadd.f32 %v2612_v3, %v2603_v17  ;;  %v5865_v29 = vadd.f32 %v2772_v39, %v2763_v35  ;;  %v5867_v5 = vadd.f32 %v2664_v37, %v2655_v22  ;;  %v2639_v46 = vmul.f32 %v5835_v8, %v5861_v6 }
 0x84b   : > { %v5923_v3 = vmul.f32 %v5839_v26, %v5810_v57  ;;  %v5927_v37 = vmul.f32 %v5839_v26, %v5805_v27  ;;  %v5932_v35 = vmul.f32 %v5841_v34, %v5805_v27  ;;  %v2598_v22 = vmul.f32 %v5839_v26, %v5800_v48 }
 0x84c   : > { %v2656_v47 = vadd.f32 %v2648_v15, %v2639_v46  ;;  %v2758_v46 = vmul.f32 %v5841_v34, %v5800_v48  ;;  %v2599_v15 = vmul.f32 %v5839_v26, %v5795_v4  ;;  %v2654_v27 = vmul.f32 %v5843_v14, %v5782_v58 }
 0x84d   : > { %v2601_v48 = vmul.f32 %v5839_v26, %v5785_v33  ;;  %v2587_v14 = vmul.f32 %v5833_v61, %v5861_v6 }
 0x84f   : > { %v5871_v19 = vpop.f32.mrf.mxu2 }
 0x850   : > { %v2665_v25 = vmul.f32 %v5848_v13, %v5871_v19 }
 0x851   : > { %v5877_v24 = vpop.f32.mrf.mxu0 }
 0x852   : > { %v5879_v42 = vadd.f32 %v2665_v25, %v2656_v47  ;;  %v2640_v28 = vmul.f32 %v5835_v8, %v5877_v24  ;;  %v2759_v47 = vmul.f32 %v5841_v34, %v5795_v4  ;;  %v2761_v4 = vmul.f32 %v5841_v34, %v5785_v33 }
 0x854   : > { %v2657_v62 = vadd.f32 %v2649_v7, %v2640_v28  ;;  %v2600_v28 = vmul.f32 %v5839_v26, %v5790_v12 }
 0x857   : > { %v5883_v55 = vpop.f32.mrf.mxu2 }
 0x858   : > { %v2666_v43 = vmul.f32 %v5848_v13, %v5883_v55 }
 0x859   : > { %v5889_v36 = vpop.f32.mrf.mxu0 }
 0x85a   : > { %v5891_v38 = vadd.f32 %v2666_v43, %v2657_v62  ;;  %v2641_v53 = vmul.f32 %v5835_v8, %v5889_v36  ;;  %v2760_v43 = vmul.f32 %v5841_v34, %v5790_v12  ;;  %v2588_v12 = vmul.f32 %v5833_v61, %v5877_v24 }
 0x85b   : > { %v2589_v33 = vmul.f32 %v5833_v61, %v5889_v36 }
 0x85c   : > { %v2658_v2 = vadd.f32 %v2650_v9, %v2641_v53  ;;  %v2602_v9 = vmul.f32 %v5839_v26, %v5782_v58 }
 0x85f   : > { %v5895_v11 = vpop.f32.mrf.mxu2 }
 0x860   : > { %v2667_v63 = vmul.f32 %v5848_v13, %v5895_v11 }
 0x861   : > { %v2499_v1 = vpop.f32.mrf.mxu0 }
 0x862   : > { %v2642_v44 = vmul.f32 %v5835_v8, %v2499_v1  ;;  %v5902_v56 = vadd.f32 %v2667_v63, %v2658_v2 }
 0x864   : > { %v2659_v49 = vadd.f32 %v2651_v41, %v2642_v44  ;;  %v2762_v44 = vmul.f32 %v5841_v34, %v5782_v58  ;;  %v2590_v41 = vmul.f32 %v5833_v61, %v2499_v1 }
 0x867   : > { %v5904_v60 = vpop.f32.mrf.mxu2 }
 0x868   : > { %v2668_v30 = vmul.f32 %v5848_v13, %v5904_v60 }
 0x869   : > { %v2502_v40 = vpop.f32.mrf.mxu0 }
 0x86a   : > { %v2643_v52 = vmul.f32 %v5835_v8, %v2502_v40  ;;  %v5913_v21 = vadd.f32 %v2668_v30, %v2659_v49  ;;  %v2591_v26 = vmul.f32 %v5833_v61, %v2502_v40  ;;  %v2751_v49 = vmul.f32 %v5837_v54, %v2502_v40 }
 0x86c   : > { %v2660_v23 = vadd.f32 %v2652_v32, %v2643_v52 }
 0x86f   : > { %v2576_v0 = vpop.f32.mrf.mxu2 }
 0x870   : > { %v2669_v59 = vmul.f32 %v5848_v13, %v2576_v0 }
 0x871   : > { %v2505_v51 = vpop.f32.mrf.mxu0 }
 0x872   : > { %v2644_v31 = vmul.f32 %v5835_v8, %v2505_v51  ;;  %v5919_v50 = vadd.f32 %v2669_v59, %v2660_v23  ;;  %v2592_v2 = vmul.f32 %v5833_v61, %v2505_v51  ;;  %v2752_v30 = vmul.f32 %v5837_v54, %v2505_v51 }
 0x873   : > { %v2777_v51 = vmul.f32 %v5851_v18, %v2576_v0 }
 0x874   : > { %v2661_v16 = vadd.f32 %v2653_v20, %v2644_v31  ;;  %v2609_v40 = vadd.f32 %v2601_v48, %v2592_v2  ;;  %v2607_v2 = vadd.f32 %v2599_v15, %v2590_v41  ;;  %v2613_v41 = vmul.f32 %v5846_v45, %v5871_v19 }
 0x877   : > { %v2579_v17 = vpop.f32.mrf.mxu2 }
 0x878   : > { %v2670_v39 = vmul.f32 %v5848_v13, %v2579_v17  ;;  %v2618_v52 = vmul.f32 %v5846_v45, %v2579_v17  ;;  %v2778_v32 = vmul.f32 %v5851_v18, %v2579_v17 }
 0x879   : > { %v2508_v25 = vpop.f32.mrf.mxu0 }
 0x87a   : > { %v2645_v7 = vmul.f32 %v5835_v8, %v2508_v25  ;;  %v2593_v62 = vmul.f32 %v5833_v61, %v2508_v25  ;;  %v5952_v53 = vadd.f32 %v2670_v39, %v2661_v16  ;;  %v2753_v8 = vmul.f32 %v5837_v54, %v2508_v25 }
 0x87b   : > { %v2750_v39 = vmul.f32 %v5837_v54, %v2499_v1  ;;  %v2617_v61 = vmul.f32 %v5846_v45, %v2576_v0  ;;  %v2769_v25 = vadd.f32 %v2761_v4, %v2752_v30  ;;  %v2608_v1 = vadd.f32 %v2600_v28, %v2591_v26 }
 0x87c   : > { %v2662_v63 = vadd.f32 %v2654_v27, %v2645_v7  ;;  %v2610_v23 = vadd.f32 %v2602_v9, %v2593_v62  ;;  %v2770_v31 = vadd.f32 %v2762_v44, %v2753_v8  ;;  %v2749_v62 = vmul.f32 %v5837_v54, %v5889_v36 }
 0x87d   : > { %v2776_v9 = vmul.f32 %v5851_v18, %v5904_v60  ;;  %v2768_v8 = vadd.f32 %v2760_v43, %v2751_v49  ;;  %v2626_v0 = vadd.f32 %v2618_v52, %v2609_v40  ;;  %v2786_v48 = vadd.f32 %v2778_v32, %v2769_v25  ;;  %v6033_v40 = vld [vmem:[%s807_s16] ss:$0 sm:$0xff] }
 0x87e   : > { %v2748_v4 = vmul.f32 %v5837_v54, %v5877_v24  ;;  %v2775_v36 = vmul.f32 %v5851_v18, %v5895_v11  ;;  %v2767_v44 = vadd.f32 %v2759_v47, %v2750_v39  ;;  %v2747_v43 = vmul.f32 %v5837_v54, %v5861_v6  ;;  %v2796_v39 = vld [vmem:[#allocation2 + $0xf8] sm:$0xff] }
 0x87f   : > { %v2582_v59 = vpop.f32.mrf.mxu2  ;;  %v2785_v28 = vadd.f32 %v2777_v51, %v2768_v8  ;;  %v2614_v26 = vmul.f32 %v5846_v45, %v5883_v55  ;;  %v2774_v24 = vmul.f32 %v5851_v18, %v5883_v55  ;;  %v2606_v30 = vadd.f32 %v2598_v22, %v2589_v33 }
 0x880   : > { %v2619_v58 = vmul.f32 %v5846_v45, %v2582_v59  ;;  %v2671_v20 = vmul.f32 %v5848_v13, %v2582_v59  ;;  %v2779_v16 = vmul.f32 %v5851_v18, %v2582_v59  ;;  %v2616_v13 = vmul.f32 %v5846_v45, %v5904_v60  ;;  %v2634_v59 = vld [vmem:[#allocation2 + $0xa8] sm:$0xff] }
 0x881   : > { %v2625_v60 = vadd.f32 %v2617_v61, %v2608_v1  ;;  %v2766_v49 = vadd.f32 %v2758_v46, %v2749_v62  ;;  %v2784_v15 = vadd.f32 %v2776_v9, %v2767_v44  ;;  %v2756_v47 = vmul.f32 %v5841_v34, %v5810_v57  ;;  %v3829_v9 = vld [vmem:[%s4702_s0 + $0x38] sm:$0xff] }
 0x882   : > { %v2627_v7 = vadd.f32 %v2619_v58, %v2610_v23  ;;  %v2787_v27 = vadd.f32 %v2779_v16, %v2770_v31  ;;  %v5980_v17 = vadd.f32 %v2671_v20, %v2662_v63  ;;  %v2615_v63 = vmul.f32 %v5846_v45, %v5895_v11  ;;  %v2793_v23 = vld [vmem:[#allocation2 + $0xe0] sm:$0xff]  ;;  %v2794_v31 = vld [vmem:[#allocation2 + $0xe8] sm:$0xff]  ;;  %v2635_v58 = vld [vmem:[#allocation2 + $0xb0] sm:$0xff]  ;;  %3306 = vmatpush.bf16.msrb.mxu0 %v3829_v9 }
 0x883   : > { %v2624_v11 = vadd.f32 %v2616_v13, %v2607_v2  ;;  %v2773_v54 = vmul.f32 %v5851_v18, %v5871_v19  ;;  %v2605_v6 = vadd.f32 %v5927_v37, %v2588_v12  ;;  %v2765_v52 = vadd.f32 %v5932_v35, %v2748_v4  ;;  %v2629_v18 = vld [vmem:[#allocation2 + $0x80] sm:$0xff]  ;;  %v2790_v37 = vld [vmem:[#allocation2 + $0xc8] sm:$0xff]  ;;  %v2631_v35 = vld [vmem:[#allocation2 + $0x90] sm:$0xff] }
 0x884   : > { %2712 = vmatpush.msra.mxu1 %v2627_v7  ;;  %2829 = vmatpush.msra.mxu3 %v2787_v27  ;;  %v2623_v55 = vadd.f32 %v2615_v63, %v2606_v30  ;;  %v2783_v22 = vadd.f32 %v2775_v36, %v2766_v49  ;;  %v2604_v46 = vadd.f32 %v5923_v3, %v2587_v14  ;;  %v2789_v19 = vld [vmem:[#allocation2 + $0xc0] sm:$0xff]  ;;  %v2630_v3 = vld [vmem:[#allocation2 + $0x88] sm:$0xff]  ;;  %v2791_v14 = vld [vmem:[#allocation2 + $0xd0] sm:$0xff] }
 0x885   : > { %v2764_v33 = vadd.f32 %v2756_v47, %v2747_v43  ;;  %v2622_v57 = vadd.f32 %v2614_v26, %v2605_v6  ;;  %v2782_v34 = vadd.f32 %v2774_v24, %v2765_v52  ;;  %v2632_v12 = vld [vmem:[#allocation2 + $0x98] sm:$0xff]  ;;  %v2795_v20 = vld [vmem:[#allocation2 + $0xf0] sm:$0xff]  ;;  %v3827_v43 = vld [vmem:[%s4702_s0 + $0x28] sm:$0xff] }
 0x886   : > { %2713 = vmatpush.msra.mxu1 %v2626_v0  ;;  %2830 = vmatpush.msra.mxu3 %v2786_v48  ;;  %v2621_v45 = vadd.f32 %v2613_v41, %v2604_v46  ;;  %v2636_v16 = vld [vmem:[#allocation2 + $0xb8] sm:$0xff]  ;;  %v3828_v63 = vld [vmem:[%s4702_s0 + $0x30] sm:$0xff]  ;;  %v3826_v41 = vld [vmem:[%s4702_s0 + $0x20] sm:$0xff] }
 0x887   : > { %v2781_v32 = vadd.f32 %v2773_v54, %v2764_v33  ;;  %3307 = vmatpush.bf16.msrb.mxu0 %v3828_v63 }
 0x888   : > { %2714 = vmatpush.msra.mxu1 %v2625_v60  ;;  %2831 = vmatpush.msra.mxu3 %v2785_v28 }
 0x88a   : > { %2715 = vmatpush.msra.mxu1 %v2624_v11  ;;  %2832 = vmatpush.msra.mxu3 %v2784_v15 }
 0x88b   : > { %3308 = vmatpush.bf16.msrb.mxu0 %v3827_v43 }
 0x88c   : > { %2716 = vmatpush.msra.mxu1 %v2623_v55  ;;  %2833 = vmatpush.msra.mxu3 %v2783_v22 }
 0x88e   : > { %2717 = vmatpush.msra.mxu1 %v2622_v57  ;;  %2834 = vmatpush.msra.mxu3 %v2782_v34 }
 0x88f   : > { %3309 = vmatpush.bf16.msrb.mxu0 %v3826_v41 }
 0x890   : > { %2718 = vmatpush.msra.mxu1 %v2621_v45  ;;  %2835 = vmatpush.msra.mxu3 %v2781_v32 }
 0x892   : > { %2719 = vmatpush.msra.mxu1 %v5863_v10  ;;  %2836 = vmatpush.msra.mxu3 %v5865_v29  ;;  %v2792_v10 = vld [vmem:[#allocation2 + $0xd8] sm:$0xff]  ;;  %v2633_v29 = vld [vmem:[#allocation2 + $0xa0] sm:$0xff] }
 0x893   : > { %3749 = vmatmul.msk.f32.vlgmr.msra.gmra.mxu1 %vm1229_vm13, %v2629_v18  ;;  %3757 = vmatmul.msk.f32.vlgmr.msra.gmra.mxu3 %vm1229_vm13, %v2789_v19  ;;  %v3825_v18 = vld [vmem:[%s4702_s0 + $0x18] sm:$0xff] }
 0x894   : > { %3310 = vmatpush.bf16.msrb.mxu0 %v3825_v18 }
 0x89b   : > { %3750 = vmatmul.msk.f32.gmra.mxu1 %vm1229_vm13, %v2630_v3  ;;  %3758 = vmatmul.msk.f32.gmra.mxu3 %vm1229_vm13, %v2790_v37 }
 0x8a3   : > { %3751 = vmatmul.msk.f32.gmra.mxu1 %vm1229_vm13, %v2631_v35  ;;  %3759 = vmatmul.msk.f32.gmra.mxu3 %vm1229_vm13, %v2791_v14 }
 0x8ab   : > { %3752 = vmatmul.msk.f32.gmra.mxu1 %vm1229_vm13, %v2632_v12  ;;  %3760 = vmatmul.msk.f32.gmra.mxu3 %vm1229_vm13, %v2792_v10 }
 0x8b3   : > { %3753 = vmatmul.msk.f32.gmra.mxu1 %vm1229_vm13, %v2633_v29  ;;  %3761 = vmatmul.msk.f32.gmra.mxu3 %vm1229_vm13, %v2793_v23  ;;  %v3824_v29 = vld [vmem:[%s4702_s0 + $0x10] sm:$0xff] }
 0x8b4   : > { %3311 = vmatpush.bf16.msrb.mxu0 %v3824_v29 }
 0x8bb   : > { %3754 = vmatmul.msk.f32.gmra.mxu1 %vm1229_vm13, %v2634_v59  ;;  %3762 = vmatmul.msk.f32.gmra.mxu3 %vm1229_vm13, %v2794_v31 }
 0x8c3   : > { %3755 = vmatmul.msk.f32.gmra.mxu1 %vm1229_vm13, %v2635_v58  ;;  %3763 = vmatmul.msk.f32.gmra.mxu3 %vm1229_vm13, %v2795_v20 }
 0x8cb   : > { %3756 = vmatmul.msk.f32.gmra.mxu1 %vm1229_vm13, %v2636_v16  ;;  %3764 = vmatmul.msk.f32.gmra.mxu3 %vm1229_vm13, %v2796_v39 }
 0x910   : > { %v2721_v61 = vpop.f32.mrf.mxu1 }
 0x911   : > { %v2722_v51 = vadd.f32 %v2721_v61, %v5867_v5 }
 0x916   : > { %v2838_v25 = vpop.f32.mrf.mxu3 }
 0x917   : > { %v2862_v7 = vadd.f32 %v2838_v25, %v2722_v51 }
 0x918   : > { %v2724_v27 = vpop.f32.mrf.mxu1 }
 0x919   : > { %v6036_v62 = vadd.f32 %v6033_v40, %v2862_v7  ;;  %v2725_v1 = vadd.f32 %v2724_v27, %v5879_v42 }
 0x91b   : > { %v6039_v13 = vmul.f32 0.70710677, %v6036_v62 }
 0x91d   : > { %v2898_v5 = vmul.f32 %v6039_v13, %v6039_v13 }
 0x91e   : > { %v2841_v8 = vpop.f32.mrf.mxu3 }
 0x91f   : > { %v6045_v0 = vmin.f32 %v2898_v5, 16.0  ;;  %v2863_v48 = vadd.f32 %v2841_v8, %v2725_v1 }
 0x920   : > { %v2727_v4 = vpop.f32.mrf.mxu1 }
 0x921   : > { %v2900_v36 = vmul.f32 2.1237322e-06, %v6045_v0  ;;  %v2911_v2 = vmul.f32 3.8918573e-05, %v6045_v0  ;;  %v6051_v44 = vadd.f32 %v6033_v40, %v2863_v48  ;;  %v2728_v22 = vadd.f32 %v2727_v4, %v5891_v38 }
 0x923   : > { %v2901_v60 = vadd.f32 0.00028619796, %v2900_v36  ;;  %v2912_v28 = vadd.f32 0.001143296, %v2911_v2  ;;  %v6054_v42 = vmul.f32 0.70710677, %v6051_v44 }
 0x924   : > { %v3823_v2 = vld [vmem:[%s4702_s0 + $0x8] sm:$0xff] }
 0x925   : > { %v2902_v26 = vmul.f32 %v2901_v60, %v6045_v0  ;;  %v2913_v24 = vmul.f32 %v2912_v28, %v6045_v0  ;;  %v2938_v30 = vmul.f32 %v6054_v42, %v6054_v42  ;;  %3312 = vmatpush.bf16.msrb.mxu0 %v3823_v2 }
 0x926   : > { %v2844_v49 = vpop.f32.mrf.mxu3 }
 0x927   : > { %v2914_v11 = vadd.f32 0.014752088, %v2913_v24  ;;  %v6061_v15 = vmin.f32 %v2938_v30, 16.0  ;;  %v2903_v54 = vadd.f32 0.0036580483, %v2902_v26  ;;  %v2864_v34 = vadd.f32 %v2844_v49, %v2728_v22 }
 0x928   : > { %v2730_v47 = vpop.f32.mrf.mxu1 }
 0x929   : > { %v2915_v6 = vmul.f32 %v2914_v11, %v6045_v0  ;;  %v2940_v52 = vmul.f32 2.1237322e-06, %v6061_v15  ;;  %v2951_v55 = vmul.f32 3.8918573e-05, %v6061_v15  ;;  %v2904_v45 = vmul.f32 %v2903_v54, %v6045_v0 }
 0x92a   : > { %v6074_v12 = vadd.f32 %v6033_v40, %v2864_v34  ;;  %v2731_v1 = vadd.f32 %v2730_v47, %v5902_v56  ;;  %v3822_v47 = vld [vmem:[%s4702_s0] sm:$0xff] }
 0x92b   : > { %v2916_v46 = vadd.f32 0.112945676, %v2915_v6  ;;  %v2941_v33 = vadd.f32 0.00028619796, %v2940_v52  ;;  %v2952_v57 = vadd.f32 0.001143296, %v2951_v55  ;;  %3313 = vmatpush.bf16.msrb.mxu0 %v3822_v47 }
 0x92c   : > { %v2905_v23 = vadd.f32 0.05243302, %v2904_v45  ;;  %v6081_v39 = vmul.f32 0.70710677, %v6074_v12 }
 0x92d   : > { %v2917_v32 = vmul.f32 %v2916_v46, %v6045_v0  ;;  %v2942_v19 = vmul.f32 %v2941_v33, %v6061_v15  ;;  %v2953_v3 = vmul.f32 %v2952_v57, %v6061_v15 }
 0x92e   : > { %v2847_v37 = vpop.f32.mrf.mxu3  ;;  %v2906_v61 = vmul.f32 %v2905_v23, %v6045_v0  ;;  %v2978_v63 = vmul.f32 %v6081_v39, %v6081_v39 }
 0x92f   : > { %v2918_v35 = vadd.f32 0.4994258, %v2917_v32  ;;  %v2943_v14 = vadd.f32 0.0036580483, %v2942_v19  ;;  %v2954_v38 = vadd.f32 0.014752088, %v2953_v3  ;;  %v2865_v28 = vadd.f32 %v2847_v37, %v2731_v1 }
 0x930   : > { %v2733_v10 = vpop.f32.mrf.mxu1  ;;  %v2907_v48 = vadd.f32 0.18741608, %v2906_v61  ;;  %v6101_v49 = vmin.f32 %v2978_v63, 16.0 }
 0x931   : > { %v2919_v59 = vmul.f32 %v2918_v35, %v6045_v0  ;;  %v2944_v31 = vmul.f32 %v2943_v14, %v6061_v15  ;;  %v2955_v58 = vmul.f32 %v2954_v38, %v6061_v15  ;;  %v2734_v25 = vadd.f32 %v2733_v10, %v5913_v21 }
 0x932   : > { %v2908_v24 = vmul.f32 %v2907_v48, %v6045_v0  ;;  %v6109_v22 = vadd.f32 %v6033_v40, %v2865_v28  ;;  %v2991_v32 = vmul.f32 3.8918573e-05, %v6101_v49  ;;  %v6121_v35 = vmul.f32 0.5, %v6051_v44 }
 0x933   : > { %v2920_v20 = vadd.f32 1.0, %v2919_v59  ;;  %v2956_v16 = vadd.f32 0.112945676, %v2955_v58  ;;  %v2945_v51 = vadd.f32 0.05243302, %v2944_v31 }
 0x934   : > { %v2909_v57 = vadd.f32 1.1283791, %v2908_v24  ;;  %v2980_v14 = vmul.f32 2.1237322e-06, %v6101_v49  ;;  %v6125_v10 = vmul.f32 0.70710677, %v6109_v22 }
 0x935   : > { %4127 = vrcp.f32 %v2920_v20  ;;  %v2957_v7 = vmul.f32 %v2956_v16, %v6061_v15  ;;  %v2946_v4 = vmul.f32 %v2945_v51, %v6061_v15  ;;  %v2930_v52 = vand.u32 2147483647, %v2920_v20 }
 0x936   : > { %v2850_v27 = vpop.f32.mrf.mxu3  ;;  %v2932_v55 = vand.u32 2147483648, %v2920_v20  ;;  %vm2926_vm14 = vweird.f32 %v2920_v20  ;;  %v2910_v23 = vmul.f32 %v2909_v57, %v6039_v13  ;;  %v2992_v51 = vadd.f32 0.001143296, %v2991_v32 }
 0x937   : > { %v2866_v9 = vadd.f32 %v2850_v27, %v2734_v25  ;;  %v2958_v5 = vadd.f32 0.4994258, %v2957_v7  ;;  %v2947_v30 = vadd.f32 0.18741608, %v2946_v4  ;;  %vm2931_vm11 = vcmp.eq.f32.partialorder %v2930_v52, 8.507059e+37 }
 0x938   : > { %v2736_v8 = vpop.f32.mrf.mxu1  ;;  %v2933_v37 = vor.u32 1.1754944e-38, %v2932_v55  ;;  %v2981_v7 = vadd.f32 0.00028619796, %v2980_v14 }
 0x939   : > { %v6091_v36 = vadd.f32 %v6033_v40, %v2866_v9  ;;  %v2959_v21 = vmul.f32 %v2958_v5, %v6061_v15  ;;  %v2737_v54 = vadd.f32 %v2736_v8, %v5919_v50  ;;  %v2948_v34 = vmul.f32 %v2947_v30, %v6061_v15 }
 0x93b   : > { %v4128_v60 = vpop.eup %4127  ;;  %v6096_v43 = vmul.f32 0.70710677, %v6091_v36  ;;  %v6098_v26 = vadd.f32 1.0, %v2959_v21 }
 0x93c   : > { %v2922_v56 = vmul.f32 %v4128_v60, %v2920_v20  ;;  %vm2927_vm13 = vweird.f32 %v4128_v60  ;;  %v2949_v20 = vadd.f32 1.1283791, %v2948_v34 }
 0x93d   : > { %v3058_v11 = vmul.f32 %v6096_v43, %v6096_v43  ;;  %4129 = vrcp.f32 %v6098_v26  ;;  %vm2928_vm15 = vmor %vm2926_vm14, %vm2927_vm13  ;;  %v2970_v13 = vand.u32 2147483647, %v6098_v26  ;;  %v2972_v1 = vand.u32 2147483648, %v6098_v26 }
 0x93e   : > { %v2923_v41 = vsub.f32 1.0, %v2922_v56  ;;  %v2853_v6 = vpop.f32.mrf.mxu3  ;;  %v2950_v63 = vmul.f32 %v2949_v20, %v6054_v42  ;;  %vm2966_vm4 = vweird.f32 %v6098_v26 }
 0x93f   : > { %v6111_v46 = vmin.f32 %v3058_v11, 16.0  ;;  %v2867_v33 = vadd.f32 %v2853_v6, %v2737_v54  ;;  %vm2971_vm12 = vcmp.eq.f32.partialorder %v2970_v13, 8.507059e+37  ;;  %v2973_v47 = vor.u32 1.1754944e-38, %v2972_v1 }
 0x940   : > { %v2924_v0 = vmul.f32 %v4128_v60, %v2923_v41  ;;  %v2739_v45 = vpop.f32.mrf.mxu1 }
 0x941   : > { %v3060_v18 = vmul.f32 2.1237322e-06, %v6111_v46  ;;  %v3071_v19 = vmul.f32 3.8918573e-05, %v6111_v46  ;;  %v6118_v3 = vadd.f32 %v6033_v40, %v2867_v33  ;;  %v2740_v58 = vadd.f32 %v2739_v45, %v5952_v53 }
 0x942   : > { %v2925_v50 = vadd.f32 %v4128_v60, %v2924_v0 }
 0x943   : > { %v4130_v38 = vpop.eup %4129  ;;  %v3072_v29 = vadd.f32 0.001143296, %v3071_v19  ;;  %v3061_v16 = vadd.f32 0.00028619796, %v3060_v18  ;;  %v6132_v27 = vmul.f32 0.70710677, %v6118_v3  ;;  %v2982_v18 = vmul.f32 %v2981_v7, %v6101_v49 }
 0x944   : > { %v2929_v15 = vsel %vm2928_vm15, %v4128_v60, %v2925_v50  ;;  %v2962_v31 = vmul.f32 %v4130_v38, %v6098_v26  ;;  %vm2967_vm7 = vweird.f32 %v4130_v38  ;;  %v2993_v60 = vmul.f32 %v2992_v51, %v6101_v49 }
 0x945   : > { %v2934_v59 = vsel %vm2931_vm11, %v2933_v37, %v2929_v15  ;;  %v3073_v44 = vmul.f32 %v3072_v29, %v6111_v46  ;;  %v3098_v53 = vmul.f32 %v6132_v27, %v6132_v27  ;;  %v3062_v2 = vmul.f32 %v3061_v16, %v6111_v46  ;;  %vm2968_vm9 = vmor %vm2966_vm4, %vm2967_vm7 }
 0x946   : > { %v2856_v61 = vpop.f32.mrf.mxu3  ;;  %v2963_v25 = vsub.f32 1.0, %v2962_v31  ;;  %v2935_v5 = vmul.f32 %v2934_v59, %v2910_v23  ;;  %v3018_v19 = vmul.f32 %v6125_v10, %v6125_v10  ;;  %v2994_v23 = vadd.f32 0.014752088, %v2993_v60 }
 0x947   : > { %v2868_v9 = vadd.f32 %v2856_v61, %v2740_v58  ;;  %v3074_v8 = vadd.f32 0.014752088, %v3073_v44  ;;  %v6146_v56 = vmin.f32 %v3098_v53, 16.0  ;;  %v3063_v55 = vadd.f32 0.0036580483, %v3062_v2 }
 0x948   : > { %v2964_v48 = vmul.f32 %v4130_v38, %v2963_v25  ;;  %v2742_v30 = vpop.f32.mrf.mxu1  ;;  %v3765_v11 = vclamps-f32 %v2935_v5, 1.0  ;;  %v2882_v51 = vmul.f32 0.5, %v6036_v62  ;;  %v2983_v25 = vadd.f32 0.0036580483, %v2982_v18 }
 0x949   : > { %v6139_v4 = vadd.f32 %v6033_v40, %v2868_v9  ;;  %v3075_v21 = vmul.f32 %v3074_v8, %v6111_v46  ;;  %v3100_v54 = vmul.f32 2.1237322e-06, %v6146_v56  ;;  %v3111_v6 = vmul.f32 3.8918573e-05, %v6146_v56 }
 0x94a   : > { %v2965_v28 = vadd.f32 %v4130_v38, %v2964_v48  ;;  %v2743_v33 = vadd.f32 %v2742_v30, %v5980_v17  ;;  %v3218_v17 = vadd.f32 1.0, %v3765_v11  ;;  %v3064_v16 = vmul.f32 %v3063_v55, %v6111_v46 }
 0x94b   : > { %v6149_v24 = vmul.f32 0.70710677, %v6139_v4  ;;  %v3076_v42 = vadd.f32 0.112945676, %v3075_v21  ;;  %v3101_v45 = vadd.f32 0.00028619796, %v3100_v54  ;;  %v2995_v48 = vmul.f32 %v2994_v23, %v6101_v49 }
 0x94c   : > { %v2969_v41 = vsel %vm2968_vm9, %v4130_v38, %v2965_v28  ;;  %v3112_v32 = vadd.f32 0.001143296, %v3111_v6  ;;  %v6174_v5 = vmin.f32 %v3018_v19, 16.0  ;;  %v3226_v8 = vmul.f32 %v3218_v17, %v2882_v51 }
 0x94d   : > { %v3138_v52 = vmul.f32 %v6149_v24, %v6149_v24  ;;  %v2974_v26 = vsel %vm2971_vm12, %v2973_v47, %v2969_v41  ;;  %v3077_v0 = vmul.f32 %v3076_v42, %v6111_v46  ;;  %v3102_v15 = vmul.f32 %v3101_v45, %v6146_v56 }
 0x94e   : > { %v2859_v57 = vpop.f32.mrf.mxu3  ;;  %v2975_v34 = vmul.f32 %v2974_v26, %v2950_v63  ;;  %v3113_v29 = vmul.f32 %v3112_v32, %v6146_v56  ;;  %v3065_v53 = vadd.f32 0.05243302, %v3064_v16  ;;  %v2984_v60 = vmul.f32 %v2983_v25, %v6101_v49 }
 0x94f   : > { %v6157_v50 = vmin.f32 %v3138_v52, 16.0  ;;  %v3078_v37 = vadd.f32 0.4994258, %v3077_v0  ;;  %v2869_v14 = vadd.f32 %v2859_v57, %v2743_v33  ;;  %v3103_v44 = vadd.f32 0.0036580483, %v3102_v15 }
 0x950   : > { %v3766_v38 = vclamps-f32 %v2975_v34, 1.0  ;;  %v3114_v61 = vadd.f32 0.014752088, %v3113_v29  ;;  %v3020_v28 = vmul.f32 2.1237322e-06, %v6174_v5  ;;  %v3066_v54 = vmul.f32 %v3065_v53, %v6111_v46 }
 0x951   : > { %v3079_v59 = vmul.f32 %v3078_v37, %v6111_v46  ;;  %v3151_v31 = vmul.f32 3.8918573e-05, %v6157_v50  ;;  %v6167_v58 = vadd.f32 %v6033_v40, %v2869_v14  ;;  %v3140_v40 = vmul.f32 2.1237322e-06, %v6157_v50 }
 0x952   : > { %v3219_v20 = vadd.f32 1.0, %v3766_v38  ;;  %v3115_v13 = vmul.f32 %v3114_v61, %v6146_v56  ;;  %v3104_v62 = vmul.f32 %v3103_v44, %v6146_v56  ;;  %v2996_v41 = vadd.f32 0.112945676, %v2995_v48 }
 0x953   : > { %v6171_v7 = vadd.f32 1.0, %v3079_v59  ;;  %v3152_v1 = vadd.f32 0.001143296, %v3151_v31  ;;  %v3141_v11 = vadd.f32 0.00028619796, %v3140_v40 }
 0x954   : > { %v3227_v9 = vmul.f32 %v3219_v20, %v6121_v35  ;;  %v3116_v63 = vadd.f32 0.112945676, %v3115_v13  ;;  %v6183_v35 = vmul.f32 0.70710677, %v6167_v58  ;;  %v3105_v6 = vadd.f32 0.05243302, %v3104_v62 }
 0x955   : > { %4131 = vrcp.f32 %v6171_v7  ;;  %v3153_v2 = vmul.f32 %v3152_v1, %v6157_v50  ;;  %v2997_v33 = vmul.f32 %v2996_v41, %v6101_v49  ;;  %v3031_v57 = vmul.f32 3.8918573e-05, %v6174_v5 }
 0x956   : > { %v3234_v21 = vpack.c.bf16 %v3227_v9, %v3226_v8  ;;  %v3117_v30 = vmul.f32 %v3116_v63, %v6146_v56  ;;  %v3178_v42 = vmul.f32 %v6183_v35, %v6183_v35  ;;  %v2985_v34 = vadd.f32 0.05243302, %v2984_v60 }
 0x957   : > { %v3154_v47 = vadd.f32 0.014752088, %v3153_v2  ;;  %v3021_v18 = vadd.f32 0.00028619796, %v3020_v28  ;;  %v3142_v19 = vmul.f32 %v3141_v11, %v6157_v50  ;;  %v3106_v15 = vmul.f32 %v3105_v6, %v6146_v56 }
 0x958   : > { %3314 = vmatmul.bf16.vlgmr.msrb.gmra.mxu0 %v3234_v21  ;;  %v3118_v52 = vadd.f32 0.4994258, %v3117_v30  ;;  %v6194_v0 = vmin.f32 %v3178_v42, 16.0  ;;  %v3067_v17 = vadd.f32 0.18741608, %v3066_v54  ;;  %v6210_v44 = vmul.f32 %v2985_v34, %v6101_v49 }
 0x959   : > { %v3155_v55 = vmul.f32 %v3154_v47, %v6157_v50  ;;  %v2998_v31 = vadd.f32 0.4994258, %v2997_v33  ;;  %v3032_v20 = vadd.f32 0.001143296, %v3031_v57  ;;  %v3143_v51 = vadd.f32 0.0036580483, %v3142_v19 }
 0x95a   : > { %v3119_v32 = vmul.f32 %v3118_v52, %v6146_v56  ;;  %v3180_v14 = vmul.f32 2.1237322e-06, %v6194_v0  ;;  %v3191_v23 = vmul.f32 3.8918573e-05, %v6194_v0  ;;  %v3107_v25 = vadd.f32 0.18741608, %v3106_v15 }
 0x95b   : > { %v6191_v26 = vpop.eup %4131  ;;  %v3156_v37 = vadd.f32 0.112945676, %v3155_v55  ;;  %v2999_v1 = vmul.f32 %v2998_v31, %v6101_v49  ;;  %v3022_v8 = vmul.f32 %v3021_v18, %v6174_v5  ;;  %v3068_v40 = vmul.f32 %v3067_v17, %v6111_v46 }
 0x95c   : > { %v3082_v45 = vmul.f32 %v6191_v26, %v6171_v7  ;;  %v6204_v29 = vadd.f32 1.0, %v3119_v32  ;;  %v3181_v16 = vadd.f32 0.00028619796, %v3180_v14  ;;  %v3192_v13 = vadd.f32 0.001143296, %v3191_v23 }
 0x95d   : > { %v3157_v59 = vmul.f32 %v3156_v37, %v6157_v50  ;;  %v3090_v48 = vand.u32 2147483647, %v6171_v7  ;;  %v3033_v53 = vmul.f32 %v3032_v20, %v6174_v5  ;;  %v6221_v21 = vadd.f32 1.0, %v2999_v1 }
 0x95e   : > { %v3083_v38 = vsub.f32 1.0, %v3082_v45  ;;  %4133 = vrcp.f32 %v6204_v29  ;;  %v3182_v63 = vmul.f32 %v3181_v16, %v6194_v0  ;;  %v3193_v2 = vmul.f32 %v3192_v13, %v6194_v0 }
 0x95f   : > { %v3158_v9 = vadd.f32 0.4994258, %v3157_v59  ;;  %vm3087_vm0 = vweird.f32 %v6191_v26  ;;  %v3092_v28 = vand.u32 2147483648, %v6171_v7  ;;  %v3144_v46 = vmul.f32 %v3143_v51, %v6157_v50 }
 0x960   : > { %v3084_v61 = vmul.f32 %v6191_v26, %v3083_v38  ;;  %v3108_v11 = vmul.f32 %v3107_v25, %v6146_v56  ;;  %v3194_v42 = vadd.f32 0.014752088, %v3193_v2  ;;  %4135 = vrcp.f32 %v6221_v21 }
 0x961   : > { %v3159_v62 = vmul.f32 %v3158_v9, %v6157_v50  ;;  %v3023_v41 = vadd.f32 0.0036580483, %v3022_v8  ;;  %vm3086_vm3 = vweird.f32 %v6171_v7  ;;  %v3034_v6 = vadd.f32 0.014752088, %v3033_v53 }
 0x962   : > { %v3085_v60 = vadd.f32 %v6191_v26, %v3084_v61  ;;  %v3069_v52 = vadd.f32 1.1283791, %v3068_v40  ;;  %vm6233_vm5 = vmor %vm3086_vm3, %vm3087_vm0  ;;  %vm6237_vm2 = vcmp.eq.f32.partialorder %v3090_v48, 8.507059e+37  ;;  %v3183_v56 = vadd.f32 0.0036580483, %v3182_v63 }
 0x963   : > { %v6228_v47 = vadd.f32 1.0, %v3159_v62  ;;  %v3145_v34 = vadd.f32 0.05243302, %v3144_v46  ;;  %v3195_v45 = vmul.f32 %v3194_v42, %v6194_v0  ;;  %v3093_v32 = vor.u32 1.1754944e-38, %v3092_v28 }
 0x964   : > { %v4134_v30 = vpop.eup %4133  ;;  %v3089_v57 = vsel %vm6233_vm5, %v6191_v26, %v3085_v60  ;;  %v3109_v18 = vadd.f32 1.1283791, %v3108_v11  ;;  %v3130_v19 = vand.u32 2147483647, %v6204_v29  ;;  %v3132_v37 = vand.u32 2147483648, %v6204_v29 }
 0x965   : > { %v3122_v54 = vmul.f32 %v4134_v30, %v6204_v29  ;;  %4137 = vrcp.f32 %v6228_v47  ;;  %vm3127_vm6 = vweird.f32 %v4134_v30  ;;  %v3196_v38 = vadd.f32 0.112945676, %v3195_v45 }
 0x966   : > { %v3035_v15 = vmul.f32 %v3034_v6, %v6174_v5  ;;  %v6249_v23 = vpop.eup %4135  ;;  %v3024_v17 = vmul.f32 %v3023_v41, %v6174_v5  ;;  %v3070_v26 = vmul.f32 %v3069_v52, %v6096_v43  ;;  %v3094_v59 = vsel %vm6237_vm2, %v3093_v32, %v3089_v57 }
 0x967   : > { %v3123_v7 = vsub.f32 1.0, %v3122_v54  ;;  %v3184_v31 = vmul.f32 %v3183_v56, %v6194_v0  ;;  %vm3126_vm8 = vweird.f32 %v6204_v29  ;;  %v3146_v16 = vmul.f32 %v3145_v34, %v6157_v50 }
 0x968   : > { %v3197_v61 = vmul.f32 %v3196_v38, %v6194_v0  ;;  %v3110_v25 = vmul.f32 %v3109_v18, %v6132_v27  ;;  %vm3128_vm10 = vmor %vm3126_vm8, %vm3127_vm6  ;;  %v3133_v9 = vor.u32 1.1754944e-38, %v3132_v37  ;;  %v3002_v43 = vmul.f32 %v6249_v23, %v6221_v21 }
 0x969   : > { %v3124_v14 = vmul.f32 %v4134_v30, %v3123_v7  ;;  %v3036_v13 = vadd.f32 0.112945676, %v3035_v15  ;;  %v3095_v1 = vmul.f32 %v3094_v59, %v3070_v26  ;;  %vm3131_vm13 = vcmp.eq.f32.partialorder %v3130_v19, 8.507059e+37 }
 0x96a   : > { %v3185_v48 = vadd.f32 0.05243302, %v3184_v31  ;;  %v3198_v53 = vadd.f32 0.4994258, %v3197_v61  ;;  %v3025_v63 = vadd.f32 0.05243302, %v3024_v17  ;;  %vm3166_vm15 = vweird.f32 %v6228_v47 }
 0x96b   : > { %v3125_v20 = vadd.f32 %v4134_v30, %v3124_v14  ;;  %v6259_v51 = vpop.eup %4137  ;;  %v3037_v62 = vmul.f32 %v3036_v13, %v6174_v5  ;;  %v3147_v2 = vadd.f32 0.18741608, %v3146_v16  ;;  %v3003_v46 = vsub.f32 1.0, %v3002_v43 }
 0x96c   : > { %v3162_v29 = vmul.f32 %v6259_v51, %v6228_v47  ;;  %v3199_v28 = vmul.f32 %v3198_v53, %v6194_v0  ;;  %v2987_v42 = vadd.f32 0.18741608, %v6210_v44  ;;  %v3186_v41 = vmul.f32 %v3185_v48, %v6194_v0 }
 0x96d   : > { %v3129_v8 = vsel %vm3128_vm10, %v4134_v30, %v3125_v20  ;;  %v3038_v11 = vadd.f32 0.4994258, %v3037_v62  ;;  %v3769_v52 = vclamps-f32 %v3095_v1, 1.0  ;;  %v3026_v55 = vmul.f32 %v3025_v63, %v6174_v5 }
 0x96e   : > { %v3134_v40 = vsel %vm3131_vm13, %v3133_v9, %v3129_v8  ;;  %v3163_v27 = vsub.f32 1.0, %v3162_v29  ;;  %v6271_v54 = vadd.f32 1.0, %v3199_v28  ;;  %v2886_v33 = vmul.f32 0.5, %v6091_v36 }
 0x96f   : > { %v3135_v60 = vmul.f32 %v3134_v40, %v3110_v25  ;;  %v3039_v6 = vmul.f32 %v3038_v11, %v6174_v5  ;;  %v3148_v56 = vmul.f32 %v3147_v2, %v6157_v50  ;;  %v3004_v57 = vmul.f32 %v6249_v23, %v3003_v46 }
 0x970   : > { %v3164_v30 = vmul.f32 %v6259_v51, %v3163_v27  ;;  %4139 = vrcp.f32 %v6271_v54  ;;  %vm3167_vm14 = vweird.f32 %v6259_v51  ;;  %v3172_v34 = vand.u32 2147483648, %v6228_v47 }
 0x971   : > { %v3770_v44 = vclamps-f32 %v3135_v60, 1.0  ;;  %v6282_v45 = vadd.f32 1.0, %v3039_v6  ;;  %v2988_v32 = vmul.f32 %v2987_v42, %v6101_v49  ;;  %v2887_v18 = vmul.f32 0.5, %v6118_v3  ;;  %vm6289_vm11 = vmor %vm3166_vm15, %vm3167_vm14 }
 0x972   : > { %v3165_v7 = vadd.f32 %v6259_v51, %v3164_v30  ;;  %v3187_v36 = vadd.f32 0.18741608, %v3186_v41  ;;  %v3222_v19 = vadd.f32 1.0, %v3769_v52  ;;  %v3027_v50 = vadd.f32 0.18741608, %v3026_v55 }
 0x973   : > { %v3170_v37 = vand.u32 2147483647, %v6228_v47  ;;  %4141 = vrcp.f32 %v6282_v45  ;;  %v3149_v14 = vadd.f32 1.1283791, %v3148_v56  ;;  %v3005_v15 = vadd.f32 %v6249_v23, %v3004_v57 }
 0x974   : > { %vm3007_vm7 = vweird.f32 %v6249_v23  ;;  %v3223_v49 = vadd.f32 1.0, %v3770_v44  ;;  %v3169_v3 = vsel %vm6289_vm11, %v6259_v51, %v3165_v7  ;;  %v3173_v17 = vor.u32 1.1754944e-38, %v3172_v34  ;;  %v6577_v51 = vld [vmem:[#allocation29_spill] sm:$0xff] }
 0x975   : > { %vm3006_vm4 = vweird.f32 %v6221_v21  ;;  %v3012_v47 = vand.u32 2147483648, %v6221_v21  ;;  %v3188_v59 = vmul.f32 %v3187_v36, %v6194_v0  ;;  %v3010_v31 = vand.u32 2147483647, %v6221_v21 }
 0x976   : > { %v4140_v26 = vpop.eup %4139  ;;  %v6302_v20 = vmul.f32 %v3222_v19, %v2886_v33  ;;  %v6304_v16 = vmul.f32 %v3223_v49, %v2887_v18  ;;  %v2989_v61 = vadd.f32 1.1283791, %v2988_v32  ;;  %vm3171_vm9 = vcmp.eq.f32.partialorder %v3170_v37, 8.507059e+37  ;;  %vm6307_vm12 = vmor %vm3006_vm4, %vm3007_vm7 }
 0x977   : > { %v3202_v25 = vmul.f32 %v4140_v26, %v6271_v54  ;;  %v3028_v9 = vmul.f32 %v3027_v50, %v6174_v5  ;;  %v3174_v43 = vsel %vm3171_vm9, %v3173_v17, %v3169_v3  ;;  %v3009_v0 = vsel %vm6307_vm12, %v6249_v23, %v3005_v15 }
 0x978   : > { %v3236_v21 = vpack.c.bf16 %v6304_v16, %v6302_v20  ;;  %v3150_v1 = vmul.f32 %v3149_v14, %v6149_v24  ;;  %v3212_v29 = vand.u32 2147483648, %v6271_v54  ;;  %v3013_v40 = vor.u32 1.1754944e-38, %v3012_v47  ;;  %v6576_v20 = vld [vmem:[#allocation28_spill] sm:$0xff] }
 0x979   : > { %v4142_v13 = vpop.eup %4141  ;;  %v3203_v8 = vsub.f32 1.0, %v3202_v25  ;;  %v3189_v48 = vadd.f32 1.1283791, %v3188_v59  ;;  %v3210_v53 = vand.u32 2147483647, %v6271_v54  ;;  %vm3011_vm0 = vcmp.eq.f32.partialorder %v3010_v31, 8.507059e+37 }
 0x97a   : > { %v3042_v5 = vmul.f32 %v4142_v13, %v6282_v45  ;;  %v3175_v62 = vmul.f32 %v3174_v43, %v3150_v1  ;;  %vm3207_vm3 = vweird.f32 %v4140_v26  ;;  %v3014_v23 = vsel %vm3011_vm0, %v3013_v40, %v3009_v0 }
 0x97b   : > { %v3204_v63 = vmul.f32 %v4140_v26, %v3203_v8  ;;  %v2990_v2 = vmul.f32 %v2989_v61, %v6081_v39  ;;  %v3029_v27 = vadd.f32 1.1283791, %v3028_v9  ;;  %vm3206_vm5 = vweird.f32 %v6271_v54 }
 0x97c   : > { %v3043_v60 = vsub.f32 1.0, %v3042_v5  ;;  %v3213_v24 = vor.u32 1.1754944e-38, %v3212_v29  ;;  %v3052_v46 = vand.u32 2147483648, %v6282_v45  ;;  %vm3208_vm2 = vmor %vm3206_vm5, %vm3207_vm3  ;;  %vm3047_vm6 = vweird.f32 %v4142_v13  ;;  %v6580_v29 = vld [vmem:[#allocation31_spill] sm:$0xff]  ;;  %v6581_v5 = vld [vmem:[#allocation32_spill] sm:$0xff] }
 0x97d   : > { %v3205_v28 = vadd.f32 %v4140_v26, %v3204_v63  ;;  %v3015_v11 = vmul.f32 %v3014_v23, %v2990_v2  ;;  %v3050_v30 = vand.u32 2147483647, %v6282_v45  ;;  %v3190_v41 = vmul.f32 %v3189_v48, %v6183_v35  ;;  %v6583_v2 = vld [vmem:[#allocation33_spill] sm:$0xff] }
 0x97e   : > { %v3044_v42 = vmul.f32 %v4142_v13, %v3043_v60  ;;  %vm3211_vm8 = vcmp.eq.f32.partialorder %v3210_v53, 8.507059e+37  ;;  %v3771_v52 = vclamps-f32 %v3175_v62, 1.0  ;;  %vm3046_vm10 = vweird.f32 %v6282_v45 }
 0x97f   : > { %v3209_v6 = vsel %vm3208_vm2, %v4140_v26, %v3205_v28  ;;  %vm3048_vm13 = vmor %vm3046_vm10, %vm3047_vm6  ;;  %v3053_v54 = vor.u32 1.1754944e-38, %v3052_v46  ;;  %v3030_v56 = vmul.f32 %v3029_v27, %v6125_v10  ;;  %v3767_v57 = vclamps-f32 %v3015_v11, 1.0  ;;  %v6575_v26 = vld [vmem:[#allocation27_spill] sm:$0xff] }
 0x980   : > { %v3214_v39 = vsel %vm3211_vm8, %v3213_v24, %v3209_v6  ;;  %v3045_v55 = vadd.f32 %v4142_v13, %v3044_v42  ;;  %vm3051_vm14 = vcmp.eq.f32.partialorder %v3050_v30, 8.507059e+37  ;;  %v3224_v32 = vadd.f32 1.0, %v3771_v52  ;;  %v6586_v24 = vld [vmem:[#allocation34_spill] sm:$0xff] }
 0x981   : > { %v3215_v33 = vmul.f32 %v3214_v39, %v3190_v41  ;;  %v2888_v35 = vmul.f32 0.5, %v6139_v4  ;;  %v2889_v36 = vmul.f32 0.5, %v6167_v58  ;;  %v3220_v45 = vadd.f32 1.0, %v3767_v57  ;;  %v4012_v4 = vld [vmem:[%s815_s21] ss:$0 sm:$0xff]  ;;  %s6578_s21 = sld [smem:[#allocation17_spill]] }
 0x982   : > { %v3049_v44 = vsel %vm3048_vm13, %v4142_v13, %v3045_v55  ;;  %v2884_v10 = vmul.f32 0.5, %v6074_v12  ;;  %v2885_v38 = vmul.f32 0.5, %v6109_v22 }
 0x983   : > { %v3054_v7 = vsel %vm3051_vm14, %v3053_v54, %v3049_v44  ;;  %v3772_v34 = vclamps-f32 %v3215_v33, 1.0  ;;  %v3232_v37 = vmul.f32 %v3224_v32, %v2888_v35 }
 0x984   : > { %v3055_v18 = vmul.f32 %v3054_v7, %v3030_v56  ;;  %v3228_v3 = vmul.f32 %v3220_v45, %v2884_v10 }
 0x985   : > { %v3225_v19 = vadd.f32 1.0, %v3772_v34 }
 0x986   : > { %v3768_v50 = vclamps-f32 %v3055_v18, 1.0 }
 0x987   : > { %v3233_v14 = vmul.f32 %v3225_v19, %v2889_v36  ;;  %s3830_s13 = sshll.u32 %s6578_s21, 6 }
 0x988   : > { %v3221_v15 = vadd.f32 1.0, %v3768_v50  ;;  %s3363_s24 = scalar_lea.hbm %s6584_s5, %s3830_s13 }
 0x989   : > { %v3237_v49 = vpack.c.bf16 %v3233_v14, %v3232_v37  ;;  %s3366_s18 = sshll.u32 %s3363_s24, 4  ;;  %s3367_s18 = int_to_ptr.hbm [resolvable:$true] %s3366_s18 }
 0x98a   : > { %v3229_v17 = vmul.f32 %v3221_v15, %v2885_v38  ;;  %s4255_s9 = sshra.s32 %s3367_s18, 4  ;;  %s4256_s9 = int_to_ptr.hbm [resolvable:$true] %s4255_s9 }
 0x98b   : > { %s4257_s1 = scalar_lea.hbm %s4256_s9, 64  ;;  %p4262_p1 = scmp.lt.s32.totalorder %s4256_s9, %s6584_s5 }
 0x98c   : > { %v3235_v47 = vpack.c.bf16 %v3229_v17, %v3228_v3  ;;  %p4258_p12 = scmp.ne.s32.totalorder %s4256_s9, %s4257_s1  ;;  %p4263_p2 = scmp.lt.s32.totalorder %s4261_s27, %s4257_s1 }
 0x98e   : > { %3319 = vmatmul.bf16.gmra.mxu0 %v3235_v47  ;;  %p4259_p13 = pnand %p4258_p12, %p4602_p3  ;;  %p4264_p4 = por %p4263_p2, %p4262_p1 }
 0x990   : > { %p4260_p0 = pneg %p4259_p13 }
 0x992   : > { %p4265_p6 = pnand %p4264_p4, %p4260_p0 }
 0x99e   : > { %3324 = vmatmul.bf16.gmra.mxu0 %v3236_v21  ;;  %v6579_v21 = vld [vmem:[#allocation30_spill] sm:$0xff] }
 0x9ae   : > { %3329 = vmatmul.bf16.gmra.mxu0 %v3237_v49 }
 0x9d5   : > { %v3315_v58 = vpop.f32.mrf.mxu0 }
 0x9d6   : > { %v3316_v12 = vadd.f32 %v4012_v4, %v3315_v58 }
 0x9d8   : > { %v3335_v22 = vadd.f32 %v3316_v12, %v6575_v26 }
 0x9da   : > { %3343 = vst.msk [vmem:[%s4705_s14] sm:$0xff] %vm848_vm1, %v3335_v22 }
 0x9dd   : > { %v3317_v59 = vpop.f32.mrf.mxu0 }
 0x9de   : > { %v3318_v31 = vadd.f32 %v4012_v4, %v3317_v59 }
 0x9e0   : > { %v3336_v16 = vadd.f32 %v3318_v31, %v6576_v20 }
 0x9e2   : > { %3344 = vst.msk [vmem:[%s4705_s14 + $0x8] sm:$0xff] %vm848_vm1, %v3336_v16 }
 0xa0b   : > { %v3320_v61 = vpop.f32.mrf.mxu0 }
 0xa0c   : > { %v3321_v25 = vadd.f32 %v4012_v4, %v3320_v61 }
 0xa0e   : > { %v3337_v9 = vadd.f32 %v3321_v25, %v6577_v51 }
 0xa10   : > { %3345 = vst.msk [vmem:[%s4705_s14 + $0x10] sm:$0xff] %vm848_vm1, %v3337_v9 }
 0xa13   : > { %v3322_v43 = vpop.f32.mrf.mxu0 }
 0xa14   : > { %v3323_v0 = vadd.f32 %v4012_v4, %v3322_v43 }
 0xa16   : > { %v3338_v13 = vadd.f32 %v3323_v0, %v6579_v21 }
 0xa18   : > { %3346 = vst.msk [vmem:[%s4705_s14 + $0x18] sm:$0xff] %vm848_vm1, %v3338_v13 }
 0xa1b   : > { %v3325_v1 = vpop.f32.mrf.mxu0 }
 0xa1c   : > { %v3326_v8 = vadd.f32 %v4012_v4, %v3325_v1 }
 0xa1e   : > { %v3339_v40 = vadd.f32 %v3326_v8, %v6580_v29 }
 0xa20   : > { %3347 = vst.msk [vmem:[%s4705_s14 + $0x20] sm:$0xff] %vm848_vm1, %v3339_v40 }
 0xa23   : > { %v3327_v48 = vpop.f32.mrf.mxu0 }
 0xa24   : > { %v3328_v53 = vadd.f32 %v4012_v4, %v3327_v48 }
 0xa26   : > { %v3340_v62 = vadd.f32 %v3328_v53, %v6581_v5 }
 0xa28   : > { %3348 = vst.msk [vmem:[%s4705_s14 + $0x28] sm:$0xff] %vm848_vm1, %v3340_v62 }
 0xa2b   : > { %v3330_v63 = vpop.f32.mrf.mxu0 }
 0xa2c   : > { %v3331_v23 = vadd.f32 %v4012_v4, %v3330_v63 }
 0xa2e   : > { %v3341_v27 = vadd.f32 %v3331_v23, %v6583_v2 }
 0xa30   : > { %3349 = vst.msk [vmem:[%s4705_s14 + $0x30] sm:$0xff] %vm848_vm1, %v3341_v27 }
 0xa33   : > { %v3332_v60 = vpop.f32.mrf.mxu0 }
 0xa34   : > { %v3333_v28 = vadd.f32 %v4012_v4, %v3332_v60 }
 0xa36   : > { %v3342_v46 = vadd.f32 %v3333_v28, %v6586_v24 }
 0xa38   : > { %3350 = vst.msk [vmem:[%s4705_s14 + $0x38] sm:$0xff] %vm848_vm1, %v3342_v46 }
 0xa39   : > { %4268 = shalt.err (!%p4265_p6)
}
 0xa3a   : > { %s4380_s14 = smov 128   ;;  %s4381_s30 = smov 8  }
 0xa3b   : > { %3841 = dma.vmem_to_hbm [thread:$0]  (%p4602_p3), %s3365_s10, 1024, %s3367_s18, %s3352_s4, %s4380_s14, %s4380_s14, %s4381_s30  }
 0xa3c PF: > { %s6588_s19 = sld [smem:[#allocation20_spill]] }
 0xa3d   : > { %s6589_s26 = sld [smem:[#allocation12_spill]] }
 0xa42   : > { %p3861_p7 = scmp.ge.s32.totalorder %s6588_s19, 2 }
 0xa43   : > { %s3381_s7 = sand.u32 1, %s6589_s26  }
 0xa44   : > { %p3855_p9 = pnand %p3861_p7, %p4607_p5  ;;  %s3382_s11 = scalar_lea.sflag [#allocation4], %s3381_s7 }
 0xa46   : > { %p3856_p8 = pneg %p3855_p9 }
 0xa48   : > { %4322 = dma.done.wait (%p3856_p8), %s3382_s11, 1024  }
 0xa49   : > { %4324 = vsyncadd (%p3856_p8), %s3382_s11, 4294966272  ;;  %s33_s0 = sadd.s32 1, %s6588_s19   ;;  %s6591_s21 = sld [smem:[#allocation13_spill]] }
 0xa4a   : > { %p30_p10 = scmp.ge.s32.totalorder %s33_s0, 6   ;;  %s6592_s22 = sld [smem:[#allocation14_spill]] }
 0xa4b   : > { %s6593_s23 = sld [smem:[#allocation24_spill]] }
 0xa4c   : > { %s6594_s24 = sld [smem:[#allocation15_spill]] }
 0xa4d   : > { %s6595_s25 = sld [smem:[#allocation16_spill]] }
 0xa4e   : > { %s6596_s26 = sld [smem:[#allocation23_spill]]  ;;  %32 = sbr.rel (!%p30_p10) target bundleno = 26 (0x1a), region = 191 }
 0xa4f   : > { %s6597_s27 = sld [smem:[#allocation18_spill]] }
 0xa50   : > { %s6598_s28 = sld [smem:[#allocation19_spill]] }
 0xa51   : > { %s6599_s29 = sld [smem:[#allocation21_spill]] }
 0xa52   : > { %s6600_s30 = sld [smem:[#allocation22_spill]] }
 0xa53   :  { %3388 = vsyncpa [#allocation3], 1 }
 0xa54   :  { %3390 = vsyncpa [#allocation3 + $0x1], 1 }
 0xa55   :  { %3391 = vsyncpa [#allocation6], 1 }
 0xa56   :  { %3393 = vsyncpa [#allocation6 + $0x1], 1 }
 0xa57   :  { %3394 = vsyncpa [#allocation4], 1 }
 0xa58   :  { %3396 = vsyncpa [#allocation4 + $0x1], 1 }

</bundles_post_ra>
